<compile_context>
chip_gen: v5e
topology: v5e:2x2
jax: 0.10.0
libtpu: 0.0.40
codegen_flags: <defaults>
</compile_context>

<pallas_src>
import jax
import jax.numpy as jnp
from jax.experimental import pallas as pl
from jax.experimental.pallas import tpu as pltpu


def _round_up(n, m):
    return (n + m - 1) // m * m


def _qnet_kernel(xa_ref, w1_ref, b1_ref, w2_ref, b2_ref, w3_ref, out_ref):
    # fc1 (cat already folded into xa) + relu, f32 accumulate.
    h = jnp.dot(xa_ref[...], w1_ref[...], preferred_element_type=jnp.float32)
    h = jnp.maximum(h + b1_ref[...], 0.0)                       # f32 (TB, 512)

    # fc2 + relu (bf16 operands, f32 accumulate).
    h = jnp.dot(h.astype(jnp.bfloat16), w2_ref[...],
                preferred_element_type=jnp.float32)
    h = jnp.maximum(h + b2_ref[...], 0.0)                       # f32 (TB, 512)

    # fc3 as VPU multiply + cross-lane reduce (w3 is a (1, 512) row), no N=1 matmul.
    # Result is written lane-dense as a (1, TB) row; the relayout is an XLU op.
    o = jnp.sum(h * w3_ref[...].astype(jnp.float32), axis=-1)   # (TB,)
    out_ref[...] = o[None, :]                                    # (1, TB)


def soft_q_forward(x, a, params, *, block_b=256):
    """Batched forward.

    x: (B, obs_dim) or (obs_dim,) f32
    a: (B, act_dim) or (act_dim,) f32
    returns (B, 1) f32, or (1,) for unbatched inputs (matches the torch module).
    """
    w1, b1, w2, b2, w3r, b3 = params
    squeeze = x.ndim == 1
    if squeeze:
        x, a = x[None, :], a[None, :]

    B, obs_dim = x.shape
    act_dim = a.shape[1]
    d_in = obs_dim + act_dim
    hidden = w2.shape[0]

    # Batch tile: big (fewer grid steps amortize ~0.35us/step overhead); keep the
    # lane-dense output block either equal to the full padded batch or a multiple of 128.
    if B <= block_b:
        tb = _round_up(B, 8)
    else:
        tb = _round_up(block_b, 128)
    b_pad = _round_up(B, tb)
    grid = b_pad // tb

    # Fold torch.cat into the kernel input; concat + (optional) pad + bf16 cast fuse into
    # a single wrapper-side copy of the small activations.
    xa = jnp.concatenate([x, a], axis=-1)
    if b_pad != B:
        xa = jnp.pad(xa, ((0, b_pad - B), (0, 0)))
    xa = xa.astype(jnp.bfloat16)

    resident = pl.Buffered(1)   # weights/biases never change across grid steps
    out = pl.pallas_call(
        _qnet_kernel,
        out_shape=jax.ShapeDtypeStruct((1, b_pad), jnp.float32),
        grid=(grid,),
        in_specs=[
            pl.BlockSpec((tb, d_in), lambda i: (i, 0)),                    # xa tile
            pl.BlockSpec((d_in, hidden), lambda i: (0, 0),
                         pipeline_mode=resident),                          # w1 (resident)
            pl.BlockSpec((1, hidden), lambda i: (0, 0),
                         pipeline_mode=resident),                          # b1
            pl.BlockSpec((hidden, hidden), lambda i: (0, 0),
                         pipeline_mode=resident),                          # w2 (resident)
            pl.BlockSpec((1, hidden), lambda i: (0, 0),
                         pipeline_mode=resident),                          # b2
            pl.BlockSpec((1, hidden), lambda i: (0, 0),
                         pipeline_mode=resident),                          # w3 row
        ],
        out_specs=pl.BlockSpec((1, tb), lambda i: (0, i)),                 # lane-dense row
        compiler_params=pltpu.CompilerParams(
            dimension_semantics=("parallel",),
        ),
    )(xa, w1, b1, w2, b2, w3r)

    q = out[0, :B, None] + b3          # fold fc3 bias here (no (1,1) VMEM tile in-kernel)
    return q[0] if squeeze else q      # (1,) for unbatched, like torch fc3


def init_params(key, obs_dim, act_dim, hidden=512):
    """Deterministic synthetic parameters.

    Weights stored bf16 (halves HBM traffic, bf16-native MXU); biases f32.
    Layout: x @ W + b with W = (in_features, out_features); fc3's weight is a (1, hidden) row.
    """
    d_in = obs_dim + act_dim
    k1, k2, k3, k4, k5, k6 = jax.random.split(key, 6)
    w1 = (jax.random.normal(k1, (d_in, hidden), jnp.float32)
          / jnp.sqrt(d_in)).astype(jnp.bfloat16)
    b1 = jax.random.normal(k2, (1, hidden), jnp.float32) * 0.01
    w2 = (jax.random.normal(k3, (hidden, hidden), jnp.float32)
          / jnp.sqrt(hidden)).astype(jnp.bfloat16)
    b2 = jax.random.normal(k4, (1, hidden), jnp.float32) * 0.01
    w3r = (jax.random.normal(k5, (1, hidden), jnp.float32)
           / jnp.sqrt(hidden)).astype(jnp.bfloat16)
    b3 = jax.random.normal(k6, (1, 1), jnp.float32) * 0.01
    return (w1, b1, w2, b2, w3r, b3)


def _reference(x, a, params):
    """Pure-JAX reference mirroring the kernel's numerics (bf16 ops, f32 accumulate)."""
    w1, b1, w2, b2, w3r, b3 = params
    xa = jnp.concatenate([x, a], axis=-1).astype(jnp.bfloat16)
    h = jnp.dot(xa, w1, preferred_element_type=jnp.float32)
    h = jnp.maximum(h + b1, 0.0)
    h = jnp.dot(h.astype(jnp.bfloat16), w2, preferred_element_type=jnp.float32)
    h = jnp.maximum(h + b2, 0.0)
    return jnp.sum(h * w3r.astype(jnp.float32), axis=-1, keepdims=True) + b3


if __name__ == "__main__":
    obs_dim, act_dim = 24, 8           # small synthetic env: obs (24,), action (8,)
    B = 512                            # replay-style batch -> 2 grid steps of TB=256
    key = jax.random.PRNGKey(0)
    kx, ka, kp = jax.random.split(key, 3)

    x = jax.random.normal(kx, (B, obs_dim), jnp.float32)
    a = jax.random.normal(ka, (B, act_dim), jnp.float32)
    params = init_params(kp, obs_dim, act_dim)

    fwd = jax.jit(soft_q_forward)
    q = jax.block_until_ready(fwd(x, a, params))
    q_ref = _reference(x, a, params)
    assert q.shape == (B, 1), q.shape
    assert jnp.allclose(q, q_ref, rtol=2e-2, atol=2e-2), (q[:4], q_ref[:4])

    # Unbatched path: exact original torch semantics (cat along dim 0 of 1-D tensors).
    q1 = jax.block_until_ready(soft_q_forward(x[0], a[0], params))
    assert q1.shape == (1,), q1.shape
    assert jnp.allclose(q1, q_ref[0], rtol=2e-2, atol=2e-2), (q1, q_ref[0])

    print("KERNEL_OK")
</pallas_src>

<mosaic_0001>
module attributes {stable_mosaic.version = 11 : i64} {
  func.func @_qnet_kernel(%arg0: i32, %arg1: memref<256x32xbf16, #tpu.memory_space<vmem>>, %arg2: memref<32x512xbf16, #tpu.memory_space<vmem>>, %arg3: memref<1x512xf32, #tpu.memory_space<vmem>>, %arg4: memref<512x512xbf16, #tpu.memory_space<vmem>>, %arg5: memref<1x512xf32, #tpu.memory_space<vmem>>, %arg6: memref<1x512xbf16, #tpu.memory_space<vmem>>, %arg7: memref<1x256xf32, #tpu.memory_space<vmem>>) attributes {dimension_semantics = [#tpu.dimension_semantics<parallel>], iteration_bounds = array<i64: 2>, scalar_prefetch = 0 : i64, scratch_operands = 0 : i64, tpu.core_type = #tpu.core_type<tc>, window_params = [{transform_indices = @transform_0, window_bounds = array<i64: 256, 32>}, {pipeline_mode = #tpu.pipeline_mode<synchronous>, transform_indices = @transform_1, window_bounds = array<i64: 32, 512>}, {pipeline_mode = #tpu.pipeline_mode<synchronous>, transform_indices = @transform_2, window_bounds = array<i64: 1, 512>}, {pipeline_mode = #tpu.pipeline_mode<synchronous>, transform_indices = @transform_3, window_bounds = array<i64: 512, 512>}, {pipeline_mode = #tpu.pipeline_mode<synchronous>, transform_indices = @transform_4, window_bounds = array<i64: 1, 512>}, {pipeline_mode = #tpu.pipeline_mode<synchronous>, transform_indices = @transform_5, window_bounds = array<i64: 1, 512>}, {transform_indices = @transform_6, window_bounds = array<i64: 1, 256>}]} {
    %c0 = arith.constant 0 : index
    %c0_0 = arith.constant 0 : index
    %0 = vector.load %arg1[%c0, %c0_0] : memref<256x32xbf16, #tpu.memory_space<vmem>>, vector<256x32xbf16>
    %c0_1 = arith.constant 0 : index
    %c0_2 = arith.constant 0 : index
    %1 = vector.load %arg2[%c0_1, %c0_2] : memref<32x512xbf16, #tpu.memory_space<vmem>>, vector<32x512xbf16>
    %cst = arith.constant dense<0.000000e+00> : vector<256x512xf32>
    %2 = tpu.matmul %0, %1, %cst {dimension_numbers = #tpu.dot_dimension_numbers<[1], [0], [0], [1], [0, 0, 1, 1], [], []>} : vector<256x32xbf16>, vector<32x512xbf16>, vector<256x512xf32> -> vector<256x512xf32>
    %c0_3 = arith.constant 0 : index
    %c0_4 = arith.constant 0 : index
    %3 = vector.load %arg3[%c0_3, %c0_4] : memref<1x512xf32, #tpu.memory_space<vmem>>, vector<1x512xf32>
    %4 = vector.broadcast %3 : vector<1x512xf32> to vector<256x512xf32>
    %5 = arith.addf %2, %4 : vector<256x512xf32>
    %cst_5 = arith.constant 0.000000e+00 : f32
    %6 = vector.broadcast %cst_5 : f32 to vector<256x512xf32>
    %7 = arith.maximumf %5, %6 : vector<256x512xf32>
    %8 = arith.truncf %7 : vector<256x512xf32> to vector<256x512xbf16>
    %c0_6 = arith.constant 0 : index
    %c0_7 = arith.constant 0 : index
    %9 = vector.load %arg4[%c0_6, %c0_7] : memref<512x512xbf16, #tpu.memory_space<vmem>>, vector<512x512xbf16>
    %cst_8 = arith.constant dense<0.000000e+00> : vector<256x512xf32>
    %10 = tpu.matmul %8, %9, %cst_8 {dimension_numbers = #tpu.dot_dimension_numbers<[1], [0], [0], [1], [0, 0, 1, 1], [], []>} : vector<256x512xbf16>, vector<512x512xbf16>, vector<256x512xf32> -> vector<256x512xf32>
    %c0_9 = arith.constant 0 : index
    %c0_10 = arith.constant 0 : index
    %11 = vector.load %arg5[%c0_9, %c0_10] : memref<1x512xf32, #tpu.memory_space<vmem>>, vector<1x512xf32>
    %12 = vector.broadcast %11 : vector<1x512xf32> to vector<256x512xf32>
    %13 = arith.addf %10, %12 : vector<256x512xf32>
    %cst_11 = arith.constant 0.000000e+00 : f32
    %14 = vector.broadcast %cst_11 : f32 to vector<256x512xf32>
    %15 = arith.maximumf %13, %14 : vector<256x512xf32>
    %c0_12 = arith.constant 0 : index
    %c0_13 = arith.constant 0 : index
    %16 = vector.load %arg6[%c0_12, %c0_13] : memref<1x512xbf16, #tpu.memory_space<vmem>>, vector<1x512xbf16>
    %17 = arith.extf %16 : vector<1x512xbf16> to vector<1x512xf32>
    %18 = vector.broadcast %17 : vector<1x512xf32> to vector<256x512xf32>
    %19 = arith.mulf %15, %18 : vector<256x512xf32>
    %cst_14 = arith.constant dense<0.000000e+00> : vector<256xf32>
    %20 = vector.multi_reduction <add>, %19, %cst_14 [1] : vector<256x512xf32> to vector<256xf32>
    %21 = vector.shape_cast %20 : vector<256xf32> to vector<1x256xf32>
    %c0_15 = arith.constant 0 : index
    %c0_16 = arith.constant 0 : index
    %22 = vector.load %arg7[%c0_15, %c0_16] : memref<1x256xf32, #tpu.memory_space<vmem>>, vector<1x256xf32>
    tpu.vector_store %arg7[%c0_15, %c0_16], %21 {strides = array<i32>} : memref<1x256xf32, #tpu.memory_space<vmem>>, vector<1x256xf32>,
    return
  }
  func.func @transform_0(%arg0: i32) -> (i32, i32) {
    %c0_i32 = arith.constant 0 : i32
    %c0_i32_0 = arith.constant 0 : i32
    return %arg0, %c0_i32 : i32, i32
  }
  func.func @transform_1(%arg0: i32) -> (i32, i32) {
    %c0_i32 = arith.constant 0 : i32
    %c0_i32_0 = arith.constant 0 : i32
    %c0_i32_1 = arith.constant 0 : i32
    return %c0_i32, %c0_i32_0 : i32, i32
  }
  func.func @transform_2(%arg0: i32) -> (i32, i32) {
    %c0_i32 = arith.constant 0 : i32
    %c0_i32_0 = arith.constant 0 : i32
    %c0_i32_1 = arith.constant 0 : i32
    return %c0_i32, %c0_i32_0 : i32, i32
  }
  func.func @transform_3(%arg0: i32) -> (i32, i32) {
    %c0_i32 = arith.constant 0 : i32
    %c0_i32_0 = arith.constant 0 : i32
    %c0_i32_1 = arith.constant 0 : i32
    return %c0_i32, %c0_i32_0 : i32, i32
  }
  func.func @transform_4(%arg0: i32) -> (i32, i32) {
    %c0_i32 = arith.constant 0 : i32
    %c0_i32_0 = arith.constant 0 : i32
    %c0_i32_1 = arith.constant 0 : i32
    return %c0_i32, %c0_i32_0 : i32, i32
  }
  func.func @transform_5(%arg0: i32) -> (i32, i32) {
    %c0_i32 = arith.constant 0 : i32
    %c0_i32_0 = arith.constant 0 : i32
    %c0_i32_1 = arith.constant 0 : i32
    return %c0_i32, %c0_i32_0 : i32, i32
  }
  func.func @transform_6(%arg0: i32) -> (i32, i32) {
    %c0_i32 = arith.constant 0 : i32
    %c0_i32_0 = arith.constant 0 : i32
    return %c0_i32, %arg0 : i32, i32
  }
}

</mosaic_0001>

<bundles_post_ra>
// kernel: soft_q_forward.1
= control target key start
LH: loop header
LB: loop body
LE: loop exit
PB: predicated region body
PF: predicated region fallthrough
CT: control target
= control target key end

     0   :  { %11 = vsyncpa [#allocation3], 0  ;;  %s5458_s21 = smov 0   ;;  %s6985_s0 = inlined_call_operand.vmem [shape: bf16[512,32], index: 0, kind: input, shape index: {}]   ;;  %s6986_s1 = inlined_call_operand.vmem [shape: bf16[32,512], index: 1, kind: input, shape index: {}]   ;;  %s6987_s2 = inlined_call_operand.vmem [shape: f32[1,512], index: 2, kind: input, shape index: {}]   ;;  %s6988_s3 = inlined_call_operand.hbm [shape: bf16[512,512], index: 3, kind: input, shape index: {}]   ;;  %s6989_s4 = inlined_call_operand.vmem [shape: f32[1,512], index: 4, kind: input, shape index: {}]   ;;  %s6990_s5 = inlined_call_operand.vmem [shape: bf16[1,512], index: 5, kind: input, shape index: {}]   ;;  %s6991_s6 = inlined_call_operand.vmem [shape: f32[1,512], index: 6, kind: output, shape index: {}]  }
   0x1 LB: > { %s196_s24 = sshll.u32 %s6988_s3, 4  ;;  %s5467_s25 = sadd.s32 4294967295, %s5417_s21   ;;  %s5417_s21 = sphi %s5458_s21, %s17_s21   ;;  %s197_s24 = int_to_ptr.hbm [resolvable:$true] %s196_s24 }
   0x2   : > { %p4517_p0 = scmp.ge.s32.totalorder %s5417_s21, 1  ;;  %p179_p1 = scmp.lt.s32.totalorder %s5417_s21, 3 }
   0x3   : > { %p5359_p2 = scmp.eq.s32.totalorder %s5467_s25, 0  ;;  %s5419_s26 = smov [#allocation2]  }
   0x4   : > { %p180_p3 = pnand %p4517_p0, %p179_p1  ;;  %s198_s27 = sshll.u32 %s5419_s26, 4  ;;  %s199_s27 = int_to_ptr.vmem [resolvable:$true] %s198_s27 }
   0x5   : > { %s5420_s28 = smov 256   ;;  %s5421_s29 = smov 16  }
   0x6   : > { %p5355_p4 = pneg %p180_p3  ;;  %229 = sbr.rel (%p180_p3) target bundleno = 1920 (0x780), region = 44 }
   0x8   : > { %p5356_p5 = pnand %p5359_p2, %p5355_p4 }
   0xa   : > { %5358 = dma.hbm_to_vmem [thread:$0]  (!%p5356_p5), %s197_s24, 16384, %s199_s27, [#allocation3], %s5420_s28, %s5420_s28, %s5421_s29  }
   0xb   : > { %5412 = dma.done.wait (%p5359_p2), [#allocation3], 16384  }
   0xc   : > { %5414 = vsyncadd (%p5359_p2), [#allocation3], 4294950912  ;;  %s4522_s30 = sshll.u32 %s5467_s25, 5  ;;  %v4607_v0 = vld [vmem:[%s6986_s1 + $0x20] sm:$0xf]  ;;  %vm441_vm0 = vcmask 261120  }
   0xd   : > { %p260_p6 = scmp.lt.s32.totalorder %s4522_s30, 63  ;;  %v5221_v1 = vld [vmem:[%s6986_s1 + $0x2c] sm:$0xf0]  ;;  %v5219_v2 = vld [vmem:[%s6986_s1 + $0x24] sm:$0xf]  ;;  %vm4355_vm1 = vcmask 130112  }
   0xe   : > { %v4608_v3 = vor.u32 %v5221_v1, %v4607_v0  ;;  %v4609_v4 = vld [vmem:[%s6986_s1 + $0x30] sm:$0xf0]  ;;  %v4615_v5 = vld [vmem:[%s6986_s1 + $0x28] sm:$0xf]  ;;  %v5222_v6 = vld [vmem:[%s6986_s1 + $0x34] sm:$0xf0] }
   0xf   : > { %s7340_s30 = smov (!%p260_p6, %s4522_s30), 63  ;;  %v4612_v7 = vor.u32 %v5219_v2, %v4609_v4  ;;  %v4616_v8 = vor.u32 %v5222_v6, %v4615_v5  ;;  %v5220_v9 = vld [vmem:[%s6986_s1 + $0x2c] sm:$0xf]  ;;  %v4617_v10 = vld [vmem:[%s6986_s1 + $0x38] sm:$0xf0]  ;;  %vm4359_vm2 = vcmask 195712  }
  0x10   : > { %s4523_s7 = sshll.u32 %s7340_s30, 2  ;;  %v4591_v11 = vld [vmem:[%s6986_s1] sm:$0xf]  ;;  %496 = vmatpush.bf16.msra.mxu0 %v4608_v3  ;;  %v4620_v12 = vor.u32 %v5220_v9, %v4617_v10  ;;  %v5217_v13 = vld [vmem:[%s6986_s1 + $0xc] sm:$0xf0]  ;;  %vm4363_vm3 = vcmask 261312  }
  0x11   : > { %s5503_s30 = scalar_lea.vmem %s6985_s0, %s4523_s7  ;;  %v5215_v14 = vld [vmem:[%s6986_s1 + $0x4] sm:$0xf]  ;;  %v4593_v15 = vld [vmem:[%s6986_s1 + $0x10] sm:$0xf0]  ;;  %585 = vmatpush.bf16.msra.mxu1 %v4612_v7  ;;  %674 = vmatpush.bf16.msra.mxu2 %v4616_v8  ;;  %v4592_v16 = vor.u32 %v5217_v13, %v4591_v11  ;;  %v4599_v18 = vld [vmem:[%s6986_s1 + $0x8] sm:$0xf] }
  0x12   : > { %v4596_v17 = vor.u32 %v5215_v14, %v4593_v15  ;;  %v5218_v19 = vld [vmem:[%s6986_s1 + $0x14] sm:$0xf0]  ;;  %v5216_v20 = vld [vmem:[%s6986_s1 + $0xc] sm:$0xf]  ;;  %763 = vmatpush.bf16.msra.mxu3 %v4620_v12  ;;  %v4601_v22 = vld [vmem:[%s6986_s1 + $0x18] sm:$0xf0] }
  0x13   : > { %v4600_v21 = vor.u32 %v5218_v19, %v4599_v18  ;;  %v5199_v23 = vld [vmem:[%s5503_s30] sm:$0xff]  ;;  %v5055_v24 = vld [vmem:[#allocation2 + $0x2e0] sm:$0xf]  ;;  %v4604_v25 = vor.u32 %v5216_v20, %v4601_v22  ;;  %v5317_v26 = vld [vmem:[#allocation2 + $0x2ec] sm:$0xf0]  ;;  %vm4367_vm4 = vcmask 326912  }
  0x14   : > { %v4799_v27 = vld [vmem:[#allocation2 + $0xe0] sm:$0xf]  ;;  %v5253_v28 = vld [vmem:[#allocation2 + $0xec] sm:$0xf0]  ;;  %497 = vmatpush.bf16.msra.mxu0 %v4592_v16  ;;  %v5056_v29 = vor.u32 %v5317_v26, %v5055_v24  ;;  %v5201_v50 = vld [vmem:[%s5503_s30 + $0x10] sm:$0xff]  ;;  %vm4371_vm5 = vcmask 392512  }
  0x15   : > { %v5183_v30 = vld [vmem:[#allocation2 + $0x3e0] sm:$0xf]  ;;  %v5349_v31 = vld [vmem:[#allocation2 + $0x3ec] sm:$0xf0]  ;;  %586 = vmatpush.bf16.msra.mxu1 %v4596_v17  ;;  %675 = vmatpush.bf16.msra.mxu2 %v4600_v21  ;;  %v4800_v33 = vor.u32 %v5253_v28, %v4799_v27  ;;  %v5203_v0 = vld [vmem:[%s5503_s30 + $0x20] sm:$0xff]  ;;  %vm4375_vm6 = vcmask 458112  }
  0x16   : > { %v4927_v32 = vld [vmem:[#allocation2 + $0x1e0] sm:$0xf]  ;;  %v5184_v34 = vor.u32 %v5349_v31, %v5183_v30  ;;  %v5285_v35 = vld [vmem:[#allocation2 + $0x1ec] sm:$0xf0]  ;;  %764 = vmatpush.bf16.msra.mxu3 %v4604_v25  ;;  %v5205_v14 = vld [vmem:[%s5503_s30 + $0x30] sm:$0xff]  ;;  %vm4379_vm7 = vcmask 523712  }
  0x17   : > { %v4928_v36 = vor.u32 %v5285_v35, %v4927_v32  ;;  %4621 = vmatmul.msk.bf16.vlgmr.msra.gmra.mxu0 %vm441_vm0, %v5199_v23  ;;  %v5039_v37 = vld [vmem:[#allocation2 + $0x2c0] sm:$0xf]  ;;  %v5313_v38 = vld [vmem:[#allocation2 + $0x2cc] sm:$0xf0]  ;;  %v5207_v28 = vld [vmem:[%s5503_s30 + $0x40] sm:$0xff]  ;;  %vm4383_vm8 = vcmask 589312  }
  0x18   : > { %4637 = vmatmul.msk.bf16.vlgmr.msra.gmra.mxu1 %vm441_vm0, %v5199_v23  ;;  %4653 = vmatmul.msk.bf16.vlgmr.msra.gmra.mxu2 %vm441_vm0, %v5199_v23  ;;  %v4783_v39 = vld [vmem:[#allocation2 + $0xc0] sm:$0xf]  ;;  %v5040_v40 = vor.u32 %v5313_v38, %v5039_v37  ;;  %v5249_v41 = vld [vmem:[#allocation2 + $0xcc] sm:$0xf0]  ;;  %vm4387_vm9 = vcmask 654912   ;;  %vm4391_vm10 = vcmask 720512  }
  0x19   : > { %1994 = vmatpush.bf16.msrb.mxu2 %v5056_v29  ;;  %4669 = vmatmul.msk.bf16.vlgmr.msra.gmra.mxu3 %vm441_vm0, %v5199_v23  ;;  %v5167_v42 = vld [vmem:[#allocation2 + $0x3c0] sm:$0xf]  ;;  %v5345_v43 = vld [vmem:[#allocation2 + $0x3cc] sm:$0xf0]  ;;  %v4784_v44 = vor.u32 %v5249_v41, %v4783_v39  ;;  %v311_v29 = vld [vmem:[%s6987_s2] sm:$0xf] }
  0x1a   : > { %2083 = vmatpush.bf16.msrb.mxu3 %v5184_v34  ;;  %1816 = vmatpush.bf16.msrb.mxu0 %v4800_v33  ;;  %v5168_v45 = vor.u32 %v5345_v43, %v5167_v42  ;;  %v4911_v46 = vld [vmem:[#allocation2 + $0x1c0] sm:$0xf]  ;;  %v5281_v47 = vld [vmem:[#allocation2 + $0x1cc] sm:$0xf0]  ;;  %v5570_v32 = vperm.slane %v311_v29, 0  ;;  %v5573_v33 = vperm.slane %v311_v29, 1 }
  0x1b   : > { %1905 = vmatpush.bf16.msrb.mxu1 %v4928_v36  ;;  %v4912_v48 = vor.u32 %v5281_v47, %v4911_v46  ;;  %v5200_v49 = vld [vmem:[%s5503_s30 + $0x8] sm:$0xff]  ;;  %v5309_v52 = vld [vmem:[#allocation2 + $0x2ac] sm:$0xf0]  ;;  %vm4395_vm11 = vcmask 786112   ;;  %vm4399_vm12 = vcmask 851712   ;;  %vm4403_vm13 = vcmask 917312  }
  0x1c   : > { %v5023_v51 = vld [vmem:[#allocation2 + $0x2a0] sm:$0xf]  ;;  %v5245_v55 = vld [vmem:[#allocation2 + $0xac] sm:$0xf0]  ;;  %vm4407_vm14 = vcmask 982912   ;;  %s4524_s8 = sshll.u32 %s5467_s25, 1 }
  0x1d   : > { %1995 = vmatpush.bf16.msrb.mxu2 %v5040_v40  ;;  %v4767_v53 = vld [vmem:[#allocation2 + $0xa0] sm:$0xf]  ;;  %v5024_v54 = vor.u32 %v5309_v52, %v5023_v51  ;;  %v5341_v57 = vld [vmem:[#allocation2 + $0x3ac] sm:$0xf0]  ;;  %v5583_v51 = vperm.slane %v311_v29, 3  ;;  %p266_p7 = scmp.lt.s32.totalorder %s4524_s8, 3 }
  0x1e   : > { %1817 = vmatpush.bf16.msrb.mxu0 %v4784_v44  ;;  %2084 = vmatpush.bf16.msrb.mxu3 %v5168_v45  ;;  %v5151_v56 = vld [vmem:[#allocation2 + $0x3a0] sm:$0xf]  ;;  %v4768_v58 = vor.u32 %v5245_v55, %v4767_v53  ;;  %v5277_v61 = vld [vmem:[#allocation2 + $0x1ac] sm:$0xf0]  ;;  %vm4411_vm15 = vcmask 1048512  }
  0x1f   : > { %1906 = vmatpush.bf16.msrb.mxu1 %v4912_v48  ;;  %v5152_v59 = vor.u32 %v5341_v57, %v5151_v56  ;;  %v4895_v60 = vld [vmem:[#allocation2 + $0x1a0] sm:$0xf]  ;;  %v5202_v63 = vld [vmem:[%s5503_s30 + $0x18] sm:$0xff]  ;;  %s7342_s8 = smov (!%p266_p7, %s4524_s8), 3 }
  0x20   : > { %v4896_v62 = vor.u32 %v5277_v61, %v4895_v60  ;;  %v5007_v1 = vld [vmem:[#allocation2 + $0x280] sm:$0xf]  ;;  %v5305_v2 = vld [vmem:[#allocation2 + $0x28c] sm:$0xf0]  ;;  %s268_s10 = scalar_lea.vmem %s6991_s6, %s7342_s8 }
  0x21   : > { %1996 = vmatpush.bf16.msrb.mxu2 %v5024_v54  ;;  %v4751_v3 = vld [vmem:[#allocation2 + $0x80] sm:$0xf]  ;;  %v5008_v4 = vor.u32 %v5305_v2, %v5007_v1  ;;  %v5241_v5 = vld [vmem:[#allocation2 + $0x8c] sm:$0xf0] }
  0x22   : > { %1818 = vmatpush.bf16.msrb.mxu0 %v4768_v58  ;;  %2085 = vmatpush.bf16.msrb.mxu3 %v5152_v59  ;;  %v5135_v6 = vld [vmem:[#allocation2 + $0x380] sm:$0xf]  ;;  %v5337_v7 = vld [vmem:[#allocation2 + $0x38c] sm:$0xf0]  ;;  %v4752_v8 = vor.u32 %v5241_v5, %v4751_v3 }
  0x23   : > { %1907 = vmatpush.bf16.msrb.mxu1 %v4896_v62  ;;  %v5136_v9 = vor.u32 %v5337_v7, %v5135_v6  ;;  %v4879_v10 = vld [vmem:[#allocation2 + $0x180] sm:$0xf]  ;;  %v5273_v11 = vld [vmem:[#allocation2 + $0x18c] sm:$0xf0] }
  0x24   : > { %v4880_v12 = vor.u32 %v5273_v11, %v4879_v10  ;;  %v5204_v13 = vld [vmem:[%s5503_s30 + $0x28] sm:$0xff]  ;;  %v5301_v16 = vld [vmem:[#allocation2 + $0x26c] sm:$0xf0] }
  0x25   : > { %1997 = vmatpush.bf16.msrb.mxu2 %v5008_v4  ;;  %v4991_v15 = vld [vmem:[#allocation2 + $0x260] sm:$0xf]  ;;  %v5237_v19 = vld [vmem:[#allocation2 + $0x6c] sm:$0xf0] }
  0x26   : > { %1819 = vmatpush.bf16.msrb.mxu0 %v4752_v8  ;;  %2086 = vmatpush.bf16.msrb.mxu3 %v5136_v9  ;;  %v4735_v17 = vld [vmem:[#allocation2 + $0x60] sm:$0xf]  ;;  %v4992_v18 = vor.u32 %v5301_v16, %v4991_v15  ;;  %v5333_v21 = vld [vmem:[#allocation2 + $0x36c] sm:$0xf0] }
  0x27   : > { %4622 = vmatmul.msk.bf16.gmra.mxu0 %vm441_vm0, %v5200_v49  ;;  %1908 = vmatpush.bf16.msrb.mxu1 %v4880_v12  ;;  %v5119_v20 = vld [vmem:[#allocation2 + $0x360] sm:$0xf]  ;;  %v4736_v22 = vor.u32 %v5237_v19, %v4735_v17  ;;  %v5269_v25 = vld [vmem:[#allocation2 + $0x16c] sm:$0xf0] }
  0x28   : > { %4638 = vmatmul.msk.bf16.gmra.mxu1 %vm441_vm0, %v5200_v49  ;;  %4654 = vmatmul.msk.bf16.gmra.mxu2 %vm441_vm0, %v5200_v49  ;;  %v5120_v23 = vor.u32 %v5333_v21, %v5119_v20  ;;  %v4863_v24 = vld [vmem:[#allocation2 + $0x160] sm:$0xf]  ;;  %v5206_v27 = vld [vmem:[%s5503_s30 + $0x38] sm:$0xff] }
  0x29   : > { %4670 = vmatmul.msk.bf16.gmra.mxu3 %vm441_vm0, %v5200_v49  ;;  %1998 = vmatpush.bf16.msrb.mxu2 %v4992_v18  ;;  %v4864_v26 = vor.u32 %v5269_v25, %v4863_v24  ;;  %v4975_v34 = vld [vmem:[#allocation2 + $0x240] sm:$0xf]  ;;  %v5297_v35 = vld [vmem:[#allocation2 + $0x24c] sm:$0xf0] }
  0x2a   : > { %1820 = vmatpush.bf16.msrb.mxu0 %v4736_v22  ;;  %2087 = vmatpush.bf16.msrb.mxu3 %v5120_v23  ;;  %v4719_v36 = vld [vmem:[#allocation2 + $0x40] sm:$0xf]  ;;  %v4976_v37 = vor.u32 %v5297_v35, %v4975_v34  ;;  %v5233_v38 = vld [vmem:[#allocation2 + $0x4c] sm:$0xf0] }
  0x2b   : > { %1909 = vmatpush.bf16.msrb.mxu1 %v4864_v26  ;;  %v5103_v39 = vld [vmem:[#allocation2 + $0x340] sm:$0xf]  ;;  %v5329_v40 = vld [vmem:[#allocation2 + $0x34c] sm:$0xf0]  ;;  %v4720_v43 = vor.u32 %v5233_v38, %v4719_v36 }
  0x2c   : > { %v5104_v44 = vor.u32 %v5329_v40, %v5103_v39  ;;  %v4847_v55 = vld [vmem:[#allocation2 + $0x140] sm:$0xf]  ;;  %v5265_v56 = vld [vmem:[#allocation2 + $0x14c] sm:$0xf0] }
  0x2d   : > { %1999 = vmatpush.bf16.msrb.mxu2 %v4976_v37  ;;  %v4848_v59 = vor.u32 %v5265_v56, %v4847_v55  ;;  %v5208_v1 = vld [vmem:[%s5503_s30 + $0x48] sm:$0xff] }
  0x2e   : > { %1821 = vmatpush.bf16.msrb.mxu0 %v4720_v43  ;;  %2088 = vmatpush.bf16.msrb.mxu3 %v5104_v44  ;;  %v4959_v44 = vld [vmem:[#allocation2 + $0x220] sm:$0xf] }
  0x2f   : > { %1910 = vmatpush.bf16.msrb.mxu1 %v4848_v59 }
  0x37   : > { %4623 = vmatmul.msk.bf16.gmra.mxu0 %vm441_vm0, %v5201_v50 }
  0x38   : > { %4639 = vmatmul.msk.bf16.gmra.mxu1 %vm441_vm0, %v5201_v50  ;;  %4655 = vmatmul.msk.bf16.gmra.mxu2 %vm441_vm0, %v5201_v50 }
  0x39   : > { %4671 = vmatmul.msk.bf16.gmra.mxu3 %vm441_vm0, %v5201_v50  ;;  %v5581_v50 = vperm.slane %v311_v29, 2 }
  0x47   : > { %4624 = vmatmul.msk.bf16.gmra.mxu0 %vm441_vm0, %v5202_v63 }
  0x48   : > { %4640 = vmatmul.msk.bf16.gmra.mxu1 %vm441_vm0, %v5202_v63  ;;  %4656 = vmatmul.msk.bf16.gmra.mxu2 %vm441_vm0, %v5202_v63 }
  0x49   : > { %4672 = vmatmul.msk.bf16.gmra.mxu3 %vm441_vm0, %v5202_v63 }
  0x57   : > { %4625 = vmatmul.msk.bf16.gmra.mxu0 %vm441_vm0, %v5203_v0 }
  0x58   : > { %4641 = vmatmul.msk.bf16.gmra.mxu1 %vm441_vm0, %v5203_v0  ;;  %4657 = vmatmul.msk.bf16.gmra.mxu2 %vm441_vm0, %v5203_v0 }
  0x59   : > { %4673 = vmatmul.msk.bf16.gmra.mxu3 %vm441_vm0, %v5203_v0 }
  0x67   : > { %4626 = vmatmul.msk.bf16.gmra.mxu0 %vm441_vm0, %v5204_v13 }
  0x68   : > { %4642 = vmatmul.msk.bf16.gmra.mxu1 %vm441_vm0, %v5204_v13  ;;  %4658 = vmatmul.msk.bf16.gmra.mxu2 %vm441_vm0, %v5204_v13 }
  0x69   : > { %4674 = vmatmul.msk.bf16.gmra.mxu3 %vm441_vm0, %v5204_v13 }
  0x77   : > { %4627 = vmatmul.msk.bf16.gmra.mxu0 %vm441_vm0, %v5205_v14 }
  0x78   : > { %4643 = vmatmul.msk.bf16.gmra.mxu1 %vm441_vm0, %v5205_v14  ;;  %4659 = vmatmul.msk.bf16.gmra.mxu2 %vm441_vm0, %v5205_v14 }
  0x79   : > { %4675 = vmatmul.msk.bf16.gmra.mxu3 %vm441_vm0, %v5205_v14 }
  0x87   : > { %4628 = vmatmul.msk.bf16.gmra.mxu0 %vm441_vm0, %v5206_v27 }
  0x88   : > { %4644 = vmatmul.msk.bf16.gmra.mxu1 %vm441_vm0, %v5206_v27  ;;  %4660 = vmatmul.msk.bf16.gmra.mxu2 %vm441_vm0, %v5206_v27 }
  0x89   : > { %4676 = vmatmul.msk.bf16.gmra.mxu3 %vm441_vm0, %v5206_v27 }
  0x94   : > { %v499_v30 = vpop.f32.mrf.mxu0 }
  0x95   : > { %v588_v31 = vpop.f32.mrf.mxu1  ;;  %v500_v41 = vadd.f32 %v499_v30, %v5570_v32  ;;  %v5209_v30 = vld [vmem:[%s5503_s30 + $0x50] sm:$0xff] }
  0x96   : > { %v589_v45 = vadd.f32 %v588_v31, %v5573_v33 }
  0x97   : > { %4629 = vmatmul.msk.bf16.gmra.mxu0 %vm441_vm0, %v5207_v28  ;;  %v846_v53 = vmax.f32 %v500_v41, 0.0 }
  0x98   : > { %4645 = vmatmul.msk.bf16.gmra.mxu1 %vm441_vm0, %v5207_v28  ;;  %4661 = vmatmul.msk.bf16.gmra.mxu2 %vm441_vm0, %v5207_v28  ;;  %v847_v57 = vmax.f32 %v589_v45, 0.0  ;;  %v5293_v45 = vld [vmem:[#allocation2 + $0x22c] sm:$0xf0] }
  0x99   : > { %4677 = vmatmul.msk.bf16.gmra.mxu3 %vm441_vm0, %v5207_v28 }
  0x9b   : > { %v677_v42 = vpop.f32.mrf.mxu2 }
  0x9c   : > { %v766_v46 = vpop.f32.mrf.mxu3  ;;  %v501_v47 = vpop.f32.mrf.mxu0  ;;  %v678_v61 = vadd.f32 %v677_v42, %v5581_v50 }
  0x9d   : > { %v502_v48 = vadd.f32 %v501_v47, %v5570_v32  ;;  %v590_v49 = vpop.f32.mrf.mxu1  ;;  %v767_v63 = vadd.f32 %v766_v46, %v5583_v51  ;;  %v4703_v46 = vld [vmem:[#allocation2 + $0x20] sm:$0xf]  ;;  %v4960_v47 = vor.u32 %v5293_v45, %v4959_v44 }
  0x9e   : > { %v591_v52 = vadd.f32 %v590_v49, %v5573_v33  ;;  %v848_v7 = vmax.f32 %v678_v61, 0.0  ;;  %v5087_v49 = vld [vmem:[#allocation2 + $0x320] sm:$0xf] }
  0x9f   : > { %v850_v54 = vmax.f32 %v502_v48, 0.0  ;;  %v849_v9 = vmax.f32 %v767_v63, 0.0  ;;  %v5229_v48 = vld [vmem:[#allocation2 + $0x2c] sm:$0xf0]  ;;  %2000 = vmatpush.bf16.msrb.mxu2 %v4960_v47 }
  0xa0   : > { %v851_v58 = vmax.f32 %v591_v52, 0.0  ;;  %v5325_v52 = vld [vmem:[#allocation2 + $0x32c] sm:$0xf0]  ;;  %v4704_v55 = vor.u32 %v5229_v48, %v4703_v46 }
  0xa1   : > { %v5586_v60 = vpack.c.bf16 %v850_v54, %v846_v53  ;;  %v5088_v56 = vor.u32 %v5325_v52, %v5087_v49  ;;  %v5211_v52 = vld [vmem:[%s5503_s30 + $0x60] sm:$0xff] }
  0xa2   : > { %v5589_v62 = vpack.c.bf16 %v851_v58, %v847_v57  ;;  %1822 = vmatpush.bf16.msrb.mxu0 %v4704_v55 }
  0xa3   : > { %7090 = vst [vmem:[#allocation5_spill] sm:$0xff] %v5586_v60  ;;  %v679_v0 = vpop.f32.mrf.mxu2  ;;  %2089 = vmatpush.bf16.msrb.mxu3 %v5088_v56 }
  0xa4   : > { %7091 = vst [vmem:[#allocation6_spill] sm:$0xff] %v5589_v62  ;;  %v680_v2 = vadd.f32 %v679_v0, %v5581_v50  ;;  %v768_v3 = vpop.f32.mrf.mxu3  ;;  %v504_v4 = vpop.f32.mrf.mxu0 }
  0xa5   : > { %v769_v5 = vadd.f32 %v768_v3, %v5583_v51  ;;  %v593_v6 = vpop.f32.mrf.mxu1  ;;  %v505_v13 = vadd.f32 %v504_v4, %v5570_v32  ;;  %v4831_v3 = vld [vmem:[#allocation2 + $0x120] sm:$0xf]  ;;  %v5261_v4 = vld [vmem:[#allocation2 + $0x12c] sm:$0xf0] }
  0xa6   : > { %v852_v8 = vmax.f32 %v680_v2, 0.0  ;;  %v594_v15 = vadd.f32 %v593_v6, %v5573_v33 }
  0xa7   : > { %v853_v10 = vmax.f32 %v769_v5, 0.0  ;;  %4630 = vmatmul.msk.bf16.gmra.mxu0 %vm441_vm0, %v5208_v1  ;;  %v854_v21 = vmax.f32 %v505_v13, 0.0 }
  0xa8   : > { %v5596_v11 = vpack.c.bf16 %v852_v8, %v848_v7  ;;  %4646 = vmatmul.msk.bf16.gmra.mxu1 %vm441_vm0, %v5208_v1  ;;  %4662 = vmatmul.msk.bf16.gmra.mxu2 %vm441_vm0, %v5208_v1  ;;  %v855_v23 = vmax.f32 %v594_v15, 0.0  ;;  %v4832_v7 = vor.u32 %v5261_v4, %v4831_v3  ;;  %v5210_v15 = vld [vmem:[%s5503_s30 + $0x58] sm:$0xff]  ;;  %v4687_v4 = vld [vmem:[#allocation2] sm:$0xf] }
  0xa9   : > { %v5600_v12 = vpack.c.bf16 %v853_v10, %v849_v9  ;;  %4678 = vmatmul.msk.bf16.gmra.mxu3 %vm441_vm0, %v5208_v1  ;;  %v5289_v3 = vld [vmem:[#allocation2 + $0x20c] sm:$0xf0] }
  0xaa   : > { %7092 = vst [vmem:[#allocation7_spill] sm:$0xff] %v5596_v11  ;;  %1911 = vmatpush.bf16.msrb.mxu1 %v4832_v7  ;;  %v5071_v7 = vld [vmem:[#allocation2 + $0x300] sm:$0xf] }
  0xab   : > { %7093 = vst [vmem:[#allocation8_spill] sm:$0xff] %v5600_v12  ;;  %v682_v14 = vpop.f32.mrf.mxu2 }
  0xac   : > { %v771_v16 = vpop.f32.mrf.mxu3  ;;  %v506_v17 = vpop.f32.mrf.mxu0  ;;  %v683_v26 = vadd.f32 %v682_v14, %v5581_v50 }
  0xad   : > { %v507_v18 = vadd.f32 %v506_v17, %v5570_v32  ;;  %v595_v19 = vpop.f32.mrf.mxu1  ;;  %v772_v28 = vadd.f32 %v771_v16, %v5583_v51 }
  0xae   : > { %v596_v20 = vadd.f32 %v595_v19, %v5573_v33  ;;  %v856_v38 = vmax.f32 %v683_v26, 0.0 }
  0xaf   : > { %v858_v22 = vmax.f32 %v507_v18, 0.0  ;;  %v857_v40 = vmax.f32 %v772_v28, 0.0 }
  0xb0   : > { %v859_v24 = vmax.f32 %v596_v20, 0.0 }
  0xb1   : > { %v5607_v25 = vpack.c.bf16 %v858_v22, %v854_v21 }
  0xb2   : > { %v5610_v27 = vpack.c.bf16 %v859_v24, %v855_v23 }
  0xb3   : > { %v684_v29 = vpop.f32.mrf.mxu2 }
  0xb4   : > { %7094 = vst [vmem:[#allocation9_spill] sm:$0xff] %v5610_v27  ;;  %v685_v31 = vadd.f32 %v684_v29, %v5581_v50  ;;  %v773_v34 = vpop.f32.mrf.mxu3  ;;  %v509_v35 = vpop.f32.mrf.mxu0 }
  0xb5   : > { %v774_v36 = vadd.f32 %v773_v34, %v5583_v51  ;;  %v598_v37 = vpop.f32.mrf.mxu1  ;;  %v510_v53 = vadd.f32 %v509_v35, %v5570_v32 }
  0xb6   : > { %v860_v39 = vmax.f32 %v685_v31, 0.0  ;;  %v599_v57 = vadd.f32 %v598_v37, %v5573_v33 }
  0xb7   : > { %v861_v41 = vmax.f32 %v774_v36, 0.0  ;;  %4631 = vmatmul.msk.bf16.gmra.mxu0 %vm441_vm0, %v5209_v30  ;;  %v862_v1 = vmax.f32 %v510_v53, 0.0 }
  0xb8   : > { %v5617_v42 = vpack.c.bf16 %v860_v39, %v856_v38  ;;  %4647 = vmatmul.msk.bf16.gmra.mxu1 %vm441_vm0, %v5209_v30  ;;  %4663 = vmatmul.msk.bf16.gmra.mxu2 %vm441_vm0, %v5209_v30  ;;  %v863_v5 = vmax.f32 %v599_v57, 0.0 }
  0xb9   : > { %v5621_v43 = vpack.c.bf16 %v861_v41, %v857_v40  ;;  %4679 = vmatmul.msk.bf16.gmra.mxu3 %vm441_vm0, %v5209_v30 }
  0xba   : > { %7095 = vst [vmem:[#allocation10_spill] sm:$0xff] %v5617_v42 }
  0xbb   : > { %7096 = vst [vmem:[#allocation11_spill] sm:$0xff] %v5621_v43  ;;  %v687_v54 = vpop.f32.mrf.mxu2 }
  0xbc   : > { %v776_v58 = vpop.f32.mrf.mxu3  ;;  %v511_v59 = vpop.f32.mrf.mxu0  ;;  %v688_v9 = vadd.f32 %v687_v54, %v5581_v50 }
  0xbd   : > { %v512_v61 = vadd.f32 %v511_v59, %v5570_v32  ;;  %v600_v63 = vpop.f32.mrf.mxu1  ;;  %v777_v13 = vadd.f32 %v776_v58, %v5583_v51 }
  0xbe   : > { %v601_v0 = vadd.f32 %v600_v63, %v5573_v33  ;;  %v864_v21 = vmax.f32 %v688_v9, 0.0  ;;  %v5321_v9 = vld [vmem:[#allocation2 + $0x30c] sm:$0xf0] }
  0xbf   : > { %v866_v2 = vmax.f32 %v512_v61, 0.0  ;;  %v865_v23 = vmax.f32 %v777_v13, 0.0 }
  0xc0   : > { %v867_v6 = vmax.f32 %v601_v0, 0.0 }
  0xc1   : > { %v5628_v8 = vpack.c.bf16 %v866_v2, %v862_v1  ;;  %v4943_v2 = vld [vmem:[#allocation2 + $0x200] sm:$0xf] }
  0xc2   : > { %v5631_v10 = vpack.c.bf16 %v867_v6, %v863_v5  ;;  %v4944_v5 = vor.u32 %v5289_v3, %v4943_v2  ;;  %v5225_v6 = vld [vmem:[#allocation2 + $0xc] sm:$0xf0] }
  0xc3   : > { %7097 = vst [vmem:[#allocation12_spill] sm:$0xff] %v5628_v8  ;;  %v689_v14 = vpop.f32.mrf.mxu2 }
  0xc4   : > { %7098 = vst [vmem:[#allocation13_spill] sm:$0xff] %v5631_v10  ;;  %v690_v16 = vadd.f32 %v689_v14, %v5581_v50  ;;  %v778_v17 = vpop.f32.mrf.mxu3  ;;  %v514_v18 = vpop.f32.mrf.mxu0  ;;  %2001 = vmatpush.bf16.msrb.mxu2 %v4944_v5 }
  0xc5   : > { %v779_v19 = vadd.f32 %v778_v17, %v5583_v51  ;;  %v603_v20 = vpop.f32.mrf.mxu1  ;;  %v515_v29 = vadd.f32 %v514_v18, %v5570_v32 }
  0xc6   : > { %v868_v22 = vmax.f32 %v690_v16, 0.0  ;;  %v604_v31 = vadd.f32 %v603_v20, %v5573_v33  ;;  %v5072_v16 = vor.u32 %v5321_v9, %v5071_v7 }
  0xc7   : > { %v869_v24 = vmax.f32 %v779_v19, 0.0  ;;  %4632 = vmatmul.msk.bf16.gmra.mxu0 %vm441_vm0, %v5210_v15  ;;  %v870_v39 = vmax.f32 %v515_v29, 0.0  ;;  %v4815_v29 = vld [vmem:[#allocation2 + $0x100] sm:$0xf] }
  0xc8   : > { %v5638_v26 = vpack.c.bf16 %v868_v22, %v864_v21  ;;  %4648 = vmatmul.msk.bf16.gmra.mxu1 %vm441_vm0, %v5210_v15  ;;  %4664 = vmatmul.msk.bf16.gmra.mxu2 %vm441_vm0, %v5210_v15  ;;  %v871_v41 = vmax.f32 %v604_v31, 0.0 }
  0xc9   : > { %v5642_v28 = vpack.c.bf16 %v869_v24, %v865_v23  ;;  %4680 = vmatmul.msk.bf16.gmra.mxu3 %vm441_vm0, %v5210_v15  ;;  %v4688_v15 = vor.u32 %v5225_v6, %v4687_v4 }
  0xca   : > { %7099 = vst [vmem:[#allocation14_spill] sm:$0xff] %v5638_v26  ;;  %2090 = vmatpush.bf16.msrb.mxu3 %v5072_v16 }
  0xcb   : > { %7100 = vst [vmem:[#allocation15_spill] sm:$0xff] %v5642_v28  ;;  %v692_v30 = vpop.f32.mrf.mxu2  ;;  %1823 = vmatpush.bf16.msrb.mxu0 %v4688_v15 }
  0xcc   : > { %v781_v34 = vpop.f32.mrf.mxu3  ;;  %v516_v35 = vpop.f32.mrf.mxu0  ;;  %v693_v46 = vadd.f32 %v692_v30, %v5581_v50  ;;  %v5257_v30 = vld [vmem:[#allocation2 + $0x10c] sm:$0xf0] }
  0xcd   : > { %v517_v36 = vadd.f32 %v516_v35, %v5570_v32  ;;  %v605_v37 = vpop.f32.mrf.mxu1  ;;  %v782_v48 = vadd.f32 %v781_v34, %v5583_v51  ;;  %v4816_v35 = vor.u32 %v5257_v30, %v4815_v29 }
  0xce   : > { %v606_v38 = vadd.f32 %v605_v37, %v5573_v33  ;;  %v872_v58 = vmax.f32 %v693_v46, 0.0 }
  0xcf   : > { %v874_v40 = vmax.f32 %v517_v36, 0.0  ;;  %v873_v61 = vmax.f32 %v782_v48, 0.0  ;;  %1912 = vmatpush.bf16.msrb.mxu1 %v4816_v35 }
  0xd0   : > { %v875_v44 = vmax.f32 %v606_v38, 0.0 }
  0xd1   : > { %v5649_v45 = vpack.c.bf16 %v874_v40, %v870_v39 }
  0xd2   : > { %v5652_v47 = vpack.c.bf16 %v875_v44, %v871_v41  ;;  %v5212_v41 = vld [vmem:[%s5503_s30 + $0x68] sm:$0xff] }
  0xd3   : > { %7101 = vst [vmem:[#allocation16_spill] sm:$0xff] %v5649_v45  ;;  %v694_v49 = vpop.f32.mrf.mxu2 }
  0xd4   : > { %7102 = vst [vmem:[#allocation17_spill] sm:$0xff] %v5652_v47  ;;  %v695_v53 = vadd.f32 %v694_v49, %v5581_v50  ;;  %v783_v54 = vpop.f32.mrf.mxu3  ;;  %v519_v55 = vpop.f32.mrf.mxu0 }
  0xd5   : > { %v784_v56 = vadd.f32 %v783_v54, %v5583_v51  ;;  %v608_v57 = vpop.f32.mrf.mxu1  ;;  %v520_v13 = vadd.f32 %v519_v55, %v5570_v32 }
  0xd6   : > { %v876_v59 = vmax.f32 %v695_v53, 0.0  ;;  %v609_v17 = vadd.f32 %v608_v57, %v5573_v33 }
  0xd7   : > { %v877_v63 = vmax.f32 %v784_v56, 0.0  ;;  %4633 = vmatmul.msk.bf16.gmra.mxu0 %vm441_vm0, %v5211_v52  ;;  %v878_v23 = vmax.f32 %v520_v13, 0.0 }
  0xd8   : > { %v5659_v0 = vpack.c.bf16 %v876_v59, %v872_v58  ;;  %4649 = vmatmul.msk.bf16.gmra.mxu1 %vm441_vm0, %v5211_v52  ;;  %4665 = vmatmul.msk.bf16.gmra.mxu2 %vm441_vm0, %v5211_v52  ;;  %v879_v31 = vmax.f32 %v609_v17, 0.0 }
  0xd9   : > { %v5663_v1 = vpack.c.bf16 %v877_v63, %v873_v61  ;;  %4681 = vmatmul.msk.bf16.gmra.mxu3 %vm441_vm0, %v5211_v52 }
  0xda   : > { %7103 = vst [vmem:[#allocation18_spill] sm:$0xff] %v5659_v0 }
  0xdb   : > { %7104 = vst [vmem:[#allocation19_spill] sm:$0xff] %v5663_v1  ;;  %v697_v14 = vpop.f32.mrf.mxu2 }
  0xdc   : > { %v786_v18 = vpop.f32.mrf.mxu3  ;;  %v521_v19 = vpop.f32.mrf.mxu0  ;;  %v698_v37 = vadd.f32 %v697_v14, %v5581_v50 }
  0xdd   : > { %v522_v20 = vadd.f32 %v521_v19, %v5570_v32  ;;  %v610_v21 = vpop.f32.mrf.mxu1  ;;  %v787_v39 = vadd.f32 %v786_v18, %v5583_v51 }
  0xde   : > { %v611_v22 = vadd.f32 %v610_v21, %v5573_v33  ;;  %v880_v53 = vmax.f32 %v698_v37, 0.0 }
  0xdf   : > { %v882_v24 = vmax.f32 %v522_v20, 0.0  ;;  %v881_v55 = vmax.f32 %v787_v39, 0.0  ;;  %v5213_v20 = vld [vmem:[%s5503_s30 + $0x70] sm:$0xff] }
  0xe0   : > { %v883_v34 = vmax.f32 %v611_v22, 0.0 }
  0xe1   : > { %v5670_v36 = vpack.c.bf16 %v882_v24, %v878_v23 }
  0xe2   : > { %v5673_v38 = vpack.c.bf16 %v883_v34, %v879_v31 }
  0xe3   : > { %7105 = vst [vmem:[#allocation20_spill] sm:$0xff] %v5670_v36  ;;  %v699_v40 = vpop.f32.mrf.mxu2 }
  0xe4   : > { %7106 = vst [vmem:[#allocation21_spill] sm:$0xff] %v5673_v38  ;;  %v700_v44 = vadd.f32 %v699_v40, %v5581_v50  ;;  %v788_v46 = vpop.f32.mrf.mxu3  ;;  %v524_v48 = vpop.f32.mrf.mxu0  ;;  %v5315_v40 = vld [vmem:[#allocation2 + $0x2e4] sm:$0xf] }
  0xe5   : > { %v789_v49 = vadd.f32 %v788_v46, %v5583_v51  ;;  %v613_v52 = vpop.f32.mrf.mxu1  ;;  %v525_v59 = vadd.f32 %v524_v48, %v5570_v32  ;;  %v4801_v48 = vld [vmem:[#allocation2 + $0xf0] sm:$0xf0] }
  0xe6   : > { %v884_v54 = vmax.f32 %v700_v44, 0.0  ;;  %v614_v63 = vadd.f32 %v613_v52, %v5573_v33  ;;  %v5251_v44 = vld [vmem:[#allocation2 + $0xe4] sm:$0xf]  ;;  %v5185_v52 = vld [vmem:[#allocation2 + $0x3f0] sm:$0xf0] }
  0xe7   : > { %v885_v56 = vmax.f32 %v789_v49, 0.0  ;;  %4634 = vmatmul.msk.bf16.gmra.mxu0 %vm441_vm0, %v5212_v41  ;;  %v886_v7 = vmax.f32 %v525_v59, 0.0  ;;  %v5347_v49 = vld [vmem:[#allocation2 + $0x3e4] sm:$0xf] }
  0xe8   : > { %v5680_v57 = vpack.c.bf16 %v884_v54, %v880_v53  ;;  %4650 = vmatmul.msk.bf16.gmra.mxu1 %vm441_vm0, %v5212_v41  ;;  %4666 = vmatmul.msk.bf16.gmra.mxu2 %vm441_vm0, %v5212_v41  ;;  %v887_v13 = vmax.f32 %v614_v63, 0.0 }
  0xe9   : > { %v5684_v58 = vpack.c.bf16 %v885_v56, %v881_v55  ;;  %4682 = vmatmul.msk.bf16.gmra.mxu3 %vm441_vm0, %v5212_v41  ;;  %v5057_v41 = vld [vmem:[#allocation2 + $0x2f0] sm:$0xf0]  ;;  %v4804_v55 = vor.u32 %v5251_v44, %v4801_v48  ;;  %v5188_v56 = vor.u32 %v5347_v49, %v5185_v52 }
  0xea   : > { %7107 = vst [vmem:[#allocation22_spill] sm:$0xff] %v5680_v57  ;;  %v5060_v46 = vor.u32 %v5315_v40, %v5057_v41 }
  0xeb   : > { %7108 = vst [vmem:[#allocation23_spill] sm:$0xff] %v5684_v58  ;;  %v702_v61 = vpop.f32.mrf.mxu2  ;;  %2172 = vmatpush.bf16.msra.mxu0 %v4804_v55  ;;  %2439 = vmatpush.bf16.msra.mxu3 %v5188_v56 }
  0xec   : > { %v791_v2 = vpop.f32.mrf.mxu3  ;;  %v526_v3 = vpop.f32.mrf.mxu0  ;;  %v703_v16 = vadd.f32 %v702_v61, %v5581_v50  ;;  %2350 = vmatpush.bf16.msra.mxu2 %v5060_v46 }
  0xed   : > { %v527_v4 = vadd.f32 %v526_v3, %v5570_v32  ;;  %v615_v5 = vpop.f32.mrf.mxu1  ;;  %v792_v18 = vadd.f32 %v791_v2, %v5583_v51 }
  0xee   : > { %v616_v6 = vadd.f32 %v615_v5, %v5573_v33  ;;  %v888_v30 = vmax.f32 %v703_v16, 0.0 }
  0xef   : > { %v890_v9 = vmax.f32 %v527_v4, 0.0  ;;  %v889_v34 = vmax.f32 %v792_v18, 0.0 }
  0xf0   : > { %v891_v14 = vmax.f32 %v616_v6, 0.0 }
  0xf1   : > { %v5691_v15 = vpack.c.bf16 %v890_v9, %v886_v7  ;;  %v5283_v7 = vld [vmem:[#allocation2 + $0x1e4] sm:$0xf]  ;;  %v4929_v9 = vld [vmem:[#allocation2 + $0x1f0] sm:$0xf0] }
  0xf2   : > { %v5694_v17 = vpack.c.bf16 %v891_v14, %v887_v13  ;;  %v4932_v16 = vor.u32 %v5283_v7, %v4929_v9 }
  0xf3   : > { %7109 = vst [vmem:[#allocation24_spill] sm:$0xff] %v5691_v15  ;;  %v704_v19 = vpop.f32.mrf.mxu2 }
  0xf4   : > { %7110 = vst [vmem:[#allocation25_spill] sm:$0xff] %v5694_v17  ;;  %v705_v21 = vadd.f32 %v704_v19, %v5581_v50  ;;  %v793_v22 = vpop.f32.mrf.mxu3  ;;  %v529_v23 = vpop.f32.mrf.mxu0  ;;  %2261 = vmatpush.bf16.msra.mxu1 %v4932_v16 }
  0xf5   : > { %v794_v24 = vadd.f32 %v793_v22, %v5583_v51  ;;  %v618_v29 = vpop.f32.mrf.mxu1  ;;  %v530_v53 = vadd.f32 %v529_v23, %v5570_v32  ;;  %v5214_v23 = vld [vmem:[%s5503_s30 + $0x78] sm:$0xff] }
  0xf6   : > { %v892_v31 = vmax.f32 %v705_v21, 0.0  ;;  %v619_v59 = vadd.f32 %v618_v29, %v5573_v33 }
  0xf7   : > { %v893_v35 = vmax.f32 %v794_v24, 0.0  ;;  %4635 = vmatmul.msk.bf16.gmra.mxu0 %vm441_vm0, %v5213_v20  ;;  %v894_v5 = vmax.f32 %v530_v53, 0.0 }
  0xf8   : > { %v5701_v37 = vpack.c.bf16 %v892_v31, %v888_v30  ;;  %4651 = vmatmul.msk.bf16.gmra.mxu1 %vm441_vm0, %v5213_v20  ;;  %4667 = vmatmul.msk.bf16.gmra.mxu2 %vm441_vm0, %v5213_v20  ;;  %v895_v13 = vmax.f32 %v619_v59, 0.0 }
  0xf9   : > { %v5705_v39 = vpack.c.bf16 %v893_v35, %v889_v34  ;;  %4683 = vmatmul.msk.bf16.gmra.mxu3 %vm441_vm0, %v5213_v20 }
  0xfa   : > { %7111 = vst [vmem:[#allocation26_spill] sm:$0xff] %v5701_v37 }
  0xfb   : > { %7112 = vst [vmem:[#allocation27_spill] sm:$0xff] %v5705_v39  ;;  %v707_v54 = vpop.f32.mrf.mxu2 }
  0xfc   : > { %v796_v61 = vpop.f32.mrf.mxu3  ;;  %v531_v63 = vpop.f32.mrf.mxu0  ;;  %v708_v19 = vadd.f32 %v707_v54, %v5581_v50 }
  0xfd   : > { %v532_v2 = vadd.f32 %v531_v63, %v5570_v32  ;;  %v620_v3 = vpop.f32.mrf.mxu1  ;;  %v797_v21 = vadd.f32 %v796_v61, %v5583_v51 }
  0xfe   : > { %v621_v4 = vadd.f32 %v620_v3, %v5573_v33  ;;  %v896_v35 = vmax.f32 %v708_v19, 0.0 }
  0xff   : > { %v898_v6 = vmax.f32 %v532_v2, 0.0  ;;  %v897_v41 = vmax.f32 %v797_v21, 0.0 }
 0x100   : > { %v899_v14 = vmax.f32 %v621_v4, 0.0 }
 0x101   : > { %v5712_v18 = vpack.c.bf16 %v898_v6, %v894_v5 }
 0x102   : > { %v5715_v20 = vpack.c.bf16 %v899_v14, %v895_v13 }
 0x103   : > { %7113 = vst [vmem:[#allocation28_spill] sm:$0xff] %v5712_v18  ;;  %v709_v22 = vpop.f32.mrf.mxu2 }
 0x104   : > { %7114 = vst [vmem:[#allocation29_spill] sm:$0xff] %v5715_v20  ;;  %v710_v24 = vadd.f32 %v709_v22, %v5581_v50  ;;  %v798_v29 = vpop.f32.mrf.mxu3  ;;  %v534_v30 = vpop.f32.mrf.mxu0 }
 0x105   : > { %v799_v31 = vadd.f32 %v798_v29, %v5583_v51  ;;  %v623_v34 = vpop.f32.mrf.mxu1  ;;  %v535_v49 = vadd.f32 %v534_v30, %v5570_v32 }
 0x106   : > { %v900_v40 = vmax.f32 %v710_v24, 0.0  ;;  %v624_v53 = vadd.f32 %v623_v34, %v5573_v33 }
 0x107   : > { %v901_v44 = vmax.f32 %v799_v31, 0.0  ;;  %4636 = vmatmul.msk.bf16.gmra.mxu0 %vm441_vm0, %v5214_v23  ;;  %v902_v63 = vmax.f32 %v535_v49, 0.0  ;;  %v4785_v49 = vld [vmem:[#allocation2 + $0xd0] sm:$0xf0] }
 0x108   : > { %v5722_v46 = vpack.c.bf16 %v900_v40, %v896_v35  ;;  %4652 = vmatmul.msk.bf16.gmra.mxu1 %vm441_vm0, %v5214_v23  ;;  %4668 = vmatmul.msk.bf16.gmra.mxu2 %vm441_vm0, %v5214_v23  ;;  %v903_v3 = vmax.f32 %v624_v53, 0.0  ;;  %v5311_v35 = vld [vmem:[#allocation2 + $0x2c4] sm:$0xf]  ;;  %v5041_v40 = vld [vmem:[#allocation2 + $0x2d0] sm:$0xf0] }
 0x109   : > { %v5726_v48 = vpack.c.bf16 %v901_v44, %v897_v41  ;;  %4684 = vmatmul.msk.bf16.gmra.mxu3 %vm441_vm0, %v5214_v23  ;;  %v5247_v41 = vld [vmem:[#allocation2 + $0xc4] sm:$0xf]  ;;  %v5044_v44 = vor.u32 %v5311_v35, %v5041_v40  ;;  %v5169_v53 = vld [vmem:[#allocation2 + $0x3d0] sm:$0xf0]  ;;  %vm4445_vm0 = vcmask 1040384  }
 0x10a   : > { %7115 = vst [vmem:[#allocation30_spill] sm:$0xff] %v5722_v46 }
 0x10b   : > { %7116 = vst [vmem:[#allocation31_spill] sm:$0xff] %v5726_v48  ;;  %v712_v52 = vpop.f32.mrf.mxu2  ;;  %2351 = vmatpush.bf16.msra.mxu2 %v5044_v44 }
 0x10c   : > { %v801_v54 = vpop.f32.mrf.mxu3  ;;  %v536_v55 = vpop.f32.mrf.mxu0  ;;  %v713_v6 = vadd.f32 %v712_v52, %v5581_v50  ;;  %v5343_v52 = vld [vmem:[#allocation2 + $0x3c4] sm:$0xf] }
 0x10d   : > { %v537_v56 = vadd.f32 %v536_v55, %v5570_v32  ;;  %v625_v59 = vpop.f32.mrf.mxu1  ;;  %v802_v9 = vadd.f32 %v801_v54, %v5583_v51 }
 0x10e   : > { %v626_v61 = vadd.f32 %v625_v59, %v5573_v33  ;;  %v904_v23 = vmax.f32 %v713_v6, 0.0  ;;  %v5172_v59 = vor.u32 %v5343_v52, %v5169_v53 }
 0x10f   : > { %v906_v2 = vmax.f32 %v537_v56, 0.0  ;;  %v905_v29 = vmax.f32 %v802_v9, 0.0  ;;  %v4788_v56 = vor.u32 %v5247_v41, %v4785_v49 }
 0x110   : > { %v907_v4 = vmax.f32 %v626_v61, 0.0  ;;  %2440 = vmatpush.bf16.msra.mxu3 %v5172_v59 }
 0x111   : > { %v5733_v5 = vpack.c.bf16 %v906_v2, %v902_v63  ;;  %2173 = vmatpush.bf16.msra.mxu0 %v4788_v56 }
 0x112   : > { %v5736_v7 = vpack.c.bf16 %v907_v4, %v903_v3 }
 0x113   : > { %7117 = vst [vmem:[#allocation32_spill] sm:$0xff] %v5733_v5  ;;  %v714_v13 = vpop.f32.mrf.mxu2 }
 0x114   : > { %7118 = vst [vmem:[#allocation33_spill] sm:$0xff] %v5736_v7  ;;  %v715_v14 = vadd.f32 %v714_v13, %v5581_v50  ;;  %v803_v16 = vpop.f32.mrf.mxu3  ;;  %v539_v19 = vpop.f32.mrf.mxu0 }
 0x115   : > { %v804_v21 = vadd.f32 %v803_v16, %v5583_v51  ;;  %v628_v22 = vpop.f32.mrf.mxu1  ;;  %v540_v54 = vadd.f32 %v539_v19, %v5570_v32  ;;  %v4913_v16 = vld [vmem:[#allocation2 + $0x1d0] sm:$0xf0] }
 0x116   : > { %v908_v24 = vmax.f32 %v715_v14, 0.0  ;;  %v629_v61 = vadd.f32 %v628_v22, %v5573_v33  ;;  %v5279_v14 = vld [vmem:[#allocation2 + $0x1c4] sm:$0xf] }
 0x117   : > { %v909_v30 = vmax.f32 %v804_v21, 0.0  ;;  %1824 = vmatmul.bf16.vlgmr.msrb.gmra.mxu0 %v5586_v60  ;;  %v910_v9 = vmax.f32 %v540_v54, 0.0 }
 0x118   : > { %v5742_v31 = vpack.c.bf16 %v908_v24, %v904_v23  ;;  %1913 = vmatmul.bf16.vlgmr.msrb.gmra.mxu1 %v5589_v62  ;;  %2002 = vmatmul.bf16.vlgmr.msrb.gmra.mxu2 %v5596_v11  ;;  %v911_v19 = vmax.f32 %v629_v61, 0.0  ;;  %v4916_v23 = vor.u32 %v5279_v14, %v4913_v16 }
 0x119   : > { %v5746_v34 = vpack.c.bf16 %v909_v30, %v905_v29  ;;  %2091 = vmatmul.bf16.vlgmr.msrb.gmra.mxu3 %v5600_v12 }
 0x11a   : > { %7119 = vst [vmem:[#allocation34_spill] sm:$0xff] %v5742_v31  ;;  %2262 = vmatpush.bf16.msra.mxu1 %v4916_v23 }
 0x11b   : > { %7120 = vst [vmem:[#allocation35_spill] sm:$0xff] %v5746_v34  ;;  %v717_v55 = vpop.f32.mrf.mxu2 }
 0x11c   : > { %v806_v63 = vpop.f32.mrf.mxu3  ;;  %v541_v2 = vpop.f32.mrf.mxu0  ;;  %v718_v22 = vadd.f32 %v717_v55, %v5581_v50 }
 0x11d   : > { %v542_v3 = vadd.f32 %v541_v2, %v5570_v32  ;;  %v630_v4 = vpop.f32.mrf.mxu1  ;;  %v807_v30 = vadd.f32 %v806_v63, %v5583_v51 }
 0x11e   : > { %v631_v6 = vadd.f32 %v630_v4, %v5573_v33  ;;  %v912_v53 = vmax.f32 %v718_v22, 0.0 }
 0x11f   : > { %v914_v13 = vmax.f32 %v542_v3, 0.0  ;;  %v913_v56 = vmax.f32 %v807_v30, 0.0 }
 0x120   : > { %v915_v21 = vmax.f32 %v631_v6, 0.0 }
 0x121   : > { %v5753_v24 = vpack.c.bf16 %v914_v13, %v910_v9 }
 0x122   : > { %v5756_v29 = vpack.c.bf16 %v915_v21, %v911_v19 }
 0x123   : > { %7121 = vst [vmem:[#allocation36_spill] sm:$0xff] %v5753_v24  ;;  %v719_v35 = vpop.f32.mrf.mxu2 }
 0x124   : > { %7122 = vst [vmem:[#allocation37_spill] sm:$0xff] %v5756_v29  ;;  %v720_v40 = vadd.f32 %v719_v35, %v5581_v50  ;;  %v808_v41 = vpop.f32.mrf.mxu3  ;;  %v544_v44 = vpop.f32.mrf.mxu0 }
 0x125   : > { %v809_v49 = vadd.f32 %v808_v41, %v5583_v51  ;;  %v633_v52 = vpop.f32.mrf.mxu1  ;;  %v545_v63 = vadd.f32 %v544_v44, %v5570_v32 }
 0x126   : > { %v916_v54 = vmax.f32 %v720_v40, 0.0  ;;  %v634_v3 = vadd.f32 %v633_v52, %v5573_v33 }
 0x127   : > { %v917_v59 = vmax.f32 %v809_v49, 0.0  ;;  %1829 = vmatmul.bf16.gmra.mxu0 %v5607_v25  ;;  %v918_v16 = vmax.f32 %v545_v63, 0.0 }
 0x128   : > { %v5762_v55 = vpack.c.bf16 %v916_v54, %v912_v53  ;;  %1918 = vmatmul.bf16.gmra.mxu1 %v5610_v27  ;;  %2007 = vmatmul.bf16.gmra.mxu2 %v5617_v42  ;;  %v919_v21 = vmax.f32 %v634_v3, 0.0 }
 0x129   : > { %v5766_v61 = vpack.c.bf16 %v917_v59, %v913_v56  ;;  %2096 = vmatmul.bf16.gmra.mxu3 %v5621_v43 }
 0x12a   : > { %7123 = vst [vmem:[#allocation38_spill] sm:$0xff] %v5762_v55 }
 0x12b   : > { %7124 = vst [vmem:[#allocation39_spill] sm:$0xff] %v5766_v61  ;;  %v722_v2 = vpop.f32.mrf.mxu2 }
 0x12c   : > { %v811_v4 = vpop.f32.mrf.mxu3  ;;  %v546_v6 = vpop.f32.mrf.mxu0  ;;  %v723_v30 = vadd.f32 %v722_v2, %v5581_v50 }
 0x12d   : > { %v547_v9 = vadd.f32 %v546_v6, %v5570_v32  ;;  %v635_v13 = vpop.f32.mrf.mxu1  ;;  %v812_v40 = vadd.f32 %v811_v4, %v5583_v51  ;;  %v5307_v4 = vld [vmem:[#allocation2 + $0x2a4] sm:$0xf] }
 0x12e   : > { %v636_v14 = vadd.f32 %v635_v13, %v5573_v33  ;;  %v920_v56 = vmax.f32 %v723_v30, 0.0  ;;  %v5243_v13 = vld [vmem:[#allocation2 + $0xa4] sm:$0xf] }
 0x12f   : > { %v922_v19 = vmax.f32 %v547_v9, 0.0  ;;  %v921_v63 = vmax.f32 %v812_v40, 0.0  ;;  %v5025_v9 = vld [vmem:[#allocation2 + $0x2b0] sm:$0xf0] }
 0x130   : > { %v923_v23 = vmax.f32 %v636_v14, 0.0  ;;  %v5028_v14 = vor.u32 %v5307_v4, %v5025_v9  ;;  %v5275_v9 = vld [vmem:[#allocation2 + $0x1a4] sm:$0xf] }
 0x131   : > { %v5773_v22 = vpack.c.bf16 %v922_v19, %v918_v16  ;;  %v4769_v16 = vld [vmem:[#allocation2 + $0xb0] sm:$0xf0]  ;;  %v5339_v19 = vld [vmem:[#allocation2 + $0x3a4] sm:$0xf] }
 0x132   : > { %v5776_v35 = vpack.c.bf16 %v923_v23, %v919_v21  ;;  %v5153_v21 = vld [vmem:[#allocation2 + $0x3b0] sm:$0xf0]  ;;  %v4772_v40 = vor.u32 %v5243_v13, %v4769_v16  ;;  %2352 = vmatpush.bf16.msra.mxu2 %v5028_v14 }
 0x133   : > { %v724_v41 = vpop.f32.mrf.mxu2 }
 0x134   : > { %v725_v44 = vadd.f32 %v724_v41, %v5581_v50  ;;  %v813_v49 = vpop.f32.mrf.mxu3  ;;  %v549_v52 = vpop.f32.mrf.mxu0  ;;  %v5156_v41 = vor.u32 %v5339_v19, %v5153_v21  ;;  %2174 = vmatpush.bf16.msra.mxu0 %v4772_v40 }
 0x135   : > { %v814_v53 = vadd.f32 %v813_v49, %v5583_v51  ;;  %v638_v54 = vpop.f32.mrf.mxu1  ;;  %v550_v23 = vadd.f32 %v549_v52, %v5570_v32 }
 0x136   : > { %v924_v59 = vmax.f32 %v725_v44, 0.0  ;;  %v639_v44 = vadd.f32 %v638_v54, %v5573_v33  ;;  %2441 = vmatpush.bf16.msra.mxu3 %v5156_v41 }
 0x137   : > { %v925_v3 = vmax.f32 %v814_v53, 0.0  ;;  %1834 = vmatmul.bf16.gmra.mxu0 %v5628_v8 }
 0x138   : > { %v5782_v6 = vpack.c.bf16 %v924_v59, %v920_v56  ;;  %1923 = vmatmul.bf16.gmra.mxu1 %v5631_v10  ;;  %2012 = vmatmul.bf16.gmra.mxu2 %v5638_v26  ;;  %v927_v52 = vmax.f32 %v639_v44, 0.0 }
 0x139   : > { %v5786_v2 = vpack.c.bf16 %v925_v3, %v921_v63  ;;  %2101 = vmatmul.bf16.gmra.mxu3 %v5642_v28  ;;  %v926_v3 = vmax.f32 %v550_v23, 0.0  ;;  %v4897_v28 = vld [vmem:[#allocation2 + $0x1b0] sm:$0xf0] }
 0x13a   : > { %v4900_v13 = vor.u32 %v5275_v9, %v4897_v28 }
 0x13b   : > { %v727_v30 = vpop.f32.mrf.mxu2 }
 0x13c   : > { %v816_v49 = vpop.f32.mrf.mxu3  ;;  %v551_v53 = vpop.f32.mrf.mxu0  ;;  %v728_v54 = vadd.f32 %v727_v30, %v5581_v50  ;;  %2263 = vmatpush.bf16.msra.mxu1 %v4900_v13 }
 0x13d   : > { %v552_v56 = vadd.f32 %v551_v53, %v5570_v32  ;;  %v640_v59 = vpop.f32.mrf.mxu1  ;;  %v817_v14 = vadd.f32 %v816_v49, %v5583_v51 }
 0x13e   : > { %v641_v63 = vadd.f32 %v640_v59, %v5573_v33  ;;  %v928_v44 = vmax.f32 %v728_v54, 0.0 }
 0x13f   : > { %v930_v4 = vmax.f32 %v552_v56, 0.0  ;;  %v929_v28 = vmax.f32 %v817_v14, 0.0 }
 0x140   : > { %v931_v26 = vmax.f32 %v641_v63, 0.0 }
 0x141   : > { %v5793_v16 = vpack.c.bf16 %v930_v4, %v926_v3 }
 0x142   : > { %v5796_v19 = vpack.c.bf16 %v931_v26, %v927_v52 }
 0x143   : > { %7125 = vst [vmem:[#allocation40_spill] sm:$0xff] %v5793_v16  ;;  %v729_v21 = vpop.f32.mrf.mxu2 }
 0x144   : > { %7126 = vst [vmem:[#allocation41_spill] sm:$0xff] %v5796_v19  ;;  %v730_v40 = vadd.f32 %v729_v21, %v5581_v50  ;;  %v818_v41 = vpop.f32.mrf.mxu3  ;;  %v554_v23 = vpop.f32.mrf.mxu0 }
 0x145   : > { %v819_v53 = vadd.f32 %v818_v41, %v5583_v51  ;;  %v643_v56 = vpop.f32.mrf.mxu1  ;;  %v555_v49 = vadd.f32 %v554_v23, %v5570_v32 }
 0x146   : > { %v932_v59 = vmax.f32 %v730_v40, 0.0  ;;  %v644_v4 = vadd.f32 %v643_v56, %v5573_v33 }
 0x147   : > { %v933_v63 = vmax.f32 %v819_v53, 0.0  ;;  %1839 = vmatmul.bf16.gmra.mxu0 %v5649_v45  ;;  %v934_v21 = vmax.f32 %v555_v49, 0.0 }
 0x148   : > { %v5802_v30 = vpack.c.bf16 %v932_v59, %v928_v44  ;;  %1928 = vmatmul.bf16.gmra.mxu1 %v5652_v47  ;;  %2017 = vmatmul.bf16.gmra.mxu2 %v5659_v0  ;;  %v935_v41 = vmax.f32 %v644_v4, 0.0  ;;  %v4881_v47 = vld [vmem:[#allocation2 + $0x190] sm:$0xf0] }
 0x149   : > { %v5806_v26 = vpack.c.bf16 %v933_v63, %v929_v28  ;;  %2106 = vmatmul.bf16.gmra.mxu3 %v5663_v1 }
 0x14a   : > { %7127 = vst [vmem:[#allocation42_spill] sm:$0xff] %v5802_v30 }
 0x14b   : > { %7128 = vst [vmem:[#allocation43_spill] sm:$0xff] %v5806_v26  ;;  %v732_v3 = vpop.f32.mrf.mxu2 }
 0x14c   : > { %v821_v9 = vpop.f32.mrf.mxu3  ;;  %v556_v52 = vpop.f32.mrf.mxu0  ;;  %v733_v59 = vadd.f32 %v732_v3, %v5581_v50 }
 0x14d   : > { %v557_v13 = vadd.f32 %v556_v52, %v5570_v32  ;;  %v645_v54 = vpop.f32.mrf.mxu1  ;;  %v822_v23 = vadd.f32 %v821_v9, %v5583_v51  ;;  %v5303_v9 = vld [vmem:[#allocation2 + $0x284] sm:$0xf] }
 0x14e   : > { %v646_v14 = vadd.f32 %v645_v54, %v5573_v33  ;;  %v936_v49 = vmax.f32 %v733_v59, 0.0  ;;  %v5335_v59 = vld [vmem:[#allocation2 + $0x384] sm:$0xf] }
 0x14f   : > { %v938_v40 = vmax.f32 %v557_v13, 0.0  ;;  %v937_v4 = vmax.f32 %v822_v23, 0.0  ;;  %v5137_v23 = vld [vmem:[#allocation2 + $0x390] sm:$0xf0] }
 0x150   : > { %v939_v53 = vmax.f32 %v646_v14, 0.0 }
 0x151   : > { %v5813_v44 = vpack.c.bf16 %v938_v40, %v934_v21  ;;  %v5009_v40 = vld [vmem:[#allocation2 + $0x290] sm:$0xf0] }
 0x152   : > { %v5816_v28 = vpack.c.bf16 %v939_v53, %v935_v41  ;;  %v5012_v41 = vor.u32 %v5303_v9, %v5009_v40  ;;  %v4753_v53 = vld [vmem:[#allocation2 + $0x90] sm:$0xf0] }
 0x153   : > { %v734_v56 = vpop.f32.mrf.mxu2 }
 0x154   : > { %v735_v63 = vadd.f32 %v734_v56, %v5581_v50  ;;  %v823_v1 = vpop.f32.mrf.mxu3  ;;  %v559_v52 = vpop.f32.mrf.mxu0  ;;  %2353 = vmatpush.bf16.msra.mxu2 %v5012_v41 }
 0x155   : > { %v824_v0 = vadd.f32 %v823_v1, %v5583_v51  ;;  %v648_v54 = vpop.f32.mrf.mxu1  ;;  %v5239_v1 = vld [vmem:[#allocation2 + $0x84] sm:$0xf] }
 0x156   : > { %v940_v13 = vmax.f32 %v735_v63, 0.0  ;;  %v4756_v63 = vor.u32 %v5239_v1, %v4753_v53 }
 0x157   : > { %v941_v14 = vmax.f32 %v824_v0, 0.0  ;;  %1844 = vmatmul.bf16.gmra.mxu0 %v5670_v36  ;;  %v560_v0 = vadd.f32 %v559_v52, %v5570_v32  ;;  %v5271_v36 = vld [vmem:[#allocation2 + $0x184] sm:$0xf] }
 0x158   : > { %v5822_v21 = vpack.c.bf16 %v940_v13, %v936_v49  ;;  %1933 = vmatmul.bf16.gmra.mxu1 %v5673_v38  ;;  %2022 = vmatmul.bf16.gmra.mxu2 %v5680_v57  ;;  %v5140_v49 = vor.u32 %v5335_v59, %v5137_v23  ;;  %v649_v13 = vadd.f32 %v648_v54, %v5573_v33 }
 0x159   : > { %v5826_v3 = vpack.c.bf16 %v941_v14, %v937_v4  ;;  %2111 = vmatmul.bf16.gmra.mxu3 %v5684_v58  ;;  %2175 = vmatpush.bf16.msra.mxu0 %v4756_v63  ;;  %v942_v40 = vmax.f32 %v560_v0, 0.0  ;;  %v4884_v1 = vor.u32 %v5271_v36, %v4881_v47 }
 0x15a   : > { %2442 = vmatpush.bf16.msra.mxu3 %v5140_v49  ;;  %v943_v52 = vmax.f32 %v649_v13, 0.0 }
 0x15b   : > { %v737_v56 = vpop.f32.mrf.mxu2  ;;  %2264 = vmatpush.bf16.msra.mxu1 %v4884_v1 }
 0x15c   : > { %v826_v38 = vpop.f32.mrf.mxu3  ;;  %v561_v57 = vpop.f32.mrf.mxu0  ;;  %v738_v54 = vadd.f32 %v737_v56, %v5581_v50 }
 0x15d   : > { %v562_v4 = vadd.f32 %v561_v57, %v5570_v32  ;;  %v650_v14 = vpop.f32.mrf.mxu1  ;;  %v827_v57 = vadd.f32 %v826_v38, %v5583_v51 }
 0x15e   : > { %v651_v9 = vadd.f32 %v650_v14, %v5573_v33  ;;  %v944_v13 = vmax.f32 %v738_v54, 0.0 }
 0x15f   : > { %v946_v58 = vmax.f32 %v562_v4, 0.0  ;;  %v945_v47 = vmax.f32 %v827_v57, 0.0 }
 0x160   : > { %v947_v45 = vmax.f32 %v651_v9, 0.0 }
 0x161   : > { %v5833_v53 = vpack.c.bf16 %v946_v58, %v942_v40 }
 0x162   : > { %v5836_v59 = vpack.c.bf16 %v947_v45, %v943_v52 }
 0x163   : > { %7129 = vst [vmem:[#allocation44_spill] sm:$0xff] %v5833_v53  ;;  %v739_v41 = vpop.f32.mrf.mxu2 }
 0x164   : > { %7130 = vst [vmem:[#allocation45_spill] sm:$0xff] %v5836_v59  ;;  %v740_v23 = vadd.f32 %v739_v41, %v5581_v50  ;;  %v828_v63 = vpop.f32.mrf.mxu3  ;;  %v564_v0 = vpop.f32.mrf.mxu0 }
 0x165   : > { %v829_v49 = vadd.f32 %v828_v63, %v5583_v51  ;;  %v653_v4 = vpop.f32.mrf.mxu1  ;;  %v565_v38 = vadd.f32 %v564_v0, %v5570_v32 }
 0x166   : > { %v948_v14 = vmax.f32 %v740_v23, 0.0  ;;  %v654_v9 = vadd.f32 %v653_v4, %v5573_v33 }
 0x167   : > { %v949_v36 = vmax.f32 %v829_v49, 0.0  ;;  %1849 = vmatmul.bf16.gmra.mxu0 %v5691_v15  ;;  %v950_v41 = vmax.f32 %v565_v38, 0.0 }
 0x168   : > { %v5842_v58 = vpack.c.bf16 %v948_v14, %v944_v13  ;;  %1938 = vmatmul.bf16.gmra.mxu1 %v5694_v17  ;;  %2027 = vmatmul.bf16.gmra.mxu2 %v5701_v37  ;;  %v951_v63 = vmax.f32 %v654_v9, 0.0 }
 0x169   : > { %v5846_v45 = vpack.c.bf16 %v949_v36, %v945_v47  ;;  %2116 = vmatmul.bf16.gmra.mxu3 %v5705_v39 }
 0x16a   : > { %7131 = vst [vmem:[#allocation46_spill] sm:$0xff] %v5842_v58 }
 0x16b   : > { %7132 = vst [vmem:[#allocation47_spill] sm:$0xff] %v5846_v45  ;;  %v742_v56 = vpop.f32.mrf.mxu2 }
 0x16c   : > { %v831_v40 = vpop.f32.mrf.mxu3  ;;  %v566_v52 = vpop.f32.mrf.mxu0  ;;  %v743_v14 = vadd.f32 %v742_v56, %v5581_v50 }
 0x16d   : > { %v567_v1 = vadd.f32 %v566_v52, %v5570_v32  ;;  %v655_v54 = vpop.f32.mrf.mxu1  ;;  %v832_v0 = vadd.f32 %v831_v40, %v5583_v51  ;;  %v5299_v40 = vld [vmem:[#allocation2 + $0x264] sm:$0xf] }
 0x16e   : > { %v656_v57 = vadd.f32 %v655_v54, %v5573_v33  ;;  %v952_v38 = vmax.f32 %v743_v14, 0.0  ;;  %v5331_v14 = vld [vmem:[#allocation2 + $0x364] sm:$0xf] }
 0x16f   : > { %v954_v23 = vmax.f32 %v567_v1, 0.0  ;;  %v953_v9 = vmax.f32 %v832_v0, 0.0  ;;  %v5121_v0 = vld [vmem:[#allocation2 + $0x370] sm:$0xf0] }
 0x170   : > { %v955_v49 = vmax.f32 %v656_v57, 0.0 }
 0x171   : > { %v5853_v13 = vpack.c.bf16 %v954_v23, %v950_v41  ;;  %v4993_v23 = vld [vmem:[#allocation2 + $0x270] sm:$0xf0] }
 0x172   : > { %v5856_v47 = vpack.c.bf16 %v955_v49, %v951_v63  ;;  %v4996_v63 = vor.u32 %v5299_v40, %v4993_v23  ;;  %v4737_v49 = vld [vmem:[#allocation2 + $0x70] sm:$0xf0] }
 0x173   : > { %v744_v4 = vpop.f32.mrf.mxu2 }
 0x174   : > { %v745_v36 = vadd.f32 %v744_v4, %v5581_v50  ;;  %v833_v39 = vpop.f32.mrf.mxu3  ;;  %v569_v52 = vpop.f32.mrf.mxu0  ;;  %2354 = vmatpush.bf16.msra.mxu2 %v4996_v63 }
 0x175   : > { %v834_v37 = vadd.f32 %v833_v39, %v5583_v51  ;;  %v658_v54 = vpop.f32.mrf.mxu1  ;;  %v5235_v39 = vld [vmem:[#allocation2 + $0x64] sm:$0xf] }
 0x176   : > { %v956_v1 = vmax.f32 %v745_v36, 0.0  ;;  %v4740_v36 = vor.u32 %v5235_v39, %v4737_v49 }
 0x177   : > { %v957_v57 = vmax.f32 %v834_v37, 0.0  ;;  %1854 = vmatmul.bf16.gmra.mxu0 %v5712_v18  ;;  %v570_v37 = vadd.f32 %v569_v52, %v5570_v32 }
 0x178   : > { %v5862_v41 = vpack.c.bf16 %v956_v1, %v952_v38  ;;  %1943 = vmatmul.bf16.gmra.mxu1 %v5715_v20  ;;  %2032 = vmatmul.bf16.gmra.mxu2 %v5722_v46  ;;  %v5124_v38 = vor.u32 %v5331_v14, %v5121_v0  ;;  %v659_v1 = vadd.f32 %v658_v54, %v5573_v33  ;;  %v5267_v54 = vld [vmem:[#allocation2 + $0x164] sm:$0xf]  ;;  %v4865_v14 = vld [vmem:[#allocation2 + $0x170] sm:$0xf0] }
 0x179   : > { %v5866_v56 = vpack.c.bf16 %v957_v57, %v953_v9  ;;  %2121 = vmatmul.bf16.gmra.mxu3 %v5726_v48  ;;  %2176 = vmatpush.bf16.msra.mxu0 %v4740_v36  ;;  %v958_v23 = vmax.f32 %v570_v37, 0.0  ;;  %v4868_v0 = vor.u32 %v5267_v54, %v4865_v14 }
 0x17a   : > { %2443 = vmatpush.bf16.msra.mxu3 %v5124_v38  ;;  %v959_v18 = vmax.f32 %v659_v1, 0.0 }
 0x17b   : > { %v747_v4 = vpop.f32.mrf.mxu2  ;;  %2265 = vmatpush.bf16.msra.mxu1 %v4868_v0 }
 0x17c   : > { %v836_v20 = vpop.f32.mrf.mxu3  ;;  %v571_v46 = vpop.f32.mrf.mxu0  ;;  %v748_v39 = vadd.f32 %v747_v4, %v5581_v50 }
 0x17d   : > { %v572_v9 = vadd.f32 %v571_v46, %v5570_v32  ;;  %v660_v57 = vpop.f32.mrf.mxu1  ;;  %v837_v63 = vadd.f32 %v836_v20, %v5583_v51 }
 0x17e   : > { %v661_v40 = vadd.f32 %v660_v57, %v5573_v33 }
 0x17f   : > { %v962_v48 = vmax.f32 %v572_v9, 0.0 }
 0x180   : > { %v963_v17 = vmax.f32 %v661_v40, 0.0  ;;  %v961_v40 = vmax.f32 %v837_v63, 0.0 }
 0x181   : > { %v5873_v52 = vpack.c.bf16 %v962_v48, %v958_v23  ;;  %v960_v48 = vmax.f32 %v748_v39, 0.0 }
 0x182   : > { %v5876_v49 = vpack.c.bf16 %v963_v17, %v959_v18 }
 0x183   : > { %7133 = vst [vmem:[#allocation48_spill] sm:$0xff] %v5873_v52  ;;  %v749_v46 = vpop.f32.mrf.mxu2 }
 0x184   : > { %7134 = vst [vmem:[#allocation49_spill] sm:$0xff] %v5876_v49  ;;  %v750_v36 = vadd.f32 %v749_v46, %v5581_v50  ;;  %v838_v38 = vpop.f32.mrf.mxu3  ;;  %v574_v57 = vpop.f32.mrf.mxu0 }
 0x185   : > { %v839_v37 = vadd.f32 %v838_v38, %v5583_v51  ;;  %v663_v1 = vpop.f32.mrf.mxu1  ;;  %v575_v20 = vadd.f32 %v574_v57, %v5570_v32 }
 0x186   : > { %v964_v9 = vmax.f32 %v750_v36, 0.0  ;;  %v664_v39 = vadd.f32 %v663_v1, %v5573_v33  ;;  %v5896_v36 = vld [vmem:[%s6989_s4] sm:$0xf] }
 0x187   : > { %v965_v4 = vmax.f32 %v839_v37, 0.0  ;;  %1859 = vmatmul.bf16.gmra.mxu0 %v5733_v5  ;;  %7137 = vst [vmem:[#allocation52_spill] sm:$0xff] %v5896_v36  ;;  %v966_v38 = vmax.f32 %v575_v20, 0.0  ;;  %v5901_v1 = vperm.slane %v5896_v36, 0 }
 0x188   : > { %v5882_v17 = vpack.c.bf16 %v964_v9, %v960_v48  ;;  %1948 = vmatmul.bf16.gmra.mxu1 %v5736_v7  ;;  %2037 = vmatmul.bf16.gmra.mxu2 %v5742_v31  ;;  %v967_v48 = vmax.f32 %v664_v39, 0.0 }
 0x189   : > { %v5886_v18 = vpack.c.bf16 %v965_v4, %v961_v40  ;;  %2126 = vmatmul.bf16.gmra.mxu3 %v5746_v34 }
 0x18a   : > { %7135 = vst [vmem:[#allocation50_spill] sm:$0xff] %v5882_v17 }
 0x18b   : > { %7136 = vst [vmem:[#allocation51_spill] sm:$0xff] %v5886_v18  ;;  %v752_v23 = vpop.f32.mrf.mxu2 }
 0x18c   : > { %v841_v54 = vpop.f32.mrf.mxu3  ;;  %v576_v14 = vpop.f32.mrf.mxu0  ;;  %v753_v40 = vadd.f32 %v752_v23, %v5581_v50 }
 0x18d   : > { %v577_v63 = vadd.f32 %v576_v14, %v5570_v32  ;;  %v665_v46 = vpop.f32.mrf.mxu1 }
 0x18e   : > { %v666_v0 = vadd.f32 %v665_v46, %v5573_v33  ;;  %v842_v33 = vadd.f32 %v841_v54, %v5583_v51  ;;  %v5231_v54 = vld [vmem:[#allocation2 + $0x44] sm:$0xf] }
 0x18f   : > { %v970_v37 = vmax.f32 %v577_v63, 0.0 }
 0x190   : > { %v971_v9 = vmax.f32 %v666_v0, 0.0  ;;  %v968_v0 = vmax.f32 %v753_v40, 0.0  ;;  %v4721_v40 = vld [vmem:[#allocation2 + $0x50] sm:$0xf0] }
 0x191   : > { %v5898_v57 = vpack.c.bf16 %v970_v37, %v966_v38  ;;  %v969_v37 = vmax.f32 %v842_v33, 0.0  ;;  %v5327_v33 = vld [vmem:[#allocation2 + $0x344] sm:$0xf] }
 0x192   : > { %v5904_v32 = vpack.c.bf16 %v971_v9, %v967_v48 }
 0x193   : > { %7138 = vst [vmem:[#allocation53_spill] sm:$0xff] %v5898_v57  ;;  %v754_v4 = vpop.f32.mrf.mxu2 }
 0x194   : > { %7139 = vst [vmem:[#allocation54_spill] sm:$0xff] %v5904_v32  ;;  %v755_v14 = vadd.f32 %v754_v4, %v5581_v50  ;;  %v843_v46 = vpop.f32.mrf.mxu3  ;;  %v1825_v34 = vpop.f32.mrf.mxu0  ;;  %v5105_v4 = vld [vmem:[#allocation2 + $0x350] sm:$0xf0] }
 0x195   : > { %v844_v20 = vadd.f32 %v843_v46, %v5583_v51  ;;  %v1826_v39 = vadd.f32 %v1825_v34, %v5901_v1  ;;  %v1914_v63 = vpop.f32.mrf.mxu1  ;;  %v5295_v51 = vld [vmem:[#allocation2 + $0x244] sm:$0xf]  ;;  %v4977_v34 = vld [vmem:[#allocation2 + $0x250] sm:$0xf0] }
 0x196   : > { %v972_v38 = vmax.f32 %v755_v14, 0.0  ;;  %v4980_v9 = vor.u32 %v5295_v51, %v4977_v34 }
 0x197   : > { %v973_v36 = vmax.f32 %v844_v20, 0.0  ;;  %v1915_v31 = vadd.f32 %v1914_v63, %v1826_v39  ;;  %1864 = vmatmul.bf16.gmra.mxu0 %v5753_v24  ;;  %v4724_v39 = vor.u32 %v5231_v54, %v4721_v40  ;;  %v5108_v63 = vor.u32 %v5327_v33, %v5105_v4 }
 0x198   : > { %v5911_v23 = vpack.c.bf16 %v972_v38, %v968_v0  ;;  %1953 = vmatmul.bf16.gmra.mxu1 %v5756_v29  ;;  %2042 = vmatmul.bf16.gmra.mxu2 %v5762_v55  ;;  %v4849_v55 = vld [vmem:[#allocation2 + $0x150] sm:$0xf0] }
 0x199   : > { %v5915_v50 = vpack.c.bf16 %v973_v36, %v969_v37  ;;  %2131 = vmatmul.bf16.gmra.mxu3 %v5766_v61  ;;  %2355 = vmatpush.bf16.msra.mxu2 %v4980_v9  ;;  %v5263_v61 = vld [vmem:[#allocation2 + $0x144] sm:$0xf] }
 0x19a   : > { %7140 = vst [vmem:[#allocation55_spill] sm:$0xff] %v5911_v23  ;;  %2177 = vmatpush.bf16.msra.mxu0 %v4724_v39  ;;  %2444 = vmatpush.bf16.msra.mxu3 %v5108_v63  ;;  %v4852_v34 = vor.u32 %v5263_v61, %v4849_v55 }
 0x19b   : > { %7141 = vst [vmem:[#allocation56_spill] sm:$0xff] %v5915_v50  ;;  %v2003_v48 = vpop.f32.mrf.mxu2 }
 0x19c   : > { %v2004_v14 = vadd.f32 %v2003_v48, %v1915_v31  ;;  %v2092_v46 = vpop.f32.mrf.mxu3  ;;  %v1827_v20 = vpop.f32.mrf.mxu0  ;;  %2266 = vmatpush.bf16.msra.mxu1 %v4852_v34 }
 0x19d   : > { %v1828_v0 = vadd.f32 %v1827_v20, %v5901_v1  ;;  %v1916_v38 = vpop.f32.mrf.mxu1 }
 0x19e   : > { %v5919_v36 = vadd.f32 %v2092_v46, %v2004_v14 }
 0x19f   : > { %v1917_v37 = vadd.f32 %v1916_v38, %v1828_v0 }
 0x1a3   : > { %v2005_v51 = vpop.f32.mrf.mxu2 }
 0x1a4   : > { %v2006_v29 = vadd.f32 %v2005_v51, %v1917_v37  ;;  %v2094_v24 = vpop.f32.mrf.mxu3  ;;  %v1830_v31 = vpop.f32.mrf.mxu0 }
 0x1a5   : > { %v1831_v48 = vadd.f32 %v1830_v31, %v5901_v1  ;;  %v1919_v54 = vpop.f32.mrf.mxu1  ;;  %v5291_v31 = vld [vmem:[#allocation2 + $0x224] sm:$0xf] }
 0x1a6   : > { %v5922_v40 = vadd.f32 %v2094_v24, %v2006_v29 }
 0x1a7   : > { %v1920_v33 = vadd.f32 %v1919_v54, %v1831_v48  ;;  %1869 = vmatmul.bf16.gmra.mxu0 %v5773_v22  ;;  %v4961_v48 = vld [vmem:[#allocation2 + $0x230] sm:$0xf0]  ;;  %v5227_v54 = vld [vmem:[#allocation2 + $0x24] sm:$0xf] }
 0x1a8   : > { %1958 = vmatmul.bf16.gmra.mxu1 %v5776_v35  ;;  %2047 = vmatmul.bf16.gmra.mxu2 %v5782_v6 }
 0x1a9   : > { %2136 = vmatmul.bf16.gmra.mxu3 %v5786_v2 }
 0x1ab   : > { %v2008_v9 = vpop.f32.mrf.mxu2 }
 0x1ac   : > { %v2009_v55 = vadd.f32 %v2008_v9, %v1920_v33  ;;  %v2097_v61 = vpop.f32.mrf.mxu3  ;;  %v1832_v4 = vpop.f32.mrf.mxu0  ;;  %v4964_v9 = vor.u32 %v5291_v31, %v4961_v48 }
 0x1ad   : > { %v1833_v14 = vadd.f32 %v1832_v4, %v5901_v1  ;;  %v1921_v46 = vpop.f32.mrf.mxu1  ;;  %v5089_v4 = vld [vmem:[#allocation2 + $0x330] sm:$0xf0] }
 0x1ae   : > { %v5929_v20 = vadd.f32 %v2097_v61, %v2009_v55  ;;  %v4705_v55 = vld [vmem:[#allocation2 + $0x30] sm:$0xf0]  ;;  %v5323_v61 = vld [vmem:[#allocation2 + $0x324] sm:$0xf]  ;;  %2356 = vmatpush.bf16.msra.mxu2 %v4964_v9 }
 0x1af   : > { %v1922_v24 = vadd.f32 %v1921_v46, %v1833_v14 }
 0x1b3   : > { %v2010_v29 = vpop.f32.mrf.mxu2 }
 0x1b4   : > { %v2011_v39 = vadd.f32 %v2010_v29, %v1922_v24  ;;  %v2099_v63 = vpop.f32.mrf.mxu3  ;;  %v1835_v0 = vpop.f32.mrf.mxu0  ;;  %v4708_v29 = vor.u32 %v5227_v54, %v4705_v55 }
 0x1b5   : > { %v1836_v38 = vadd.f32 %v1835_v0, %v5901_v1  ;;  %v1924_v37 = vpop.f32.mrf.mxu1 }
 0x1b6   : > { %v5932_v51 = vadd.f32 %v2099_v63, %v2011_v39  ;;  %v5092_v39 = vor.u32 %v5323_v61, %v5089_v4  ;;  %2178 = vmatpush.bf16.msra.mxu0 %v4708_v29 }
 0x1b7   : > { %v1925_v34 = vadd.f32 %v1924_v37, %v1836_v38  ;;  %1874 = vmatmul.bf16.gmra.mxu0 %v5793_v16 }
 0x1b8   : > { %1963 = vmatmul.bf16.gmra.mxu1 %v5796_v19  ;;  %2052 = vmatmul.bf16.gmra.mxu2 %v5802_v30  ;;  %v4833_v30 = vld [vmem:[#allocation2 + $0x130] sm:$0xf0] }
 0x1b9   : > { %2141 = vmatmul.bf16.gmra.mxu3 %v5806_v26  ;;  %v5259_v26 = vld [vmem:[#allocation2 + $0x124] sm:$0xf] }
 0x1ba   : > { %2445 = vmatpush.bf16.msra.mxu3 %v5092_v39  ;;  %v4836_v48 = vor.u32 %v5259_v26, %v4833_v30 }
 0x1bb   : > { %v2013_v33 = vpop.f32.mrf.mxu2 }
 0x1bc   : > { %v2014_v14 = vadd.f32 %v2013_v33, %v1925_v34  ;;  %v2102_v46 = vpop.f32.mrf.mxu3  ;;  %v1837_v24 = vpop.f32.mrf.mxu0  ;;  %2267 = vmatpush.bf16.msra.mxu1 %v4836_v48 }
 0x1bd   : > { %v1838_v63 = vadd.f32 %v1837_v24, %v5901_v1  ;;  %v1926_v0 = vpop.f32.mrf.mxu1 }
 0x1be   : > { %v5939_v38 = vadd.f32 %v2102_v46, %v2014_v14 }
 0x1bf   : > { %v1927_v37 = vadd.f32 %v1926_v0, %v1838_v63 }
 0x1c3   : > { %v2015_v31 = vpop.f32.mrf.mxu2 }
 0x1c4   : > { %v2016_v19 = vadd.f32 %v2015_v31, %v1927_v37  ;;  %v2104_v16 = vpop.f32.mrf.mxu3  ;;  %v1840_v34 = vpop.f32.mrf.mxu0 }
 0x1c5   : > { %v1841_v33 = vadd.f32 %v1840_v34, %v5901_v1  ;;  %v1929_v54 = vpop.f32.mrf.mxu1  ;;  %v5287_v34 = vld [vmem:[#allocation2 + $0x204] sm:$0xf] }
 0x1c6   : > { %v5942_v55 = vadd.f32 %v2104_v16, %v2016_v19 }
 0x1c7   : > { %v1930_v61 = vadd.f32 %v1929_v54, %v1841_v33  ;;  %1879 = vmatmul.bf16.gmra.mxu0 %v5813_v44  ;;  %v4945_v33 = vld [vmem:[#allocation2 + $0x210] sm:$0xf0]  ;;  %v5223_v54 = vld [vmem:[#allocation2 + $0x4] sm:$0xf] }
 0x1c8   : > { %1968 = vmatmul.bf16.gmra.mxu1 %v5816_v28  ;;  %2057 = vmatmul.bf16.gmra.mxu2 %v5822_v21 }
 0x1c9   : > { %2146 = vmatmul.bf16.gmra.mxu3 %v5826_v3 }
 0x1cb   : > { %v2018_v9 = vpop.f32.mrf.mxu2 }
 0x1cc   : > { %v2019_v30 = vadd.f32 %v2018_v9, %v1930_v61  ;;  %v2107_v26 = vpop.f32.mrf.mxu3  ;;  %v1842_v4 = vpop.f32.mrf.mxu0  ;;  %v4948_v9 = vor.u32 %v5287_v34, %v4945_v33 }
 0x1cd   : > { %v1843_v14 = vadd.f32 %v1842_v4, %v5901_v1  ;;  %v1931_v46 = vpop.f32.mrf.mxu1  ;;  %v5073_v4 = vld [vmem:[#allocation2 + $0x310] sm:$0xf0] }
 0x1ce   : > { %v5949_v24 = vadd.f32 %v2107_v26, %v2019_v30  ;;  %v4689_v30 = vld [vmem:[#allocation2 + $0x10] sm:$0xf0]  ;;  %v5319_v26 = vld [vmem:[#allocation2 + $0x304] sm:$0xf]  ;;  %2357 = vmatpush.bf16.msra.mxu2 %v4948_v9 }
 0x1cf   : > { %v1932_v16 = vadd.f32 %v1931_v46, %v1843_v14 }
 0x1d3   : > { %v2020_v19 = vpop.f32.mrf.mxu2 }
 0x1d4   : > { %v2021_v29 = vadd.f32 %v2020_v19, %v1932_v16  ;;  %v2109_v39 = vpop.f32.mrf.mxu3  ;;  %v1845_v63 = vpop.f32.mrf.mxu0  ;;  %v4692_v19 = vor.u32 %v5223_v54, %v4689_v30 }
 0x1d5   : > { %v1846_v0 = vadd.f32 %v1845_v63, %v5901_v1  ;;  %v1934_v37 = vpop.f32.mrf.mxu1 }
 0x1d6   : > { %v5952_v31 = vadd.f32 %v2109_v39, %v2021_v29  ;;  %v5076_v29 = vor.u32 %v5319_v26, %v5073_v4  ;;  %2179 = vmatpush.bf16.msra.mxu0 %v4692_v19 }
 0x1d7   : > { %v1935_v48 = vadd.f32 %v1934_v37, %v1846_v0  ;;  %1884 = vmatmul.bf16.gmra.mxu0 %v5833_v53 }
 0x1d8   : > { %1973 = vmatmul.bf16.gmra.mxu1 %v5836_v59  ;;  %2062 = vmatmul.bf16.gmra.mxu2 %v5842_v58  ;;  %v4817_v58 = vld [vmem:[#allocation2 + $0x110] sm:$0xf0] }
 0x1d9   : > { %2151 = vmatmul.bf16.gmra.mxu3 %v5846_v45  ;;  %v5255_v45 = vld [vmem:[#allocation2 + $0x104] sm:$0xf] }
 0x1da   : > { %2446 = vmatpush.bf16.msra.mxu3 %v5076_v29  ;;  %v4820_v33 = vor.u32 %v5255_v45, %v4817_v58 }
 0x1db   : > { %v2023_v61 = vpop.f32.mrf.mxu2 }
 0x1dc   : > { %v2024_v14 = vadd.f32 %v2023_v61, %v1935_v48  ;;  %v2112_v46 = vpop.f32.mrf.mxu3  ;;  %v1847_v16 = vpop.f32.mrf.mxu0  ;;  %2268 = vmatpush.bf16.msra.mxu1 %v4820_v33 }
 0x1dd   : > { %v1848_v39 = vadd.f32 %v1847_v16, %v5901_v1  ;;  %v1936_v63 = vpop.f32.mrf.mxu1 }
 0x1de   : > { %v5959_v0 = vadd.f32 %v2112_v46, %v2024_v14 }
 0x1df   : > { %v1937_v37 = vadd.f32 %v1936_v63, %v1848_v39 }
 0x1e3   : > { %v2025_v34 = vpop.f32.mrf.mxu2 }
 0x1e4   : > { %v2026_v59 = vadd.f32 %v2025_v34, %v1937_v37  ;;  %v2114_v53 = vpop.f32.mrf.mxu3  ;;  %v1850_v48 = vpop.f32.mrf.mxu0 }
 0x1e5   : > { %v1851_v61 = vadd.f32 %v1850_v48, %v5901_v1  ;;  %v1939_v54 = vpop.f32.mrf.mxu1  ;;  %v5063_v48 = vld [vmem:[#allocation2 + $0x2e8] sm:$0xf] }
 0x1e6   : > { %v5962_v30 = vadd.f32 %v2114_v53, %v2026_v59 }
 0x1e7   : > { %v1940_v26 = vadd.f32 %v1939_v54, %v1851_v61  ;;  %1889 = vmatmul.bf16.gmra.mxu0 %v5853_v13  ;;  %v5318_v61 = vld [vmem:[#allocation2 + $0x2f4] sm:$0xf0]  ;;  %v4807_v54 = vld [vmem:[#allocation2 + $0xe8] sm:$0xf] }
 0x1e8   : > { %1978 = vmatmul.bf16.gmra.mxu1 %v5856_v47  ;;  %2067 = vmatmul.bf16.gmra.mxu2 %v5862_v41 }
 0x1e9   : > { %2156 = vmatmul.bf16.gmra.mxu3 %v5866_v56 }
 0x1eb   : > { %v2028_v9 = vpop.f32.mrf.mxu2 }
 0x1ec   : > { %v2029_v58 = vadd.f32 %v2028_v9, %v1940_v26  ;;  %v2117_v45 = vpop.f32.mrf.mxu3  ;;  %v1852_v4 = vpop.f32.mrf.mxu0  ;;  %v5064_v9 = vor.u32 %v5318_v61, %v5063_v48 }
 0x1ed   : > { %v1853_v14 = vadd.f32 %v1852_v4, %v5901_v1  ;;  %v1941_v46 = vpop.f32.mrf.mxu1  ;;  %v5350_v4 = vld [vmem:[#allocation2 + $0x3f4] sm:$0xf0] }
 0x1ee   : > { %v5969_v16 = vadd.f32 %v2117_v45, %v2029_v58  ;;  %v5254_v58 = vld [vmem:[#allocation2 + $0xf4] sm:$0xf0]  ;;  %v5191_v45 = vld [vmem:[#allocation2 + $0x3e8] sm:$0xf]  ;;  %2706 = vmatpush.bf16.msrb.mxu2 %v5064_v9 }
 0x1ef   : > { %v1942_v53 = vadd.f32 %v1941_v46, %v1853_v14 }
 0x1f3   : > { %v2030_v59 = vpop.f32.mrf.mxu2 }
 0x1f4   : > { %v2031_v19 = vadd.f32 %v2030_v59, %v1942_v53  ;;  %v2119_v29 = vpop.f32.mrf.mxu3  ;;  %v1855_v39 = vpop.f32.mrf.mxu0  ;;  %v4808_v59 = vor.u32 %v5254_v58, %v4807_v54 }
 0x1f5   : > { %v1856_v63 = vadd.f32 %v1855_v39, %v5901_v1  ;;  %v1944_v37 = vpop.f32.mrf.mxu1 }
 0x1f6   : > { %v5972_v34 = vadd.f32 %v2119_v29, %v2031_v19  ;;  %v5192_v19 = vor.u32 %v5350_v4, %v5191_v45  ;;  %2528 = vmatpush.bf16.msrb.mxu0 %v4808_v59 }
 0x1f7   : > { %v1945_v33 = vadd.f32 %v1944_v37, %v1856_v63  ;;  %1894 = vmatmul.bf16.gmra.mxu0 %v5873_v52 }
 0x1f8   : > { %1983 = vmatmul.bf16.gmra.mxu1 %v5876_v49  ;;  %2072 = vmatmul.bf16.gmra.mxu2 %v5882_v17  ;;  %v5286_v17 = vld [vmem:[#allocation2 + $0x1f4] sm:$0xf0] }
 0x1f9   : > { %2161 = vmatmul.bf16.gmra.mxu3 %v5886_v18  ;;  %v4935_v18 = vld [vmem:[#allocation2 + $0x1e8] sm:$0xf] }
 0x1fa   : > { %2795 = vmatpush.bf16.msrb.mxu3 %v5192_v19  ;;  %v4936_v61 = vor.u32 %v5286_v17, %v4935_v18 }
 0x1fb   : > { %v2033_v26 = vpop.f32.mrf.mxu2 }
 0x1fc   : > { %v2034_v14 = vadd.f32 %v2033_v26, %v1945_v33  ;;  %v2122_v46 = vpop.f32.mrf.mxu3  ;;  %v1857_v53 = vpop.f32.mrf.mxu0  ;;  %2617 = vmatpush.bf16.msrb.mxu1 %v4936_v61 }
 0x1fd   : > { %v1858_v29 = vadd.f32 %v1857_v53, %v5901_v1  ;;  %v1946_v39 = vpop.f32.mrf.mxu1 }
 0x1fe   : > { %v5979_v63 = vadd.f32 %v2122_v46, %v2034_v14 }
 0x1ff   : > { %v1947_v37 = vadd.f32 %v1946_v39, %v1858_v29 }
 0x203   : > { %v2035_v48 = vpop.f32.mrf.mxu2 }
 0x204   : > { %v2036_v49 = vadd.f32 %v2035_v48, %v1947_v37  ;;  %v2124_v52 = vpop.f32.mrf.mxu3  ;;  %v1860_v33 = vpop.f32.mrf.mxu0 }
 0x205   : > { %v1861_v26 = vadd.f32 %v1860_v33, %v5901_v1  ;;  %v1949_v54 = vpop.f32.mrf.mxu1  ;;  %v5047_v33 = vld [vmem:[#allocation2 + $0x2c8] sm:$0xf] }
 0x206   : > { %v5982_v58 = vadd.f32 %v2124_v52, %v2036_v49 }
 0x207   : > { %v1950_v45 = vadd.f32 %v1949_v54, %v1861_v26  ;;  %1899 = vmatmul.bf16.gmra.mxu0 %v5898_v57  ;;  %v5314_v26 = vld [vmem:[#allocation2 + $0x2d4] sm:$0xf0]  ;;  %v4791_v54 = vld [vmem:[#allocation2 + $0xc8] sm:$0xf] }
 0x208   : > { %1988 = vmatmul.bf16.gmra.mxu1 %v5904_v32  ;;  %2077 = vmatmul.bf16.gmra.mxu2 %v5911_v23 }
 0x209   : > { %2166 = vmatmul.bf16.gmra.mxu3 %v5915_v50 }
 0x20b   : > { %v2038_v9 = vpop.f32.mrf.mxu2 }
 0x20c   : > { %v2039_v17 = vadd.f32 %v2038_v9, %v1950_v45  ;;  %v2127_v18 = vpop.f32.mrf.mxu3  ;;  %v1862_v4 = vpop.f32.mrf.mxu0  ;;  %v5048_v9 = vor.u32 %v5314_v26, %v5047_v33 }
 0x20d   : > { %v1863_v14 = vadd.f32 %v1862_v4, %v5901_v1  ;;  %v1951_v46 = vpop.f32.mrf.mxu1  ;;  %v5346_v4 = vld [vmem:[#allocation2 + $0x3d4] sm:$0xf0] }
 0x20e   : > { %v5989_v53 = vadd.f32 %v2127_v18, %v2039_v17  ;;  %v5250_v17 = vld [vmem:[#allocation2 + $0xd4] sm:$0xf0]  ;;  %v5175_v18 = vld [vmem:[#allocation2 + $0x3c8] sm:$0xf]  ;;  %2707 = vmatpush.bf16.msrb.mxu2 %v5048_v9 }
 0x20f   : > { %v1952_v52 = vadd.f32 %v1951_v46, %v1863_v14 }
 0x213   : > { %v2040_v49 = vpop.f32.mrf.mxu2 }
 0x214   : > { %v2041_v59 = vadd.f32 %v2040_v49, %v1952_v52  ;;  %v2129_v19 = vpop.f32.mrf.mxu3  ;;  %v1865_v29 = vpop.f32.mrf.mxu0  ;;  %v4792_v49 = vor.u32 %v5250_v17, %v4791_v54 }
 0x215   : > { %v1866_v39 = vadd.f32 %v1865_v29, %v5901_v1  ;;  %v1954_v37 = vpop.f32.mrf.mxu1 }
 0x216   : > { %v5992_v48 = vadd.f32 %v2129_v19, %v2041_v59  ;;  %v5176_v59 = vor.u32 %v5346_v4, %v5175_v18  ;;  %2529 = vmatpush.bf16.msrb.mxu0 %v4792_v49 }
 0x217   : > { %v1955_v61 = vadd.f32 %v1954_v37, %v1866_v39  ;;  %2180 = vmatmul.bf16.vlgmr.msra.gmra.mxu0 %v5586_v60 }
 0x218   : > { %2269 = vmatmul.bf16.vlgmr.msra.gmra.mxu1 %v5589_v62  ;;  %2358 = vmatmul.bf16.vlgmr.msra.gmra.mxu2 %v5596_v11  ;;  %v5282_v11 = vld [vmem:[#allocation2 + $0x1d4] sm:$0xf0] }
 0x219   : > { %2447 = vmatmul.bf16.vlgmr.msra.gmra.mxu3 %v5600_v12  ;;  %v4919_v12 = vld [vmem:[#allocation2 + $0x1c8] sm:$0xf] }
 0x21a   : > { %2796 = vmatpush.bf16.msrb.mxu3 %v5176_v59  ;;  %v4920_v26 = vor.u32 %v5282_v11, %v4919_v12 }
 0x21b   : > { %v2043_v45 = vpop.f32.mrf.mxu2 }
 0x21c   : > { %v2044_v14 = vadd.f32 %v2043_v45, %v1955_v61  ;;  %v2132_v46 = vpop.f32.mrf.mxu3  ;;  %v1867_v52 = vpop.f32.mrf.mxu0  ;;  %2618 = vmatpush.bf16.msrb.mxu1 %v4920_v26 }
 0x21d   : > { %v1868_v19 = vadd.f32 %v1867_v52, %v5901_v1  ;;  %v1956_v29 = vpop.f32.mrf.mxu1 }
 0x21e   : > { %v5999_v39 = vadd.f32 %v2132_v46, %v2044_v14 }
 0x21f   : > { %v1957_v37 = vadd.f32 %v1956_v29, %v1868_v19 }
 0x223   : > { %v2045_v33 = vpop.f32.mrf.mxu2 }
 0x224   : > { %v2046_v62 = vadd.f32 %v2045_v33, %v1957_v37  ;;  %v2134_v60 = vpop.f32.mrf.mxu3  ;;  %v1870_v61 = vpop.f32.mrf.mxu0 }
 0x225   : > { %v1871_v45 = vadd.f32 %v1870_v61, %v5901_v1  ;;  %v1959_v54 = vpop.f32.mrf.mxu1  ;;  %v7144_v61 = vld [vmem:[#allocation14_spill] sm:$0xff] }
 0x226   : > { %v6002_v17 = vadd.f32 %v2134_v60, %v2046_v62 }
 0x227   : > { %v1960_v18 = vadd.f32 %v1959_v54, %v1871_v45  ;;  %2185 = vmatmul.bf16.gmra.mxu0 %v5607_v25  ;;  %v7145_v45 = vld [vmem:[#allocation15_spill] sm:$0xff]  ;;  %v5031_v54 = vld [vmem:[#allocation2 + $0x2a8] sm:$0xf] }
 0x228   : > { %7142 = vst [vmem:[#allocation57_spill] sm:$0xff] %v6002_v17  ;;  %2274 = vmatmul.bf16.gmra.mxu1 %v5610_v27  ;;  %2363 = vmatmul.bf16.gmra.mxu2 %v5617_v42 }
 0x229   : > { %2452 = vmatmul.bf16.gmra.mxu3 %v5621_v43 }
 0x22b   : > { %v2048_v9 = vpop.f32.mrf.mxu2 }
 0x22c   : > { %v2049_v11 = vadd.f32 %v2048_v9, %v1960_v18  ;;  %v2137_v12 = vpop.f32.mrf.mxu3  ;;  %v1872_v4 = vpop.f32.mrf.mxu0  ;;  %v5310_v18 = vld [vmem:[#allocation2 + $0x2b4] sm:$0xf0]  ;;  %v4775_v9 = vld [vmem:[#allocation2 + $0xa8] sm:$0xf] }
 0x22d   : > { %v1873_v14 = vadd.f32 %v1872_v4, %v5901_v1  ;;  %v1961_v46 = vpop.f32.mrf.mxu1  ;;  %v5246_v4 = vld [vmem:[#allocation2 + $0xb4] sm:$0xf0] }
 0x22e   : > { %v6009_v52 = vadd.f32 %v2137_v12, %v2049_v11  ;;  %v5032_v12 = vor.u32 %v5310_v18, %v5031_v54 }
 0x22f   : > { %v1962_v60 = vadd.f32 %v1961_v46, %v1873_v14  ;;  %v5159_v14 = vld [vmem:[#allocation2 + $0x3a8] sm:$0xf]  ;;  %v5342_v46 = vld [vmem:[#allocation2 + $0x3b4] sm:$0xf0] }
 0x230   : > { %2708 = vmatpush.bf16.msrb.mxu2 %v5032_v12  ;;  %v7148_v12 = vld [vmem:[#allocation16_spill] sm:$0xff] }
 0x233   : > { %v2050_v62 = vpop.f32.mrf.mxu2 }
 0x234   : > { %v2051_v49 = vadd.f32 %v2050_v62, %v1962_v60  ;;  %v2139_v59 = vpop.f32.mrf.mxu3  ;;  %v1875_v19 = vpop.f32.mrf.mxu0 }
 0x235   : > { %v1876_v29 = vadd.f32 %v1875_v19, %v5901_v1  ;;  %v1964_v37 = vpop.f32.mrf.mxu1  ;;  %v5160_v19 = vor.u32 %v5342_v46, %v5159_v14  ;;  %v7149_v46 = vld [vmem:[#allocation17_spill] sm:$0xff] }
 0x236   : > { %v6012_v33 = vadd.f32 %v2139_v59, %v2051_v49  ;;  %v4776_v59 = vor.u32 %v5246_v4, %v4775_v9 }
 0x237   : > { %v1965_v26 = vadd.f32 %v1964_v37, %v1876_v29  ;;  %2190 = vmatmul.bf16.gmra.mxu0 %v5628_v8  ;;  %2797 = vmatpush.bf16.msrb.mxu3 %v5160_v19 }
 0x238   : > { %7143 = vst [vmem:[#allocation58_spill] sm:$0xff] %v6012_v33  ;;  %2279 = vmatmul.bf16.gmra.mxu1 %v5631_v10  ;;  %2368 = vmatmul.bf16.gmra.mxu2 %v7144_v61  ;;  %v5278_v61 = vld [vmem:[#allocation2 + $0x1b4] sm:$0xf0] }
 0x239   : > { %2457 = vmatmul.bf16.gmra.mxu3 %v7145_v45  ;;  %2530 = vmatpush.bf16.msrb.mxu0 %v4776_v59  ;;  %v4903_v45 = vld [vmem:[#allocation2 + $0x1a8] sm:$0xf] }
 0x23a   : > { %v4904_v18 = vor.u32 %v5278_v61, %v4903_v45 }
 0x23b   : > { %v2053_v11 = vpop.f32.mrf.mxu2 }
 0x23c   : > { %v2054_v60 = vadd.f32 %v2053_v11, %v1965_v26  ;;  %v2142_v62 = vpop.f32.mrf.mxu3  ;;  %v1877_v49 = vpop.f32.mrf.mxu0  ;;  %2619 = vmatpush.bf16.msrb.mxu1 %v4904_v18 }
 0x23d   : > { %v1878_v29 = vadd.f32 %v1877_v49, %v5901_v1  ;;  %v1966_v37 = vpop.f32.mrf.mxu1 }
 0x23e   : > { %v6019_v33 = vadd.f32 %v2142_v62, %v2054_v60  ;;  %v7150_v60 = vld [vmem:[#allocation18_spill] sm:$0xff]  ;;  %v7151_v62 = vld [vmem:[#allocation19_spill] sm:$0xff] }
 0x23f   : > { %v1967_v17 = vadd.f32 %v1966_v37, %v1878_v29 }
 0x240   : > { %7146 = vst [vmem:[#allocation59_spill] sm:$0xff] %v6019_v33 }
 0x243   : > { %v2055_v54 = vpop.f32.mrf.mxu2 }
 0x244   : > { %v2056_v10 = vadd.f32 %v2055_v54, %v1967_v17  ;;  %v2144_v8 = vpop.f32.mrf.mxu3  ;;  %v1880_v26 = vpop.f32.mrf.mxu0 }
 0x245   : > { %v1881_v11 = vadd.f32 %v1880_v26, %v5901_v1  ;;  %v1969_v9 = vpop.f32.mrf.mxu1 }
 0x246   : > { %v6022_v4 = vadd.f32 %v2144_v8, %v2056_v10 }
 0x247   : > { %v1970_v14 = vadd.f32 %v1969_v9, %v1881_v11  ;;  %2195 = vmatmul.bf16.gmra.mxu0 %v7148_v12 }
 0x248   : > { %7147 = vst [vmem:[#allocation60_spill] sm:$0xff] %v6022_v4  ;;  %2284 = vmatmul.bf16.gmra.mxu1 %v7149_v46  ;;  %2373 = vmatmul.bf16.gmra.mxu2 %v7150_v60  ;;  %v5274_v46 = vld [vmem:[#allocation2 + $0x194] sm:$0xf0] }
 0x249   : > { %2462 = vmatmul.bf16.gmra.mxu3 %v7151_v62  ;;  %v7154_v62 = vld [vmem:[#allocation20_spill] sm:$0xff] }
 0x24b   : > { %v2058_v49 = vpop.f32.mrf.mxu2 }
 0x24c   : > { %v2059_v61 = vadd.f32 %v2058_v49, %v1970_v14  ;;  %v2147_v17 = vpop.f32.mrf.mxu3  ;;  %v1882_v45 = vpop.f32.mrf.mxu0  ;;  %v7155_v14 = vld [vmem:[#allocation21_spill] sm:$0xff]  ;;  %v7156_v49 = vld [vmem:[#allocation22_spill] sm:$0xff] }
 0x24d   : > { %v1883_v59 = vadd.f32 %v1882_v45, %v5901_v1  ;;  %v1971_v19 = vpop.f32.mrf.mxu1  ;;  %v7157_v45 = vld [vmem:[#allocation23_spill] sm:$0xff] }
 0x24e   : > { %v6029_v29 = vadd.f32 %v2147_v17, %v2059_v61  ;;  %v5015_v61 = vld [vmem:[#allocation2 + $0x288] sm:$0xf]  ;;  %v5306_v17 = vld [vmem:[#allocation2 + $0x294] sm:$0xf0] }
 0x24f   : > { %v1972_v8 = vadd.f32 %v1971_v19, %v1883_v59  ;;  %v4759_v59 = vld [vmem:[#allocation2 + $0x88] sm:$0xf] }
 0x250   : > { %7152 = vst [vmem:[#allocation61_spill] sm:$0xff] %v6029_v29  ;;  %v5143_v29 = vld [vmem:[#allocation2 + $0x388] sm:$0xf] }
 0x253   : > { %v2060_v10 = vpop.f32.mrf.mxu2 }
 0x254   : > { %v2061_v37 = vadd.f32 %v2060_v10, %v1972_v8  ;;  %v2149_v54 = vpop.f32.mrf.mxu3  ;;  %v1885_v18 = vpop.f32.mrf.mxu0  ;;  %v5016_v8 = vor.u32 %v5306_v17, %v5015_v61  ;;  %v5242_v10 = vld [vmem:[#allocation2 + $0x94] sm:$0xf0] }
 0x255   : > { %v1886_v26 = vadd.f32 %v1885_v18, %v5901_v1  ;;  %v1974_v11 = vpop.f32.mrf.mxu1  ;;  %v5338_v18 = vld [vmem:[#allocation2 + $0x394] sm:$0xf0] }
 0x256   : > { %v6032_v9 = vadd.f32 %v2149_v54, %v2061_v37  ;;  %2709 = vmatpush.bf16.msrb.mxu2 %v5016_v8  ;;  %v7160_v8 = vld [vmem:[#allocation26_spill] sm:$0xff] }
 0x257   : > { %v1975_v4 = vadd.f32 %v1974_v11, %v1886_v26  ;;  %2200 = vmatmul.bf16.gmra.mxu0 %v7154_v62  ;;  %v4760_v26 = vor.u32 %v5242_v10, %v4759_v59  ;;  %v5144_v11 = vor.u32 %v5338_v18, %v5143_v29  ;;  %v4887_v62 = vld [vmem:[#allocation2 + $0x188] sm:$0xf] }
 0x258   : > { %7153 = vst [vmem:[#allocation62_spill] sm:$0xff] %v6032_v9  ;;  %2289 = vmatmul.bf16.gmra.mxu1 %v7155_v14  ;;  %2378 = vmatmul.bf16.gmra.mxu2 %v7156_v49  ;;  %v4888_v17 = vor.u32 %v5274_v46, %v4887_v62 }
 0x259   : > { %2467 = vmatmul.bf16.gmra.mxu3 %v7157_v45  ;;  %2531 = vmatpush.bf16.msrb.mxu0 %v4760_v26 }
 0x25a   : > { %2798 = vmatpush.bf16.msrb.mxu3 %v5144_v11  ;;  %2620 = vmatpush.bf16.msrb.mxu1 %v4888_v17 }
 0x25b   : > { %v2063_v19 = vpop.f32.mrf.mxu2 }
 0x25c   : > { %v2064_v60 = vadd.f32 %v2063_v19, %v1975_v4  ;;  %v2152_v37 = vpop.f32.mrf.mxu3  ;;  %v1887_v54 = vpop.f32.mrf.mxu0 }
 0x25d   : > { %v1888_v9 = vadd.f32 %v1887_v54, %v5901_v1  ;;  %v1976_v14 = vpop.f32.mrf.mxu1 }
 0x25e   : > { %v6039_v49 = vadd.f32 %v2152_v37, %v2064_v60  ;;  %v7159_v60 = vld [vmem:[#allocation25_spill] sm:$0xff] }
 0x25f   : > { %v1977_v45 = vadd.f32 %v1976_v14, %v1888_v9  ;;  %v7161_v9 = vld [vmem:[#allocation27_spill] sm:$0xff] }
 0x263   : > { %v2065_v61 = vpop.f32.mrf.mxu2 }
 0x264   : > { %v2066_v12 = vadd.f32 %v2065_v61, %v1977_v45  ;;  %v2154_v33 = vpop.f32.mrf.mxu3  ;;  %v1890_v4 = vpop.f32.mrf.mxu0 }
 0x265   : > { %v1891_v19 = vadd.f32 %v1890_v4, %v5901_v1  ;;  %v1979_v59 = vpop.f32.mrf.mxu1 }
 0x266   : > { %v6042_v29 = vadd.f32 %v2154_v33, %v2066_v12 }
 0x267   : > { %v1980_v10 = vadd.f32 %v1979_v59, %v1891_v19  ;;  %2205 = vmatmul.bf16.gmra.mxu0 %v5691_v15 }
 0x268   : > { %7158 = vst [vmem:[#allocation63_spill] sm:$0xff] %v6042_v29  ;;  %2294 = vmatmul.bf16.gmra.mxu1 %v7159_v60  ;;  %2383 = vmatmul.bf16.gmra.mxu2 %v7160_v8  ;;  %v7164_v29 = vld [vmem:[#allocation28_spill] sm:$0xff] }
 0x269   : > { %2472 = vmatmul.bf16.gmra.mxu3 %v7161_v9  ;;  %v5270_v8 = vld [vmem:[#allocation2 + $0x174] sm:$0xf0] }
 0x26b   : > { %v2068_v14 = vpop.f32.mrf.mxu2 }
 0x26c   : > { %v2069_v46 = vadd.f32 %v2068_v14, %v1980_v10  ;;  %v2157_v62 = vpop.f32.mrf.mxu3  ;;  %v1892_v45 = vpop.f32.mrf.mxu0  ;;  %v7165_v10 = vld [vmem:[#allocation29_spill] sm:$0xff]  ;;  %v7166_v14 = vld [vmem:[#allocation30_spill] sm:$0xff] }
 0x26d   : > { %v1893_v18 = vadd.f32 %v1892_v45, %v5901_v1  ;;  %v1981_v37 = vpop.f32.mrf.mxu1  ;;  %v7167_v45 = vld [vmem:[#allocation31_spill] sm:$0xff] }
 0x26e   : > { %v6049_v54 = vadd.f32 %v2157_v62, %v2069_v46  ;;  %v4999_v46 = vld [vmem:[#allocation2 + $0x268] sm:$0xf]  ;;  %v5302_v62 = vld [vmem:[#allocation2 + $0x274] sm:$0xf0] }
 0x26f   : > { %v1982_v33 = vadd.f32 %v1981_v37, %v1893_v18  ;;  %v4743_v18 = vld [vmem:[#allocation2 + $0x68] sm:$0xf] }
 0x270   : > { %7162 = vst [vmem:[#allocation64_spill] sm:$0xff] %v6049_v54  ;;  %v5127_v54 = vld [vmem:[#allocation2 + $0x368] sm:$0xf] }
 0x273   : > { %v2070_v12 = vpop.f32.mrf.mxu2 }
 0x274   : > { %v2071_v26 = vadd.f32 %v2070_v12, %v1982_v33  ;;  %v2159_v11 = vpop.f32.mrf.mxu3  ;;  %v1895_v61 = vpop.f32.mrf.mxu0  ;;  %v5000_v33 = vor.u32 %v5302_v62, %v4999_v46  ;;  %v5238_v12 = vld [vmem:[#allocation2 + $0x74] sm:$0xf0] }
 0x275   : > { %v1896_v17 = vadd.f32 %v1895_v61, %v5901_v1  ;;  %v1984_v4 = vpop.f32.mrf.mxu1  ;;  %v5334_v61 = vld [vmem:[#allocation2 + $0x374] sm:$0xf0] }
 0x276   : > { %v6052_v19 = vadd.f32 %v2159_v11, %v2071_v26  ;;  %2710 = vmatpush.bf16.msrb.mxu2 %v5000_v33 }
 0x277   : > { %v1985_v59 = vadd.f32 %v1984_v4, %v1896_v17  ;;  %2210 = vmatmul.bf16.gmra.mxu0 %v7164_v29  ;;  %v4744_v17 = vor.u32 %v5238_v12, %v4743_v18  ;;  %v5128_v4 = vor.u32 %v5334_v61, %v5127_v54  ;;  %v4871_v29 = vld [vmem:[#allocation2 + $0x168] sm:$0xf] }
 0x278   : > { %7163 = vst [vmem:[#allocation65_spill] sm:$0xff] %v6052_v19  ;;  %2299 = vmatmul.bf16.gmra.mxu1 %v7165_v10  ;;  %2388 = vmatmul.bf16.gmra.mxu2 %v7166_v14  ;;  %v4872_v62 = vor.u32 %v5270_v8, %v4871_v29 }
 0x279   : > { %2477 = vmatmul.bf16.gmra.mxu3 %v7167_v45  ;;  %2532 = vmatpush.bf16.msrb.mxu0 %v4744_v17  ;;  %v3368_v17 = vld [vmem:[%s6990_s5] sm:$0xf] }
 0x27a   : > { %2799 = vmatpush.bf16.msrb.mxu3 %v5128_v4  ;;  %2621 = vmatpush.bf16.msrb.mxu1 %v4872_v62 }
 0x27b   : > { %v2073_v37 = vpop.f32.mrf.mxu2 }
 0x27c   : > { %v2074_v9 = vadd.f32 %v2073_v37, %v1985_v59  ;;  %v2162_v26 = vpop.f32.mrf.mxu3  ;;  %v1897_v11 = vpop.f32.mrf.mxu0 }
 0x27d   : > { %v1898_v19 = vadd.f32 %v1897_v11, %v5901_v1  ;;  %v1986_v10 = vpop.f32.mrf.mxu1 }
 0x27e   : > { %v6059_v14 = vadd.f32 %v2162_v26, %v2074_v9  ;;  %v7169_v9 = vld [vmem:[#allocation34_spill] sm:$0xff] }
 0x27f   : > { %v1987_v45 = vadd.f32 %v1986_v10, %v1898_v19  ;;  %v7170_v19 = vld [vmem:[#allocation35_spill] sm:$0xff] }
 0x283   : > { %v2075_v46 = vpop.f32.mrf.mxu2 }
 0x284   : > { %v2076_v60 = vadd.f32 %v2075_v46, %v1987_v45  ;;  %v2164_v15 = vpop.f32.mrf.mxu3  ;;  %v1900_v59 = vpop.f32.mrf.mxu0 }
 0x285   : > { %v1901_v37 = vadd.f32 %v1900_v59, %v5901_v1  ;;  %v1989_v18 = vpop.f32.mrf.mxu1 }
 0x286   : > { %v6062_v54 = vadd.f32 %v2164_v15, %v2076_v60  ;;  %v7172_v60 = vld [vmem:[#allocation52_spill] sm:$0xff] }
 0x287   : > { %v1990_v12 = vadd.f32 %v1989_v18, %v1901_v37  ;;  %2215 = vmatmul.bf16.gmra.mxu0 %v5733_v5  ;;  %v6072_v11 = vperm.slane %v7172_v60, 1  ;;  %v6077_v37 = vunpack.c.l.bf16 %v3368_v17  ;;  %v4983_v60 = vld [vmem:[#allocation2 + $0x248] sm:$0xf]  ;;  %v5298_v17 = vld [vmem:[#allocation2 + $0x254] sm:$0xf0] }
 0x288   : > { %7168 = vst [vmem:[#allocation66_spill] sm:$0xff] %v6062_v54  ;;  %2304 = vmatmul.bf16.gmra.mxu1 %v5736_v7  ;;  %2393 = vmatmul.bf16.gmra.mxu2 %v7169_v9  ;;  %v4984_v54 = vor.u32 %v5298_v17, %v4983_v60 }
 0x289   : > { %2482 = vmatmul.bf16.gmra.mxu3 %v7170_v19  ;;  %7173 = vst [vmem:[#allocation52_spill] sm:$0xff] %v6077_v37 }
 0x28a   : > { %2711 = vmatpush.bf16.msrb.mxu2 %v4984_v54 }
 0x28b   : > { %v2078_v10 = vpop.f32.mrf.mxu2 }
 0x28c   : > { %v2079_v29 = vadd.f32 %v2078_v10, %v1990_v12  ;;  %v2167_v8 = vpop.f32.mrf.mxu3  ;;  %v1902_v45 = vpop.f32.mrf.mxu0 }
 0x28d   : > { %v1903_v33 = vadd.f32 %v1902_v45, %v5901_v1  ;;  %v1991_v61 = vpop.f32.mrf.mxu1  ;;  %v7177_v45 = vld [vmem:[#allocation38_spill] sm:$0xff] }
 0x28e   : > { %v6069_v26 = vadd.f32 %v2167_v8, %v2079_v29  ;;  %v7175_v29 = vld [vmem:[#allocation36_spill] sm:$0xff]  ;;  %v7176_v8 = vld [vmem:[#allocation37_spill] sm:$0xff] }
 0x28f   : > { %v1992_v15 = vadd.f32 %v1991_v61, %v1903_v33  ;;  %v3371_v33 = vperm.slane %v6077_v37, 0  ;;  %v7178_v61 = vld [vmem:[#allocation39_spill] sm:$0xff] }
 0x290   : > { %7171 = vst [vmem:[#allocation67_spill] sm:$0xff] %v6069_v26 }
 0x293   : > { %v2080_v4 = vpop.f32.mrf.mxu2 }
 0x294   : > { %v2081_v46 = vadd.f32 %v2080_v4, %v1992_v15  ;;  %v2169_v62 = vpop.f32.mrf.mxu3  ;;  %v2181_v59 = vpop.f32.mrf.mxu0  ;;  %v3372_v15 = vperm.slane %v6077_v37, 2  ;;  %v4727_v4 = vld [vmem:[#allocation2 + $0x48] sm:$0xf]  ;;  %v6090_v37 = vperm.slane %v3371_v33, 0 }
 0x295   : > { %v2182_v18 = vadd.f32 %v2181_v59, %v6072_v11  ;;  %v2270_v1 = vpop.f32.mrf.mxu1 }
 0x296   : > { %v6080_v12 = vadd.f32 %v2169_v62, %v2081_v46  ;;  %v5234_v46 = vld [vmem:[#allocation2 + $0x54] sm:$0xf0]  ;;  %v5111_v62 = vld [vmem:[#allocation2 + $0x348] sm:$0xf]  ;;  %v6092_v7 = vperm.slane %v3372_v15, 0 }
 0x297   : > { %v2271_v10 = vadd.f32 %v2270_v1, %v2182_v18  ;;  %2220 = vmatmul.bf16.gmra.mxu0 %v7175_v29  ;;  %v5330_v18 = vld [vmem:[#allocation2 + $0x354] sm:$0xf0] }
 0x298   : > { %7174 = vst [vmem:[#allocation68_spill] sm:$0xff] %v6080_v12  ;;  %2309 = vmatmul.bf16.gmra.mxu1 %v7176_v8  ;;  %2398 = vmatmul.bf16.gmra.mxu2 %v7177_v45  ;;  %v4728_v8 = vor.u32 %v5234_v46, %v4727_v4  ;;  %v5112_v26 = vor.u32 %v5330_v18, %v5111_v62  ;;  %v5266_v46 = vld [vmem:[#allocation2 + $0x154] sm:$0xf0] }
 0x299   : > { %2487 = vmatmul.bf16.gmra.mxu3 %v7178_v61  ;;  %v3240_v61 = vmax.f32 %v5919_v36, 0.0 }
 0x29a   : > { %2533 = vmatpush.bf16.msrb.mxu0 %v4728_v8  ;;  %2800 = vmatpush.bf16.msrb.mxu3 %v5112_v26 }
 0x29b   : > { %v2359_v59 = vpop.f32.mrf.mxu2 }
 0x29c   : > { %v2360_v1 = vadd.f32 %v2359_v59, %v2271_v10  ;;  %v2448_v12 = vpop.f32.mrf.mxu3  ;;  %v2183_v29 = vpop.f32.mrf.mxu0  ;;  %v3383_v10 = vmul.f32 %v6090_v37, %v3240_v61  ;;  %v4855_v59 = vld [vmem:[#allocation2 + $0x148] sm:$0xf] }
 0x29d   : > { %v2184_v45 = vadd.f32 %v2183_v29, %v6072_v11  ;;  %v2272_v19 = vpop.f32.mrf.mxu1  ;;  %v4856_v62 = vor.u32 %v5266_v46, %v4855_v59  ;;  %v3248_v46 = vmax.f32 %v5929_v20, 0.0 }
 0x29e   : > { %v2449_v9 = vadd.f32 %v2448_v12, %v2360_v1 }
 0x29f   : > { %v2273_v60 = vadd.f32 %v2272_v19, %v2184_v45  ;;  %2622 = vmatpush.bf16.msrb.mxu1 %v4856_v62  ;;  %v3244_v19 = vmax.f32 %v5922_v40, 0.0 }
 0x2a0   : > { %v3241_v17 = vmax.f32 %v2449_v9, 0.0 }
 0x2a1   : > { %v3387_v45 = vmul.f32 %v6090_v37, %v3244_v19 }
 0x2a2   : > { %v3384_v4 = vmul.f32 %v6092_v7, %v3241_v17 }
 0x2a3   : > { %v2361_v29 = vpop.f32.mrf.mxu2 }
 0x2a4   : > { %v2362_v54 = vadd.f32 %v2361_v29, %v2273_v60  ;;  %v2450_v18 = vpop.f32.mrf.mxu3  ;;  %v2186_v36 = vpop.f32.mrf.mxu0  ;;  %v6096_v33 = vadd.f32 %v3384_v4, %v3383_v10 }
 0x2a5   : > { %v2187_v12 = vadd.f32 %v2186_v36, %v6072_v11  ;;  %v2275_v15 = vpop.f32.mrf.mxu1 }
 0x2a6   : > { %v2451_v9 = vadd.f32 %v2450_v18, %v2362_v54  ;;  %v3391_v18 = vmul.f32 %v6090_v37, %v3248_v46 }
 0x2a7   : > { %v2276_v26 = vadd.f32 %v2275_v15, %v2187_v12  ;;  %2225 = vmatmul.bf16.gmra.mxu0 %v5773_v22 }
 0x2a8   : > { %v3245_v8 = vmax.f32 %v2451_v9, 0.0  ;;  %2314 = vmatmul.bf16.gmra.mxu1 %v5776_v35  ;;  %2403 = vmatmul.bf16.gmra.mxu2 %v5782_v6 }
 0x2a9   : > { %2492 = vmatmul.bf16.gmra.mxu3 %v5786_v2 }
 0x2aa   : > { %v3388_v61 = vmul.f32 %v6092_v7, %v3245_v8 }
 0x2ab   : > { %v2364_v1 = vpop.f32.mrf.mxu2 }
 0x2ac   : > { %v2365_v60 = vadd.f32 %v2364_v1, %v2276_v26  ;;  %v2453_v17 = vpop.f32.mrf.mxu3  ;;  %v2188_v10 = vpop.f32.mrf.mxu0  ;;  %v6106_v40 = vadd.f32 %v3388_v61, %v3387_v45  ;;  %v3252_v61 = vmax.f32 %v5932_v51, 0.0 }
 0x2ad   : > { %v2189_v4 = vadd.f32 %v2188_v10, %v6072_v11  ;;  %v2277_v59 = vpop.f32.mrf.mxu1  ;;  %v7181_v10 = vld [vmem:[#allocation41_spill] sm:$0xff] }
 0x2ae   : > { %v2454_v29 = vadd.f32 %v2453_v17, %v2365_v60  ;;  %v7180_v60 = vld [vmem:[#allocation40_spill] sm:$0xff]  ;;  %v3395_v46 = vmul.f32 %v6090_v37, %v3252_v61 }
 0x2af   : > { %v2278_v62 = vadd.f32 %v2277_v59, %v2189_v4  ;;  %v7182_v4 = vld [vmem:[#allocation42_spill] sm:$0xff]  ;;  %v7183_v59 = vld [vmem:[#allocation43_spill] sm:$0xff] }
 0x2b0   : > { %v3249_v54 = vmax.f32 %v2454_v29, 0.0 }
 0x2b2   : > { %v3392_v36 = vmul.f32 %v6092_v7, %v3249_v54  ;;  %v5294_v54 = vld [vmem:[#allocation2 + $0x234] sm:$0xf0] }
 0x2b3   : > { %v2366_v12 = vpop.f32.mrf.mxu2 }
 0x2b4   : > { %v2367_v15 = vadd.f32 %v2366_v12, %v2278_v62  ;;  %v2455_v19 = vpop.f32.mrf.mxu3  ;;  %v2191_v9 = vpop.f32.mrf.mxu0  ;;  %v6112_v26 = vadd.f32 %v3392_v36, %v3391_v18  ;;  %v4967_v62 = vld [vmem:[#allocation2 + $0x228] sm:$0xf]  ;;  %v5230_v12 = vld [vmem:[#allocation2 + $0x34] sm:$0xf0] }
 0x2b5   : > { %v2192_v8 = vadd.f32 %v2191_v9, %v6072_v11  ;;  %v2280_v45 = vpop.f32.mrf.mxu1  ;;  %v4711_v18 = vld [vmem:[#allocation2 + $0x28] sm:$0xf]  ;;  %v4968_v51 = vor.u32 %v5294_v54, %v4967_v62 }
 0x2b6   : > { %7179 = vst [vmem:[#allocation69_spill] sm:$0xff] %v6112_v26  ;;  %v2456_v1 = vadd.f32 %v2455_v19, %v2367_v15  ;;  %v5095_v15 = vld [vmem:[#allocation2 + $0x328] sm:$0xf]  ;;  %v5326_v19 = vld [vmem:[#allocation2 + $0x334] sm:$0xf0] }
 0x2b7   : > { %v2281_v20 = vadd.f32 %v2280_v45, %v2192_v8  ;;  %2230 = vmatmul.bf16.gmra.mxu0 %v7180_v60  ;;  %2712 = vmatpush.bf16.msrb.mxu2 %v4968_v51 }
 0x2b8   : > { %v3253_v17 = vmax.f32 %v2456_v1, 0.0  ;;  %2319 = vmatmul.bf16.gmra.mxu1 %v7181_v10  ;;  %2408 = vmatmul.bf16.gmra.mxu2 %v7182_v4  ;;  %v4712_v1 = vor.u32 %v5230_v12, %v4711_v18  ;;  %v5096_v10 = vor.u32 %v5326_v19, %v5095_v15  ;;  %v5262_v15 = vld [vmem:[#allocation2 + $0x134] sm:$0xf0] }
 0x2b9   : > { %2497 = vmatmul.bf16.gmra.mxu3 %v7183_v59 }
 0x2ba   : > { %v3396_v29 = vmul.f32 %v6092_v7, %v3253_v17  ;;  %v3256_v17 = vmax.f32 %v5939_v38, 0.0  ;;  %2534 = vmatpush.bf16.msrb.mxu0 %v4712_v1  ;;  %2801 = vmatpush.bf16.msrb.mxu3 %v5096_v10  ;;  %v3260_v10 = vmax.f32 %v5942_v55, 0.0 }
 0x2bb   : > { %v2369_v36 = vpop.f32.mrf.mxu2 }
 0x2bc   : > { %v2370_v9 = vadd.f32 %v2369_v36, %v2281_v20  ;;  %v2458_v8 = vpop.f32.mrf.mxu3  ;;  %v2193_v45 = vpop.f32.mrf.mxu0  ;;  %v6122_v4 = vadd.f32 %v3396_v29, %v3395_v46  ;;  %v3399_v26 = vmul.f32 %v6090_v37, %v3256_v17  ;;  %v4839_v29 = vld [vmem:[#allocation2 + $0x128] sm:$0xf] }
 0x2bd   : > { %v2194_v59 = vadd.f32 %v2193_v45, %v6072_v11  ;;  %v2282_v61 = vpop.f32.mrf.mxu1 }
 0x2be   : > { %v2459_v60 = vadd.f32 %v2458_v8, %v2370_v9  ;;  %v4840_v9 = vor.u32 %v5262_v15, %v4839_v29 }
 0x2bf   : > { %v2283_v62 = vadd.f32 %v2282_v61, %v2194_v59 }
 0x2c0   : > { %v3257_v54 = vmax.f32 %v2459_v60, 0.0  ;;  %2623 = vmatpush.bf16.msrb.mxu1 %v4840_v9 }
 0x2c2   : > { %v3400_v20 = vmul.f32 %v6092_v7, %v3257_v54 }
 0x2c3   : > { %v2371_v36 = vpop.f32.mrf.mxu2 }
 0x2c4   : > { %v2372_v18 = vadd.f32 %v2371_v36, %v2283_v62  ;;  %v2460_v12 = vpop.f32.mrf.mxu3  ;;  %v2196_v46 = vpop.f32.mrf.mxu0  ;;  %v6128_v19 = vadd.f32 %v3400_v20, %v3399_v26  ;;  %v3403_v26 = vmul.f32 %v6090_v37, %v3260_v10  ;;  %v3264_v36 = vmax.f32 %v5949_v24, 0.0 }
 0x2c5   : > { %v2197_v51 = vadd.f32 %v2196_v46, %v6072_v11  ;;  %v2285_v38 = vpop.f32.mrf.mxu1 }
 0x2c6   : > { %v2461_v59 = vadd.f32 %v2460_v12, %v2372_v18  ;;  %v3407_v29 = vmul.f32 %v6090_v37, %v3264_v36 }
 0x2c7   : > { %v2286_v60 = vadd.f32 %v2285_v38, %v2197_v51  ;;  %2235 = vmatmul.bf16.gmra.mxu0 %v5813_v44 }
 0x2c8   : > { %v3261_v8 = vmax.f32 %v2461_v59, 0.0  ;;  %2324 = vmatmul.bf16.gmra.mxu1 %v5816_v28  ;;  %2413 = vmatmul.bf16.gmra.mxu2 %v5822_v21 }
 0x2c9   : > { %2502 = vmatmul.bf16.gmra.mxu3 %v5826_v3 }
 0x2ca   : > { %v3404_v45 = vmul.f32 %v6092_v7, %v3261_v8 }
 0x2cb   : > { %v2374_v1 = vpop.f32.mrf.mxu2 }
 0x2cc   : > { %v2375_v61 = vadd.f32 %v2374_v1, %v2286_v60  ;;  %v2463_v17 = vpop.f32.mrf.mxu3  ;;  %v2198_v55 = vpop.f32.mrf.mxu0  ;;  %v6138_v62 = vadd.f32 %v3404_v45, %v3403_v26  ;;  %v3268_v26 = vmax.f32 %v5952_v31, 0.0  ;;  %v7184_v1 = vld [vmem:[#allocation44_spill] sm:$0xff] }
 0x2cd   : > { %v2199_v54 = vadd.f32 %v2198_v55, %v6072_v11  ;;  %v2287_v20 = vpop.f32.mrf.mxu1  ;;  %v7186_v55 = vld [vmem:[#allocation46_spill] sm:$0xff] }
 0x2ce   : > { %v2464_v18 = vadd.f32 %v2463_v17, %v2375_v61  ;;  %v7185_v17 = vld [vmem:[#allocation45_spill] sm:$0xff] }
 0x2cf   : > { %v2288_v12 = vadd.f32 %v2287_v20, %v2199_v54  ;;  %v7187_v54 = vld [vmem:[#allocation47_spill] sm:$0xff]  ;;  %v3411_v20 = vmul.f32 %v6090_v37, %v3268_v26 }
 0x2d0   : > { %v3265_v46 = vmax.f32 %v2464_v18, 0.0  ;;  %v4951_v18 = vld [vmem:[#allocation2 + $0x208] sm:$0xf] }
 0x2d2   : > { %v3408_v15 = vmul.f32 %v6092_v7, %v3265_v46  ;;  %v4695_v46 = vld [vmem:[#allocation2 + $0x8] sm:$0xf] }
 0x2d3   : > { %v2376_v51 = vpop.f32.mrf.mxu2 }
 0x2d4   : > { %v6144_v38 = vadd.f32 %v3408_v15, %v3407_v29  ;;  %v2377_v9 = vadd.f32 %v2376_v51, %v2288_v12  ;;  %v2465_v10 = vpop.f32.mrf.mxu3  ;;  %v2201_v59 = vpop.f32.mrf.mxu0  ;;  %v5290_v12 = vld [vmem:[#allocation2 + $0x214] sm:$0xf0]  ;;  %v5079_v51 = vld [vmem:[#allocation2 + $0x308] sm:$0xf] }
 0x2d5   : > { %v2202_v60 = vadd.f32 %v2201_v59, %v6072_v11  ;;  %v2290_v8 = vpop.f32.mrf.mxu1  ;;  %v4952_v31 = vor.u32 %v5290_v12, %v4951_v18  ;;  %v5226_v15 = vld [vmem:[#allocation2 + $0x14] sm:$0xf0] }
 0x2d6   : > { %v2466_v45 = vadd.f32 %v2465_v10, %v2377_v9  ;;  %v5322_v9 = vld [vmem:[#allocation2 + $0x314] sm:$0xf0] }
 0x2d7   : > { %v2291_v24 = vadd.f32 %v2290_v8, %v2202_v60  ;;  %2240 = vmatmul.bf16.gmra.mxu0 %v7184_v1  ;;  %v4696_v8 = vor.u32 %v5226_v15, %v4695_v46  ;;  %2713 = vmatpush.bf16.msrb.mxu2 %v4952_v31 }
 0x2d8   : > { %v3269_v61 = vmax.f32 %v2466_v45, 0.0  ;;  %2329 = vmatmul.bf16.gmra.mxu1 %v7185_v17  ;;  %2418 = vmatmul.bf16.gmra.mxu2 %v7186_v55  ;;  %v5080_v45 = vor.u32 %v5322_v9, %v5079_v51  ;;  %v4823_v51 = vld [vmem:[#allocation2 + $0x108] sm:$0xf]  ;;  %v5258_v9 = vld [vmem:[#allocation2 + $0x114] sm:$0xf0] }
 0x2d9   : > { %2507 = vmatmul.bf16.gmra.mxu3 %v7187_v54  ;;  %2535 = vmatpush.bf16.msrb.mxu0 %v4696_v8 }
 0x2da   : > { %v3412_v36 = vmul.f32 %v6092_v7, %v3269_v61  ;;  %v3272_v61 = vmax.f32 %v5959_v0, 0.0  ;;  %2802 = vmatpush.bf16.msrb.mxu3 %v5080_v45 }
 0x2db   : > { %v2379_v29 = vpop.f32.mrf.mxu2 }
 0x2dc   : > { %v2380_v10 = vadd.f32 %v2379_v29, %v2291_v24  ;;  %v2468_v59 = vpop.f32.mrf.mxu3  ;;  %v2203_v60 = vpop.f32.mrf.mxu0  ;;  %v6154_v55 = vadd.f32 %v3412_v36, %v3411_v20  ;;  %v3415_v1 = vmul.f32 %v6090_v37, %v3272_v61 }
 0x2dd   : > { %v2204_v54 = vadd.f32 %v2203_v60, %v6072_v11  ;;  %v2292_v26 = vpop.f32.mrf.mxu1 }
 0x2de   : > { %v2469_v17 = vadd.f32 %v2468_v59, %v2380_v10  ;;  %v4824_v10 = vor.u32 %v5258_v9, %v4823_v51  ;;  %v3276_v59 = vmax.f32 %v5962_v30, 0.0 }
 0x2df   : > { %v2293_v18 = vadd.f32 %v2292_v26, %v2204_v54 }
 0x2e0   : > { %v3273_v12 = vmax.f32 %v2469_v17, 0.0  ;;  %2624 = vmatpush.bf16.msrb.mxu1 %v4824_v10 }
 0x2e2   : > { %v3416_v24 = vmul.f32 %v6092_v7, %v3273_v12 }
 0x2e3   : > { %v2381_v29 = vpop.f32.mrf.mxu2 }
 0x2e4   : > { %v6160_v46 = vadd.f32 %v3416_v24, %v3415_v1  ;;  %v2382_v20 = vadd.f32 %v2381_v29, %v2293_v18  ;;  %v2470_v36 = vpop.f32.mrf.mxu3  ;;  %v2206_v15 = vpop.f32.mrf.mxu0  ;;  %v3419_v1 = vmul.f32 %v6090_v37, %v3276_v59  ;;  %v3280_v29 = vmax.f32 %v5969_v16, 0.0 }
 0x2e5   : > { %v2207_v31 = vadd.f32 %v2206_v15, %v6072_v11  ;;  %v2295_v0 = vpop.f32.mrf.mxu1 }
 0x2e6   : > { %v2471_v54 = vadd.f32 %v2470_v36, %v2382_v20  ;;  %v3423_v51 = vmul.f32 %v6090_v37, %v3280_v29 }
 0x2e7   : > { %v2296_v17 = vadd.f32 %v2295_v0, %v2207_v31  ;;  %2245 = vmatmul.bf16.gmra.mxu0 %v5853_v13 }
 0x2e8   : > { %v3277_v60 = vmax.f32 %v2471_v54, 0.0  ;;  %2334 = vmatmul.bf16.gmra.mxu1 %v5856_v47  ;;  %2423 = vmatmul.bf16.gmra.mxu2 %v5862_v41 }
 0x2e9   : > { %2512 = vmatmul.bf16.gmra.mxu3 %v5866_v56 }
 0x2ea   : > { %v3420_v8 = vmul.f32 %v6092_v7, %v3277_v60 }
 0x2eb   : > { %v2384_v45 = vpop.f32.mrf.mxu2 }
 0x2ec   : > { %v2385_v26 = vadd.f32 %v2384_v45, %v2296_v17  ;;  %v2473_v61 = vpop.f32.mrf.mxu3  ;;  %v2208_v30 = vpop.f32.mrf.mxu0  ;;  %v6170_v18 = vadd.f32 %v3420_v8, %v3419_v1  ;;  %v3284_v1 = vmax.f32 %v5972_v34, 0.0  ;;  %v7188_v45 = vld [vmem:[#allocation48_spill] sm:$0xff] }
 0x2ed   : > { %v2209_v12 = vadd.f32 %v2208_v30, %v6072_v11  ;;  %v2297_v24 = vpop.f32.mrf.mxu1  ;;  %v7190_v30 = vld [vmem:[#allocation50_spill] sm:$0xff] }
 0x2ee   : > { %v2474_v20 = vadd.f32 %v2473_v61, %v2385_v26  ;;  %v7189_v61 = vld [vmem:[#allocation49_spill] sm:$0xff] }
 0x2ef   : > { %v2298_v36 = vadd.f32 %v2297_v24, %v2209_v12  ;;  %v7191_v12 = vld [vmem:[#allocation51_spill] sm:$0xff]  ;;  %v3427_v24 = vmul.f32 %v6090_v37, %v3284_v1 }
 0x2f0   : > { %v3281_v15 = vmax.f32 %v2474_v20, 0.0  ;;  %v5316_v20 = vld [vmem:[#allocation2 + $0x2ec] sm:$0xf] }
 0x2f2   : > { %v3424_v9 = vmul.f32 %v6092_v7, %v3281_v15  ;;  %v5252_v15 = vld [vmem:[#allocation2 + $0xec] sm:$0xf] }
 0x2f3   : > { %v2386_v31 = vpop.f32.mrf.mxu2 }
 0x2f4   : > { %v6176_v0 = vadd.f32 %v3424_v9, %v3423_v51  ;;  %v2387_v10 = vadd.f32 %v2386_v31, %v2298_v36  ;;  %v2475_v59 = vpop.f32.mrf.mxu3  ;;  %v2211_v54 = vpop.f32.mrf.mxu0  ;;  %v5065_v36 = vld [vmem:[#allocation2 + $0x2f8] sm:$0xf0]  ;;  %v5348_v31 = vld [vmem:[#allocation2 + $0x3ec] sm:$0xf] }
 0x2f5   : > { %v2212_v17 = vadd.f32 %v2211_v54, %v6072_v11  ;;  %v2300_v60 = vpop.f32.mrf.mxu1  ;;  %v5068_v34 = vor.u32 %v5316_v20, %v5065_v36  ;;  %v4809_v9 = vld [vmem:[#allocation2 + $0xf8] sm:$0xf0] }
 0x2f6   : > { %v2476_v8 = vadd.f32 %v2475_v59, %v2387_v10  ;;  %v5193_v10 = vld [vmem:[#allocation2 + $0x3f8] sm:$0xf0] }
 0x2f7   : > { %v2301_v16 = vadd.f32 %v2300_v60, %v2212_v17  ;;  %2250 = vmatmul.bf16.gmra.mxu0 %v7188_v45  ;;  %v4812_v60 = vor.u32 %v5252_v15, %v4809_v9  ;;  %3062 = vmatpush.bf16.msra.mxu2 %v5068_v34 }
 0x2f8   : > { %v3285_v26 = vmax.f32 %v2476_v8, 0.0  ;;  %2339 = vmatmul.bf16.gmra.mxu1 %v7189_v61  ;;  %2428 = vmatmul.bf16.gmra.mxu2 %v7190_v30  ;;  %v5196_v8 = vor.u32 %v5348_v31, %v5193_v10  ;;  %v5284_v31 = vld [vmem:[#allocation2 + $0x1ec] sm:$0xf]  ;;  %v4937_v10 = vld [vmem:[#allocation2 + $0x1f8] sm:$0xf0] }
 0x2f9   : > { %2517 = vmatmul.bf16.gmra.mxu3 %v7191_v12  ;;  %2884 = vmatpush.bf16.msra.mxu0 %v4812_v60 }
 0x2fa   : > { %v3428_v29 = vmul.f32 %v6092_v7, %v3285_v26  ;;  %v3288_v26 = vmax.f32 %v5979_v63, 0.0  ;;  %3151 = vmatpush.bf16.msra.mxu3 %v5196_v8 }
 0x2fb   : > { %v2389_v51 = vpop.f32.mrf.mxu2 }
 0x2fc   : > { %v2390_v59 = vadd.f32 %v2389_v51, %v2301_v16  ;;  %v2478_v54 = vpop.f32.mrf.mxu3  ;;  %v2213_v17 = vpop.f32.mrf.mxu0  ;;  %v6186_v30 = vadd.f32 %v3428_v29, %v3427_v24  ;;  %v3431_v45 = vmul.f32 %v6090_v37, %v3288_v26 }
 0x2fd   : > { %v2214_v12 = vadd.f32 %v2213_v17, %v6072_v11  ;;  %v2302_v1 = vpop.f32.mrf.mxu1 }
 0x2fe   : > { %v2479_v61 = vadd.f32 %v2478_v54, %v2390_v59  ;;  %v4940_v59 = vor.u32 %v5284_v31, %v4937_v10  ;;  %v3292_v54 = vmax.f32 %v5982_v58, 0.0 }
 0x2ff   : > { %v2303_v20 = vadd.f32 %v2302_v1, %v2214_v12 }
 0x300   : > { %v3289_v36 = vmax.f32 %v2479_v61, 0.0  ;;  %2973 = vmatpush.bf16.msra.mxu1 %v4940_v59 }
 0x302   : > { %v3432_v16 = vmul.f32 %v6092_v7, %v3289_v36 }
 0x303   : > { %v2391_v51 = vpop.f32.mrf.mxu2 }
 0x304   : > { %v6192_v15 = vadd.f32 %v3432_v16, %v3431_v45  ;;  %v2392_v24 = vadd.f32 %v2391_v51, %v2303_v20  ;;  %v2480_v29 = vpop.f32.mrf.mxu3  ;;  %v2216_v9 = vpop.f32.mrf.mxu0  ;;  %v3435_v45 = vmul.f32 %v6090_v37, %v3292_v54  ;;  %v3296_v51 = vmax.f32 %v5989_v53, 0.0 }
 0x305   : > { %v2217_v34 = vadd.f32 %v2216_v9, %v6072_v11  ;;  %v2305_v63 = vpop.f32.mrf.mxu1 }
 0x306   : > { %v2481_v12 = vadd.f32 %v2480_v29, %v2392_v24  ;;  %v3439_v31 = vmul.f32 %v6090_v37, %v3296_v51 }
 0x307   : > { %v2306_v61 = vadd.f32 %v2305_v63, %v2217_v34  ;;  %2255 = vmatmul.bf16.gmra.mxu0 %v5898_v57 }
 0x308   : > { %v3293_v17 = vmax.f32 %v2481_v12, 0.0  ;;  %2344 = vmatmul.bf16.gmra.mxu1 %v5904_v32  ;;  %2433 = vmatmul.bf16.gmra.mxu2 %v5911_v23 }
 0x309   : > { %2522 = vmatmul.bf16.gmra.mxu3 %v5915_v50 }
 0x30a   : > { %v3436_v60 = vmul.f32 %v6092_v7, %v3293_v17 }
 0x30b   : > { %v2394_v8 = vpop.f32.mrf.mxu2 }
 0x30c   : > { %v2395_v1 = vadd.f32 %v2394_v8, %v2306_v61  ;;  %v2483_v26 = vpop.f32.mrf.mxu3  ;;  %v2218_v58 = vpop.f32.mrf.mxu0  ;;  %v6202_v20 = vadd.f32 %v3436_v60, %v3435_v45  ;;  %v3300_v45 = vmax.f32 %v5992_v48, 0.0  ;;  %v7192_v8 = vld [vmem:[#allocation5_spill] sm:$0xff] }
 0x30d   : > { %v2219_v36 = vadd.f32 %v2218_v58, %v6072_v11  ;;  %v2307_v16 = vpop.f32.mrf.mxu1  ;;  %v7194_v58 = vld [vmem:[#allocation7_spill] sm:$0xff] }
 0x30e   : > { %v2484_v24 = vadd.f32 %v2483_v26, %v2395_v1  ;;  %v7193_v26 = vld [vmem:[#allocation6_spill] sm:$0xff] }
 0x30f   : > { %v2308_v29 = vadd.f32 %v2307_v16, %v2219_v36  ;;  %v7195_v36 = vld [vmem:[#allocation8_spill] sm:$0xff]  ;;  %v3443_v16 = vmul.f32 %v6090_v37, %v3300_v45 }
 0x310   : > { %v3297_v9 = vmax.f32 %v2484_v24, 0.0  ;;  %v5312_v24 = vld [vmem:[#allocation2 + $0x2cc] sm:$0xf] }
 0x312   : > { %v3440_v10 = vmul.f32 %v6092_v7, %v3297_v9  ;;  %v5248_v9 = vld [vmem:[#allocation2 + $0xcc] sm:$0xf] }
 0x313   : > { %v2396_v34 = vpop.f32.mrf.mxu2 }
 0x314   : > { %v6208_v63 = vadd.f32 %v3440_v10, %v3439_v31  ;;  %v2397_v59 = vadd.f32 %v2396_v34, %v2308_v29  ;;  %v2485_v54 = vpop.f32.mrf.mxu3  ;;  %v2221_v12 = vpop.f32.mrf.mxu0  ;;  %v5049_v29 = vld [vmem:[#allocation2 + $0x2d8] sm:$0xf0]  ;;  %v5344_v34 = vld [vmem:[#allocation2 + $0x3cc] sm:$0xf] }
 0x315   : > { %v2222_v61 = vadd.f32 %v2221_v12, %v6072_v11  ;;  %v2310_v17 = vpop.f32.mrf.mxu1  ;;  %v5052_v48 = vor.u32 %v5312_v24, %v5049_v29  ;;  %v4793_v10 = vld [vmem:[#allocation2 + $0xd8] sm:$0xf0] }
 0x316   : > { %v2486_v60 = vadd.f32 %v2485_v54, %v2397_v59  ;;  %v5177_v59 = vld [vmem:[#allocation2 + $0x3d8] sm:$0xf0] }
 0x317   : > { %v2311_v53 = vadd.f32 %v2310_v17, %v2222_v61  ;;  %2536 = vmatmul.bf16.vlgmr.msrb.gmra.mxu0 %v7192_v8  ;;  %v4796_v17 = vor.u32 %v5248_v9, %v4793_v10  ;;  %3063 = vmatpush.bf16.msra.mxu2 %v5052_v48 }
 0x318   : > { %v3301_v1 = vmax.f32 %v2486_v60, 0.0  ;;  %2625 = vmatmul.bf16.vlgmr.msrb.gmra.mxu1 %v7193_v26  ;;  %2714 = vmatmul.bf16.vlgmr.msrb.gmra.mxu2 %v7194_v58  ;;  %v5180_v60 = vor.u32 %v5344_v34, %v5177_v59  ;;  %v5280_v34 = vld [vmem:[#allocation2 + $0x1cc] sm:$0xf]  ;;  %v4921_v59 = vld [vmem:[#allocation2 + $0x1d8] sm:$0xf0] }
 0x319   : > { %2803 = vmatmul.bf16.vlgmr.msrb.gmra.mxu3 %v7195_v36  ;;  %2885 = vmatpush.bf16.msra.mxu0 %v4796_v17 }
 0x31a   : > { %v3444_v51 = vmul.f32 %v6092_v7, %v3301_v1  ;;  %v3304_v1 = vmax.f32 %v5999_v39, 0.0  ;;  %3152 = vmatpush.bf16.msra.mxu3 %v5180_v60 }
 0x31b   : > { %v2399_v31 = vpop.f32.mrf.mxu2 }
 0x31c   : > { %v2400_v54 = vadd.f32 %v2399_v31, %v2311_v53  ;;  %v2488_v12 = vpop.f32.mrf.mxu3  ;;  %v2223_v61 = vpop.f32.mrf.mxu0  ;;  %v6218_v58 = vadd.f32 %v3444_v51, %v3443_v16  ;;  %v3447_v8 = vmul.f32 %v6090_v37, %v3304_v1  ;;  %v3312_v1 = vmax.f32 %v6009_v52, 0.0  ;;  %v7197_v52 = vld [vmem:[#allocation12_spill] sm:$0xff] }
 0x31d   : > { %v2224_v36 = vadd.f32 %v2223_v61, %v6072_v11  ;;  %v2312_v45 = vpop.f32.mrf.mxu1 }
 0x31e   : > { %v2489_v26 = vadd.f32 %v2488_v12, %v2400_v54  ;;  %v4924_v54 = vor.u32 %v5280_v34, %v4921_v59 }
 0x31f   : > { %v2313_v24 = vadd.f32 %v2312_v45, %v2224_v36 }
 0x320   : > { %v3305_v29 = vmax.f32 %v2489_v26, 0.0  ;;  %2974 = vmatpush.bf16.msra.mxu1 %v4924_v54 }
 0x322   : > { %v3448_v53 = vmul.f32 %v6092_v7, %v3305_v29 }
 0x323   : > { %v2401_v31 = vpop.f32.mrf.mxu2 }
 0x324   : > { %v6224_v9 = vadd.f32 %v3448_v53, %v3447_v8  ;;  %v2402_v16 = vadd.f32 %v2401_v31, %v2313_v24  ;;  %v2490_v51 = vpop.f32.mrf.mxu3  ;;  %v2226_v10 = vpop.f32.mrf.mxu0  ;;  %v3455_v31 = vmul.f32 %v6090_v37, %v3312_v1  ;;  %v5244_v1 = vld [vmem:[#allocation2 + $0xac] sm:$0xf] }
 0x325   : > { %v2227_v48 = vadd.f32 %v2226_v10, %v6072_v11  ;;  %v2315_v39 = vpop.f32.mrf.mxu1 }
 0x326   : > { %v2491_v12 = vadd.f32 %v2490_v51, %v2402_v16 }
 0x327   : > { %v2316_v61 = vadd.f32 %v2315_v39, %v2227_v48  ;;  %2541 = vmatmul.bf16.gmra.mxu0 %v5607_v25 }
 0x328   : > { %2630 = vmatmul.bf16.gmra.mxu1 %v5610_v27  ;;  %2719 = vmatmul.bf16.gmra.mxu2 %v5617_v42 }
 0x329   : > { %2808 = vmatmul.bf16.gmra.mxu3 %v5621_v43 }
 0x32b   : > { %v2404_v8 = vpop.f32.mrf.mxu2 }
 0x32c   : > { %v2405_v26 = vadd.f32 %v2404_v8, %v2316_v61  ;;  %v2493_v36 = vpop.f32.mrf.mxu3  ;;  %v2228_v17 = vpop.f32.mrf.mxu0 }
 0x32d   : > { %v2229_v60 = vadd.f32 %v2228_v17, %v6072_v11  ;;  %v2317_v45 = vpop.f32.mrf.mxu1  ;;  %v7200_v17 = vld [vmem:[#allocation15_spill] sm:$0xff] }
 0x32e   : > { %v2494_v24 = vadd.f32 %v2493_v36, %v2405_v26  ;;  %v7198_v26 = vld [vmem:[#allocation13_spill] sm:$0xff]  ;;  %v7199_v36 = vld [vmem:[#allocation14_spill] sm:$0xff] }
 0x32f   : > { %v2318_v29 = vadd.f32 %v2317_v45, %v2229_v60  ;;  %v5308_v60 = vld [vmem:[#allocation2 + $0x2ac] sm:$0xf]  ;;  %v5033_v45 = vld [vmem:[#allocation2 + $0x2b8] sm:$0xf0] }
 0x330   : > { %v3313_v53 = vmax.f32 %v2494_v24, 0.0 }
 0x332   : > { %v3456_v16 = vmul.f32 %v6092_v7, %v3313_v53  ;;  %v4777_v53 = vld [vmem:[#allocation2 + $0xb8] sm:$0xf0] }
 0x333   : > { %v2406_v51 = vpop.f32.mrf.mxu2 }
 0x334   : > { %v6235_v10 = vadd.f32 %v3456_v16, %v3455_v31  ;;  %v2407_v34 = vadd.f32 %v2406_v51, %v2318_v29  ;;  %v2495_v59 = vpop.f32.mrf.mxu3  ;;  %v2231_v48 = vpop.f32.mrf.mxu0  ;;  %v5036_v29 = vor.u32 %v5308_v60, %v5033_v45  ;;  %v5340_v31 = vld [vmem:[#allocation2 + $0x3ac] sm:$0xf]  ;;  %v5161_v16 = vld [vmem:[#allocation2 + $0x3b8] sm:$0xf0]  ;;  %v3309_v51 = vmax.f32 %v2491_v12, 0.0 }
 0x335   : > { %v2232_v39 = vadd.f32 %v2231_v48, %v6072_v11  ;;  %v2320_v54 = vpop.f32.mrf.mxu1 }
 0x336   : > { %7196 = vst [vmem:[#allocation70_spill] sm:$0xff] %v6235_v10  ;;  %v6238_v61 = vadd.f32 %v2495_v59, %v2407_v34  ;;  %3064 = vmatpush.bf16.msra.mxu2 %v5036_v29  ;;  %v3452_v45 = vmul.f32 %v6092_v7, %v3309_v51 }
 0x337   : > { %v2321_v8 = vadd.f32 %v2320_v54, %v2232_v39  ;;  %2546 = vmatmul.bf16.gmra.mxu0 %v7197_v52  ;;  %v4780_v39 = vor.u32 %v5244_v1, %v4777_v53  ;;  %v5164_v54 = vor.u32 %v5340_v31, %v5161_v16  ;;  %v7202_v52 = vld [vmem:[#allocation59_spill] sm:$0xff] }
 0x338   : > { %2635 = vmatmul.bf16.gmra.mxu1 %v7198_v26  ;;  %2724 = vmatmul.bf16.gmra.mxu2 %v7199_v36  ;;  %v7201_v36 = vld [vmem:[#allocation57_spill] sm:$0xff]  ;;  %v3320_v43 = vmax.f32 %v7202_v52, 0.0  ;;  %v5276_v52 = vld [vmem:[#allocation2 + $0x1ac] sm:$0xf] }
 0x339   : > { %2813 = vmatmul.bf16.gmra.mxu3 %v7200_v17  ;;  %v3308_v17 = vmax.f32 %v7201_v36, 0.0  ;;  %2886 = vmatpush.bf16.msra.mxu0 %v4780_v39  ;;  %v7207_v39 = vld [vmem:[#allocation18_spill] sm:$0xff] }
 0x33a   : > { %3153 = vmatpush.bf16.msra.mxu3 %v5164_v54  ;;  %v3463_v1 = vmul.f32 %v6090_v37, %v3320_v43  ;;  %v7205_v43 = vld [vmem:[#allocation16_spill] sm:$0xff]  ;;  %v7208_v54 = vld [vmem:[#allocation19_spill] sm:$0xff] }
 0x33b   : > { %v2409_v24 = vpop.f32.mrf.mxu2 }
 0x33c   : > { %v2410_v34 = vadd.f32 %v2409_v24, %v2321_v8  ;;  %v2498_v59 = vpop.f32.mrf.mxu3  ;;  %v2233_v48 = vpop.f32.mrf.mxu0  ;;  %v3451_v8 = vmul.f32 %v6090_v37, %v3308_v17 }
 0x33d   : > { %v2234_v10 = vadd.f32 %v2233_v48, %v6072_v11  ;;  %v2322_v26 = vpop.f32.mrf.mxu1  ;;  %v7206_v48 = vld [vmem:[#allocation17_spill] sm:$0xff] }
 0x33e   : > { %v2499_v42 = vadd.f32 %v2498_v59, %v2410_v34  ;;  %v4905_v34 = vld [vmem:[#allocation2 + $0x1b8] sm:$0xf0]  ;;  %v6253_v59 = vadd.f32 %v3452_v45, %v3451_v8 }
 0x33f   : > { %v2323_v60 = vadd.f32 %v2322_v26, %v2234_v10 }
 0x340   : > { %v3321_v12 = vmax.f32 %v2499_v42, 0.0  ;;  %7204 = vst [vmem:[#allocation59_spill] sm:$0xff] %v6253_v59  ;;  %v4908_v42 = vor.u32 %v5276_v52, %v4905_v34  ;;  %v4857_v59 = vld [vmem:[#allocation2 + $0x158] sm:$0xf0] }
 0x342   : > { %v3464_v24 = vmul.f32 %v6092_v7, %v3321_v12  ;;  %2975 = vmatpush.bf16.msra.mxu1 %v4908_v42 }
 0x343   : > { %v2411_v53 = vpop.f32.mrf.mxu2 }
 0x344   : > { %v6251_v31 = vadd.f32 %v3464_v24, %v3463_v1  ;;  %v2412_v29 = vadd.f32 %v2411_v53, %v2323_v60  ;;  %v2500_v36 = vpop.f32.mrf.mxu3  ;;  %v2236_v16 = vpop.f32.mrf.mxu0  ;;  %v7209_v53 = vld [vmem:[#allocation61_spill] sm:$0xff] }
 0x345   : > { %v2237_v10 = vadd.f32 %v2236_v16, %v6072_v11  ;;  %v2325_v26 = vpop.f32.mrf.mxu1 }
 0x346   : > { %7203 = vst [vmem:[#allocation57_spill] sm:$0xff] %v6251_v31  ;;  %v6256_v51 = vadd.f32 %v2500_v36, %v2412_v29  ;;  %v3328_v29 = vmax.f32 %v7209_v53, 0.0  ;;  %v7211_v53 = vld [vmem:[#allocation20_spill] sm:$0xff] }
 0x347   : > { %v2326_v17 = vadd.f32 %v2325_v26, %v2237_v10  ;;  %2551 = vmatmul.bf16.gmra.mxu0 %v7205_v43 }
 0x348   : > { %2640 = vmatmul.bf16.gmra.mxu1 %v7206_v48  ;;  %2729 = vmatmul.bf16.gmra.mxu2 %v7207_v39  ;;  %v3471_v34 = vmul.f32 %v6090_v37, %v3328_v29  ;;  %v5017_v29 = vld [vmem:[#allocation2 + $0x298] sm:$0xf0] }
 0x349   : > { %2818 = vmatmul.bf16.gmra.mxu3 %v7208_v54 }
 0x34b   : > { %v2414_v60 = vpop.f32.mrf.mxu2 }
 0x34c   : > { %v2415_v12 = vadd.f32 %v2414_v60, %v2326_v17  ;;  %v2503_v45 = vpop.f32.mrf.mxu3  ;;  %v2238_v8 = vpop.f32.mrf.mxu0 }
 0x34d   : > { %v2239_v1 = vadd.f32 %v2238_v8, %v6072_v11  ;;  %v2327_v24 = vpop.f32.mrf.mxu1 }
 0x34e   : > { %v2504_v36 = vadd.f32 %v2503_v45, %v2415_v12  ;;  %v7212_v12 = vld [vmem:[#allocation21_spill] sm:$0xff]  ;;  %v7213_v45 = vld [vmem:[#allocation22_spill] sm:$0xff] }
 0x34f   : > { %v2328_v16 = vadd.f32 %v2327_v24, %v2239_v1  ;;  %v7214_v1 = vld [vmem:[#allocation23_spill] sm:$0xff]  ;;  %v5304_v24 = vld [vmem:[#allocation2 + $0x28c] sm:$0xf] }
 0x350   : > { %v3329_v52 = vmax.f32 %v2504_v36, 0.0  ;;  %v5240_v36 = vld [vmem:[#allocation2 + $0x8c] sm:$0xf] }
 0x352   : > { %v3472_v10 = vmul.f32 %v6092_v7, %v3329_v52  ;;  %v5020_v52 = vor.u32 %v5304_v24, %v5017_v29  ;;  %v3317_v24 = vmax.f32 %v6238_v61, 0.0 }
 0x353   : > { %v2416_v26 = vpop.f32.mrf.mxu2 }
 0x354   : > { %v6266_v42 = vadd.f32 %v3472_v10, %v3471_v34  ;;  %v2417_v31 = vadd.f32 %v2416_v26, %v2328_v16  ;;  %v2505_v54 = vpop.f32.mrf.mxu3  ;;  %v2241_v17 = vpop.f32.mrf.mxu0  ;;  %v4761_v34 = vld [vmem:[#allocation2 + $0x98] sm:$0xf0]  ;;  %v5336_v10 = vld [vmem:[#allocation2 + $0x38c] sm:$0xf]  ;;  %3065 = vmatpush.bf16.msra.mxu2 %v5020_v52 }
 0x355   : > { %v2242_v60 = vadd.f32 %v2241_v17, %v6072_v11  ;;  %v2330_v39 = vpop.f32.mrf.mxu1  ;;  %v5145_v26 = vld [vmem:[#allocation2 + $0x398] sm:$0xf0] }
 0x356   : > { %7210 = vst [vmem:[#allocation61_spill] sm:$0xff] %v6266_v42  ;;  %v6269_v8 = vadd.f32 %v2505_v54, %v2417_v31 }
 0x357   : > { %v2331_v48 = vadd.f32 %v2330_v39, %v2242_v60  ;;  %2556 = vmatmul.bf16.gmra.mxu0 %v7211_v53  ;;  %v4764_v39 = vor.u32 %v5240_v36, %v4761_v34  ;;  %v5148_v60 = vor.u32 %v5336_v10, %v5145_v26 }
 0x358   : > { %2645 = vmatmul.bf16.gmra.mxu1 %v7212_v12  ;;  %2734 = vmatmul.bf16.gmra.mxu2 %v7213_v45  ;;  %v3336_v45 = vmax.f32 %v6039_v49, 0.0  ;;  %v5272_v49 = vld [vmem:[#allocation2 + $0x18c] sm:$0xf] }
 0x359   : > { %2823 = vmatmul.bf16.gmra.mxu3 %v7214_v1  ;;  %2887 = vmatpush.bf16.msra.mxu0 %v4764_v39  ;;  %v7217_v39 = vld [vmem:[#allocation24_spill] sm:$0xff] }
 0x35a   : > { %3154 = vmatpush.bf16.msra.mxu3 %v5148_v60  ;;  %v3479_v29 = vmul.f32 %v6090_v37, %v3336_v45  ;;  %v7218_v60 = vld [vmem:[#allocation25_spill] sm:$0xff] }
 0x35b   : > { %v2419_v16 = vpop.f32.mrf.mxu2 }
 0x35c   : > { %v2420_v17 = vadd.f32 %v2419_v16, %v2331_v48  ;;  %v2508_v31 = vpop.f32.mrf.mxu3  ;;  %v2243_v54 = vpop.f32.mrf.mxu0  ;;  %v7215_v16 = vld [vmem:[#allocation58_spill] sm:$0xff] }
 0x35d   : > { %v2244_v42 = vadd.f32 %v2243_v54, %v6072_v11  ;;  %v2332_v12 = vpop.f32.mrf.mxu1  ;;  %v3316_v36 = vmax.f32 %v7215_v16, 0.0 }
 0x35e   : > { %v2509_v1 = vadd.f32 %v2508_v31, %v2420_v17  ;;  %v4889_v17 = vld [vmem:[#allocation2 + $0x198] sm:$0xf0]  ;;  %v3460_v31 = vmul.f32 %v6092_v7, %v3317_v24  ;;  %v3325_v24 = vmax.f32 %v6256_v51, 0.0 }
 0x35f   : > { %v2333_v53 = vadd.f32 %v2332_v12, %v2244_v42  ;;  %v4892_v61 = vor.u32 %v5272_v49, %v4889_v17 }
 0x360   : > { %v3337_v43 = vmax.f32 %v2509_v1, 0.0 }
 0x361   : > { %2976 = vmatpush.bf16.msra.mxu1 %v4892_v61  ;;  %v3468_v61 = vmul.f32 %v6092_v7, %v3325_v24 }
 0x362   : > { %v3480_v48 = vmul.f32 %v6092_v7, %v3337_v43  ;;  %v3459_v43 = vmul.f32 %v6090_v37, %v3316_v36 }
 0x363   : > { %v2421_v34 = vpop.f32.mrf.mxu2 }
 0x364   : > { %v6281_v10 = vadd.f32 %v3480_v48, %v3479_v29  ;;  %v2422_v26 = vadd.f32 %v2421_v34, %v2333_v53  ;;  %v2510_v52 = vpop.f32.mrf.mxu3  ;;  %v2246_v54 = vpop.f32.mrf.mxu0  ;;  %v7219_v53 = vld [vmem:[#allocation26_spill] sm:$0xff]  ;;  %v7220_v29 = vld [vmem:[#allocation27_spill] sm:$0xff]  ;;  %v6292_v48 = vadd.f32 %v3460_v31, %v3459_v43  ;;  %v7222_v34 = vld [vmem:[#allocation60_spill] sm:$0xff] }
 0x365   : > { %v2247_v42 = vadd.f32 %v2246_v54, %v6072_v11  ;;  %v2335_v12 = vpop.f32.mrf.mxu1 }
 0x366   : > { %7216 = vst [vmem:[#allocation58_spill] sm:$0xff] %v6281_v10  ;;  %v6285_v1 = vadd.f32 %v2510_v52, %v2422_v26  ;;  %v3324_v26 = vmax.f32 %v7222_v34, 0.0 }
 0x367   : > { %v2336_v45 = vadd.f32 %v2335_v12, %v2247_v42  ;;  %2561 = vmatmul.bf16.gmra.mxu0 %v7217_v39  ;;  %7221 = vst [vmem:[#allocation71_spill] sm:$0xff] %v6292_v48  ;;  %v7223_v42 = vld [vmem:[#allocation64_spill] sm:$0xff] }
 0x368   : > { %2650 = vmatmul.bf16.gmra.mxu1 %v7218_v60  ;;  %2739 = vmatmul.bf16.gmra.mxu2 %v7219_v53  ;;  %v3344_v12 = vmax.f32 %v7223_v42, 0.0  ;;  %v3467_v31 = vmul.f32 %v6090_v37, %v3324_v26  ;;  %v7226_v26 = vld [vmem:[#allocation28_spill] sm:$0xff] }
 0x369   : > { %2828 = vmatmul.bf16.gmra.mxu3 %v7220_v29 }
 0x36a   : > { %v3487_v51 = vmul.f32 %v6090_v37, %v3344_v12  ;;  %v6302_v34 = vadd.f32 %v3468_v61, %v3467_v31  ;;  %v5300_v12 = vld [vmem:[#allocation2 + $0x26c] sm:$0xf] }
 0x36b   : > { %v2424_v16 = vpop.f32.mrf.mxu2  ;;  %v5236_v61 = vld [vmem:[#allocation2 + $0x6c] sm:$0xf] }
 0x36c   : > { %v2425_v52 = vadd.f32 %v2424_v16, %v2336_v45  ;;  %v2513_v54 = vpop.f32.mrf.mxu3  ;;  %v2248_v36 = vpop.f32.mrf.mxu0  ;;  %7224 = vst [vmem:[#allocation60_spill] sm:$0xff] %v6302_v34 }
 0x36d   : > { %v2249_v49 = vadd.f32 %v2248_v36, %v6072_v11  ;;  %v2337_v17 = vpop.f32.mrf.mxu1 }
 0x36e   : > { %v2514_v10 = vadd.f32 %v2513_v54, %v2425_v52 }
 0x36f   : > { %v2338_v53 = vadd.f32 %v2337_v17, %v2249_v49  ;;  %v7228_v49 = vld [vmem:[#allocation30_spill] sm:$0xff]  ;;  %v7229_v17 = vld [vmem:[#allocation31_spill] sm:$0xff] }
 0x370   : > { %v3345_v43 = vmax.f32 %v2514_v10, 0.0  ;;  %v7227_v10 = vld [vmem:[#allocation29_spill] sm:$0xff] }
 0x372   : > { %v3488_v48 = vmul.f32 %v6092_v7, %v3345_v43  ;;  %v4745_v43 = vld [vmem:[#allocation2 + $0x78] sm:$0xf0] }
 0x373   : > { %v2426_v45 = vpop.f32.mrf.mxu2 }
 0x374   : > { %v6304_v16 = vadd.f32 %v3488_v48, %v3487_v51  ;;  %v2427_v36 = vadd.f32 %v2426_v45, %v2338_v53  ;;  %v2515_v29 = vpop.f32.mrf.mxu3  ;;  %v2251_v60 = vpop.f32.mrf.mxu0  ;;  %v5001_v48 = vld [vmem:[#allocation2 + $0x278] sm:$0xf0]  ;;  %v5332_v51 = vld [vmem:[#allocation2 + $0x36c] sm:$0xf] }
 0x375   : > { %v2252_v42 = vadd.f32 %v2251_v60, %v6072_v11  ;;  %v2340_v24 = vpop.f32.mrf.mxu1  ;;  %v5004_v31 = vor.u32 %v5300_v12, %v5001_v48  ;;  %v5129_v60 = vld [vmem:[#allocation2 + $0x378] sm:$0xf0] }
 0x376   : > { %7225 = vst [vmem:[#allocation64_spill] sm:$0xff] %v6304_v16  ;;  %v6307_v52 = vadd.f32 %v2515_v29, %v2427_v36 }
 0x377   : > { %v2341_v54 = vadd.f32 %v2340_v24, %v2252_v42  ;;  %2566 = vmatmul.bf16.gmra.mxu0 %v7226_v26  ;;  %v4748_v42 = vor.u32 %v5236_v61, %v4745_v43  ;;  %v5132_v24 = vor.u32 %v5332_v51, %v5129_v60  ;;  %3066 = vmatpush.bf16.msra.mxu2 %v5004_v31 }
 0x378   : > { %2655 = vmatmul.bf16.gmra.mxu1 %v7227_v10  ;;  %2744 = vmatmul.bf16.gmra.mxu2 %v7228_v49  ;;  %v3352_v49 = vmax.f32 %v6059_v14, 0.0 }
 0x379   : > { %2833 = vmatmul.bf16.gmra.mxu3 %v7229_v17  ;;  %2888 = vmatpush.bf16.msra.mxu0 %v4748_v42 }
 0x37a   : > { %3155 = vmatpush.bf16.msra.mxu3 %v5132_v24  ;;  %v3495_v12 = vmul.f32 %v6090_v37, %v3352_v49  ;;  %v7233_v49 = vld [vmem:[#allocation35_spill] sm:$0xff] }
 0x37b   : > { %v2429_v53 = vpop.f32.mrf.mxu2 }
 0x37c   : > { %v2430_v45 = vadd.f32 %v2429_v53, %v2341_v54  ;;  %v2518_v29 = vpop.f32.mrf.mxu3  ;;  %v2253_v36 = vpop.f32.mrf.mxu0  ;;  %v5268_v54 = vld [vmem:[#allocation2 + $0x16c] sm:$0xf]  ;;  %v4873_v53 = vld [vmem:[#allocation2 + $0x178] sm:$0xf0] }
 0x37d   : > { %v2254_v16 = vadd.f32 %v2253_v36, %v6072_v11  ;;  %v2342_v10 = vpop.f32.mrf.mxu1  ;;  %v4876_v61 = vor.u32 %v5268_v54, %v4873_v53 }
 0x37e   : > { %v2519_v17 = vadd.f32 %v2518_v29, %v2430_v45 }
 0x37f   : > { %v2343_v26 = vadd.f32 %v2342_v10, %v2254_v16  ;;  %2977 = vmatpush.bf16.msra.mxu1 %v4876_v61  ;;  %v7231_v10 = vld [vmem:[#allocation33_spill] sm:$0xff] }
 0x380   : > { %v3353_v34 = vmax.f32 %v2519_v17, 0.0 }
 0x382   : > { %v3496_v48 = vmul.f32 %v6092_v7, %v3353_v34  ;;  %v7232_v34 = vld [vmem:[#allocation34_spill] sm:$0xff] }
 0x383   : > { %v2431_v39 = vpop.f32.mrf.mxu2 }
 0x384   : > { %v6317_v43 = vadd.f32 %v3496_v48, %v3495_v12  ;;  %v2432_v51 = vadd.f32 %v2431_v39, %v2343_v26  ;;  %v2520_v60 = vpop.f32.mrf.mxu3  ;;  %v2256_v31 = vpop.f32.mrf.mxu0  ;;  %v7234_v12 = vld [vmem:[#allocation67_spill] sm:$0xff] }
 0x385   : > { %v2257_v14 = vadd.f32 %v2256_v31, %v6072_v11  ;;  %v2345_v45 = vpop.f32.mrf.mxu1  ;;  %v3360_v48 = vmax.f32 %v7234_v12, 0.0  ;;  %v7237_v12 = vld [vmem:[#allocation36_spill] sm:$0xff] }
 0x386   : > { %7230 = vst [vmem:[#allocation72_spill] sm:$0xff] %v6317_v43  ;;  %v6320_v29 = vadd.f32 %v2520_v60, %v2432_v51  ;;  %v6331_v51 = vld [vmem:[%s6989_s4] sm:$0xf]  ;;  %v7239_v43 = vld [vmem:[#allocation38_spill] sm:$0xff] }
 0x387   : > { %v2346_v16 = vadd.f32 %v2345_v45, %v2257_v14  ;;  %2571 = vmatmul.bf16.gmra.mxu0 %v5733_v5  ;;  %7235 = vst [vmem:[#allocation67_spill] sm:$0xff] %v6331_v51  ;;  %v6334_v60 = vperm.slane %v6331_v51, 2  ;;  %v3503_v31 = vmul.f32 %v6090_v37, %v3360_v48  ;;  %v7240_v48 = vld [vmem:[#allocation39_spill] sm:$0xff] }
 0x388   : > { %2660 = vmatmul.bf16.gmra.mxu1 %v7231_v10  ;;  %2749 = vmatmul.bf16.gmra.mxu2 %v7232_v34 }
 0x389   : > { %2838 = vmatmul.bf16.gmra.mxu3 %v7233_v49  ;;  %v5328_v49 = vld [vmem:[#allocation2 + $0x34c] sm:$0xf] }
 0x38b   : > { %v2434_v17 = vpop.f32.mrf.mxu2 }
 0x38c   : > { %v2435_v36 = vadd.f32 %v2434_v17, %v2346_v16  ;;  %v2523_v39 = vpop.f32.mrf.mxu3  ;;  %v2258_v26 = vpop.f32.mrf.mxu0 }
 0x38d   : > { %v2259_v42 = vadd.f32 %v2258_v26, %v6072_v11  ;;  %v2347_v24 = vpop.f32.mrf.mxu1 }
 0x38e   : > { %v2524_v54 = vadd.f32 %v2523_v39, %v2435_v36 }
 0x38f   : > { %v2348_v53 = vadd.f32 %v2347_v24, %v2259_v42 }
 0x390   : > { %v3361_v61 = vmax.f32 %v2524_v54, 0.0  ;;  %v7238_v54 = vld [vmem:[#allocation37_spill] sm:$0xff] }
 0x392   : > { %v3504_v14 = vmul.f32 %v6092_v7, %v3361_v61  ;;  %v7241_v61 = vld [vmem:[#allocation52_spill] sm:$0xff] }
 0x393   : > { %v2436_v45 = vpop.f32.mrf.mxu2 }
 0x394   : > { %v6338_v11 = vadd.f32 %v3504_v14, %v3503_v31  ;;  %v2437_v16 = vadd.f32 %v2436_v45, %v2348_v53  ;;  %v2525_v17 = vpop.f32.mrf.mxu3  ;;  %v2537_v36 = vpop.f32.mrf.mxu0  ;;  %v3373_v31 = vperm.slane %v7241_v61, 4  ;;  %v5296_v14 = vld [vmem:[#allocation2 + $0x24c] sm:$0xf]  ;;  %v4985_v53 = vld [vmem:[#allocation2 + $0x258] sm:$0xf0] }
 0x395   : > { %v2538_v39 = vadd.f32 %v2537_v36, %v6334_v60  ;;  %v2626_v26 = vpop.f32.mrf.mxu1  ;;  %v5232_v45 = vld [vmem:[#allocation2 + $0x4c] sm:$0xf]  ;;  %v4988_v51 = vor.u32 %v5296_v14, %v4985_v53  ;;  %v4729_v36 = vld [vmem:[#allocation2 + $0x58] sm:$0xf0] }
 0x396   : > { %7236 = vst [vmem:[#allocation73_spill] sm:$0xff] %v6338_v11  ;;  %v6341_v42 = vadd.f32 %v2525_v17, %v2437_v16  ;;  %v5113_v16 = vld [vmem:[#allocation2 + $0x358] sm:$0xf0]  ;;  %v6349_v10 = vperm.slane %v3373_v31, 0  ;;  %v5264_v53 = vld [vmem:[#allocation2 + $0x14c] sm:$0xf] }
 0x397   : > { %v2627_v24 = vadd.f32 %v2626_v26, %v2538_v39  ;;  %2576 = vmatmul.bf16.gmra.mxu0 %v7237_v12  ;;  %v4732_v12 = vor.u32 %v5232_v45, %v4729_v36  ;;  %v5116_v34 = vor.u32 %v5328_v49, %v5113_v16  ;;  %3067 = vmatpush.bf16.msra.mxu2 %v4988_v51  ;;  %v7242_v16 = vld [vmem:[#allocation62_spill] sm:$0xff] }
 0x398   : > { %2665 = vmatmul.bf16.gmra.mxu1 %v7238_v54  ;;  %2754 = vmatmul.bf16.gmra.mxu2 %v7239_v43 }
 0x399   : > { %2843 = vmatmul.bf16.gmra.mxu3 %v7240_v48  ;;  %2889 = vmatpush.bf16.msra.mxu0 %v4732_v12 }
 0x39a   : > { %3156 = vmatpush.bf16.msra.mxu3 %v5116_v34 }
 0x39b   : > { %v2715_v11 = vpop.f32.mrf.mxu2 }
 0x39c   : > { %v2716_v17 = vadd.f32 %v2715_v11, %v2627_v24  ;;  %v2804_v39 = vpop.f32.mrf.mxu3  ;;  %v2539_v26 = vpop.f32.mrf.mxu0  ;;  %v4860_v24 = vor.u32 %v5264_v53, %v4857_v59 }
 0x39d   : > { %v2540_v54 = vadd.f32 %v2539_v26, %v6334_v60  ;;  %v2628_v43 = vpop.f32.mrf.mxu1 }
 0x39e   : > { %v2805_v48 = vadd.f32 %v2804_v39, %v2716_v17  ;;  %2978 = vmatpush.bf16.msra.mxu1 %v4860_v24  ;;  %v3332_v17 = vmax.f32 %v7242_v16, 0.0  ;;  %v7245_v16 = vld [vmem:[#allocation41_spill] sm:$0xff] }
 0x39f   : > { %v2629_v61 = vadd.f32 %v2628_v43, %v2540_v54 }
 0x3a0   : > { %v3242_v5 = vmax.f32 %v2805_v48, 0.0 }
 0x3a2   : > { %v3385_v14 = vmul.f32 %v6349_v10, %v3242_v5 }
 0x3a3   : > { %v2717_v11 = vpop.f32.mrf.mxu2 }
 0x3a4   : > { %v2718_v27 = vadd.f32 %v2717_v11, %v2629_v61  ;;  %v2806_v45 = vpop.f32.mrf.mxu3  ;;  %v2542_v49 = vpop.f32.mrf.mxu0  ;;  %v6353_v36 = vadd.f32 %v6096_v33, %v3385_v14  ;;  %v3333_v33 = vmax.f32 %v6269_v8, 0.0 }
 0x3a5   : > { %v2543_v51 = vadd.f32 %v2542_v49, %v6334_v60  ;;  %v2631_v31 = vpop.f32.mrf.mxu1 }
 0x3a6   : > { %v2807_v12 = vadd.f32 %v2806_v45, %v2718_v27  ;;  %v3476_v53 = vmul.f32 %v6092_v7, %v3333_v33  ;;  %v3475_v45 = vmul.f32 %v6090_v37, %v3332_v17  ;;  %v7246_v17 = vld [vmem:[#allocation42_spill] sm:$0xff] }
 0x3a7   : > { %v2632_v34 = vadd.f32 %v2631_v31, %v2543_v51  ;;  %2581 = vmatmul.bf16.gmra.mxu0 %v5773_v22 }
 0x3a8   : > { %v3246_v43 = vmax.f32 %v2807_v12, 0.0  ;;  %2670 = vmatmul.bf16.gmra.mxu1 %v5776_v35  ;;  %2759 = vmatmul.bf16.gmra.mxu2 %v5782_v6  ;;  %v6370_v51 = vadd.f32 %v3476_v53, %v3475_v45  ;;  %v5292_v53 = vld [vmem:[#allocation2 + $0x22c] sm:$0xf] }
 0x3a9   : > { %2848 = vmatmul.bf16.gmra.mxu3 %v5786_v2 }
 0x3aa   : > { %v3389_v5 = vmul.f32 %v6349_v10, %v3246_v43 }
 0x3ab   : > { %v2720_v59 = vpop.f32.mrf.mxu2 }
 0x3ac   : > { %v2721_v54 = vadd.f32 %v2720_v59, %v2632_v34  ;;  %v2809_v48 = vpop.f32.mrf.mxu3  ;;  %v2544_v61 = vpop.f32.mrf.mxu0  ;;  %v6363_v27 = vadd.f32 %v6106_v40, %v3389_v5  ;;  %v7243_v34 = vld [vmem:[#allocation69_spill] sm:$0xff] }
 0x3ad   : > { %v2545_v39 = vadd.f32 %v2544_v61, %v6334_v60  ;;  %v2633_v26 = vpop.f32.mrf.mxu1 }
 0x3ae   : > { %v2810_v14 = vadd.f32 %v2809_v48, %v2721_v54  ;;  %v7244_v48 = vld [vmem:[#allocation40_spill] sm:$0xff] }
 0x3af   : > { %v2634_v11 = vadd.f32 %v2633_v26, %v2545_v39  ;;  %v3341_v39 = vmax.f32 %v6285_v1, 0.0  ;;  %v7247_v26 = vld [vmem:[#allocation43_spill] sm:$0xff] }
 0x3b0   : > { %v3250_v24 = vmax.f32 %v2810_v14, 0.0  ;;  %v7248_v1 = vld [vmem:[#allocation63_spill] sm:$0xff] }
 0x3b2   : > { %v3393_v8 = vmul.f32 %v6349_v10, %v3250_v24  ;;  %v5228_v24 = vld [vmem:[#allocation2 + $0x2c] sm:$0xf] }
 0x3b3   : > { %v2722_v49 = vpop.f32.mrf.mxu2 }
 0x3b4   : > { %v2723_v31 = vadd.f32 %v2722_v49, %v2634_v11  ;;  %v2811_v40 = vpop.f32.mrf.mxu3  ;;  %v2547_v12 = vpop.f32.mrf.mxu0  ;;  %v6373_v43 = vadd.f32 %v7243_v34, %v3393_v8  ;;  %v4969_v11 = vld [vmem:[#allocation2 + $0x238] sm:$0xf0] }
 0x3b5   : > { %v2548_v5 = vadd.f32 %v2547_v12, %v6334_v60  ;;  %v2636_v59 = vpop.f32.mrf.mxu1  ;;  %v4972_v8 = vor.u32 %v5292_v53, %v4969_v11  ;;  %v4713_v49 = vld [vmem:[#allocation2 + $0x38] sm:$0xf0]  ;;  %v3484_v53 = vmul.f32 %v6092_v7, %v3341_v39 }
 0x3b6   : > { %v2812_v54 = vadd.f32 %v2811_v40, %v2723_v31  ;;  %v5324_v31 = vld [vmem:[#allocation2 + $0x32c] sm:$0xf]  ;;  %v5097_v40 = vld [vmem:[#allocation2 + $0x338] sm:$0xf0] }
 0x3b7   : > { %v2637_v33 = vadd.f32 %v2636_v59, %v2548_v5  ;;  %2586 = vmatmul.bf16.gmra.mxu0 %v7244_v48  ;;  %v4716_v59 = vor.u32 %v5228_v24, %v4713_v49  ;;  %3068 = vmatpush.bf16.msra.mxu2 %v4972_v8  ;;  %v5260_v49 = vld [vmem:[#allocation2 + $0x12c] sm:$0xf] }
 0x3b8   : > { %v3254_v61 = vmax.f32 %v2812_v54, 0.0  ;;  %2675 = vmatmul.bf16.gmra.mxu1 %v7245_v16  ;;  %2764 = vmatmul.bf16.gmra.mxu2 %v7246_v17  ;;  %v5100_v54 = vor.u32 %v5324_v31, %v5097_v40 }
 0x3b9   : > { %2853 = vmatmul.bf16.gmra.mxu3 %v7247_v26  ;;  %v3340_v26 = vmax.f32 %v7248_v1, 0.0  ;;  %2890 = vmatpush.bf16.msra.mxu0 %v4716_v59 }
 0x3ba   : > { %v3397_v14 = vmul.f32 %v6349_v10, %v3254_v61  ;;  %3157 = vmatpush.bf16.msra.mxu3 %v5100_v54 }
 0x3bb   : > { %v2725_v45 = vpop.f32.mrf.mxu2 }
 0x3bc   : > { %v2726_v12 = vadd.f32 %v2725_v45, %v2637_v33  ;;  %v2814_v34 = vpop.f32.mrf.mxu3  ;;  %v2549_v5 = vpop.f32.mrf.mxu0  ;;  %v6383_v17 = vadd.f32 %v6122_v4, %v3397_v14  ;;  %v3483_v45 = vmul.f32 %v6090_v37, %v3340_v26  ;;  %v4841_v4 = vld [vmem:[#allocation2 + $0x138] sm:$0xf0] }
 0x3bd   : > { %v2550_v61 = vadd.f32 %v2549_v5, %v6334_v60  ;;  %v2638_v16 = vpop.f32.mrf.mxu1  ;;  %v4844_v31 = vor.u32 %v5260_v49, %v4841_v4 }
 0x3be   : > { %v2815_v48 = vadd.f32 %v2814_v34, %v2726_v12  ;;  %v6390_v40 = vadd.f32 %v3484_v53, %v3483_v45  ;;  %v7249_v45 = vld [vmem:[#allocation65_spill] sm:$0xff] }
 0x3bf   : > { %v2639_v11 = vadd.f32 %v2638_v16, %v2550_v61  ;;  %2979 = vmatpush.bf16.msra.mxu1 %v4844_v31 }
 0x3c0   : > { %v3258_v33 = vmax.f32 %v2815_v48, 0.0 }
 0x3c2   : > { %v3401_v24 = vmul.f32 %v6349_v10, %v3258_v33 }
 0x3c3   : > { %v2727_v14 = vpop.f32.mrf.mxu2 }
 0x3c4   : > { %v2728_v5 = vadd.f32 %v2727_v14, %v2639_v11  ;;  %v2816_v1 = vpop.f32.mrf.mxu3  ;;  %v2552_v8 = vpop.f32.mrf.mxu0  ;;  %v6393_v12 = vadd.f32 %v6128_v19, %v3401_v24  ;;  %v3349_v19 = vmax.f32 %v6307_v52, 0.0  ;;  %v3348_v24 = vmax.f32 %v7249_v45, 0.0  ;;  %v7251_v45 = vld [vmem:[#allocation45_spill] sm:$0xff] }
 0x3c5   : > { %v2553_v39 = vadd.f32 %v2552_v8, %v6334_v60  ;;  %v2641_v16 = vpop.f32.mrf.mxu1 }
 0x3c6   : > { %v2817_v48 = vadd.f32 %v2816_v1, %v2728_v5  ;;  %v3492_v31 = vmul.f32 %v6092_v7, %v3349_v19  ;;  %v3491_v8 = vmul.f32 %v6090_v37, %v3348_v24  ;;  %v7252_v24 = vld [vmem:[#allocation46_spill] sm:$0xff] }
 0x3c7   : > { %v2642_v26 = vadd.f32 %v2641_v16, %v2553_v39  ;;  %2591 = vmatmul.bf16.gmra.mxu0 %v5813_v44 }
 0x3c8   : > { %v3262_v34 = vmax.f32 %v2817_v48, 0.0  ;;  %2680 = vmatmul.bf16.gmra.mxu1 %v5816_v28  ;;  %2769 = vmatmul.bf16.gmra.mxu2 %v5822_v21  ;;  %v6410_v16 = vadd.f32 %v3492_v31, %v3491_v8  ;;  %v4953_v31 = vld [vmem:[#allocation2 + $0x218] sm:$0xf0] }
 0x3c9   : > { %2858 = vmatmul.bf16.gmra.mxu3 %v5826_v3 }
 0x3ca   : > { %v3405_v59 = vmul.f32 %v6349_v10, %v3262_v34 }
 0x3cb   : > { %v2730_v54 = vpop.f32.mrf.mxu2 }
 0x3cc   : > { %v2731_v61 = vadd.f32 %v2730_v54, %v2642_v26  ;;  %v2819_v53 = vpop.f32.mrf.mxu3  ;;  %v2554_v11 = vpop.f32.mrf.mxu0  ;;  %v6403_v33 = vadd.f32 %v6138_v62, %v3405_v59 }
 0x3cd   : > { %v2555_v49 = vadd.f32 %v2554_v11, %v6334_v60  ;;  %v2643_v4 = vpop.f32.mrf.mxu1 }
 0x3ce   : > { %v2820_v14 = vadd.f32 %v2819_v53, %v2731_v61  ;;  %v7250_v53 = vld [vmem:[#allocation44_spill] sm:$0xff] }
 0x3cf   : > { %v2644_v5 = vadd.f32 %v2643_v4, %v2555_v49  ;;  %v3357_v49 = vmax.f32 %v6320_v29, 0.0  ;;  %v7253_v4 = vld [vmem:[#allocation47_spill] sm:$0xff]  ;;  %v7254_v29 = vld [vmem:[#allocation66_spill] sm:$0xff] }
 0x3d0   : > { %v3266_v1 = vmax.f32 %v2820_v14, 0.0 }
 0x3d2   : > { %v3409_v52 = vmul.f32 %v6349_v10, %v3266_v1 }
 0x3d3   : > { %v2732_v39 = vpop.f32.mrf.mxu2 }
 0x3d4   : > { %v2733_v48 = vadd.f32 %v2732_v39, %v2644_v5  ;;  %v2821_v62 = vpop.f32.mrf.mxu3  ;;  %v2557_v26 = vpop.f32.mrf.mxu0  ;;  %v6413_v34 = vadd.f32 %v6144_v38, %v3409_v52  ;;  %v5288_v38 = vld [vmem:[#allocation2 + $0x20c] sm:$0xf]  ;;  %v4697_v52 = vld [vmem:[#allocation2 + $0x18] sm:$0xf0] }
 0x3d5   : > { %v2558_v59 = vadd.f32 %v2557_v26, %v6334_v60  ;;  %v2646_v54 = vpop.f32.mrf.mxu1  ;;  %v5224_v5 = vld [vmem:[#allocation2 + $0xc] sm:$0xf]  ;;  %v4956_v8 = vor.u32 %v5288_v38, %v4953_v31  ;;  %v3500_v38 = vmul.f32 %v6092_v7, %v3357_v49 }
 0x3d6   : > { %v2822_v61 = vadd.f32 %v2821_v62, %v2733_v48  ;;  %v5320_v39 = vld [vmem:[#allocation2 + $0x30c] sm:$0xf]  ;;  %v5081_v48 = vld [vmem:[#allocation2 + $0x318] sm:$0xf0] }
 0x3d7   : > { %v2647_v19 = vadd.f32 %v2646_v54, %v2558_v59  ;;  %2596 = vmatmul.bf16.gmra.mxu0 %v7250_v53  ;;  %v4700_v54 = vor.u32 %v5224_v5, %v4697_v52  ;;  %3069 = vmatpush.bf16.msra.mxu2 %v4956_v8  ;;  %v5256_v52 = vld [vmem:[#allocation2 + $0x10c] sm:$0xf] }
 0x3d8   : > { %v3270_v11 = vmax.f32 %v2822_v61, 0.0  ;;  %2685 = vmatmul.bf16.gmra.mxu1 %v7251_v45  ;;  %2774 = vmatmul.bf16.gmra.mxu2 %v7252_v24  ;;  %v5084_v61 = vor.u32 %v5320_v39, %v5081_v48 }
 0x3d9   : > { %2863 = vmatmul.bf16.gmra.mxu3 %v7253_v4  ;;  %v3356_v4 = vmax.f32 %v7254_v29, 0.0  ;;  %2891 = vmatpush.bf16.msra.mxu0 %v4700_v54 }
 0x3da   : > { %v3413_v14 = vmul.f32 %v6349_v10, %v3270_v11  ;;  %3158 = vmatpush.bf16.msra.mxu3 %v5084_v61 }
 0x3db   : > { %v2735_v1 = vpop.f32.mrf.mxu2 }
 0x3dc   : > { %v2736_v62 = vadd.f32 %v2735_v1, %v2647_v19  ;;  %v2824_v26 = vpop.f32.mrf.mxu3  ;;  %v2559_v59 = vpop.f32.mrf.mxu0  ;;  %v6423_v24 = vadd.f32 %v6154_v55, %v3413_v14  ;;  %v3499_v1 = vmul.f32 %v6090_v37, %v3356_v4  ;;  %v4825_v55 = vld [vmem:[#allocation2 + $0x118] sm:$0xf0] }
 0x3dd   : > { %v2560_v11 = vadd.f32 %v2559_v59, %v6334_v60  ;;  %v2648_v45 = vpop.f32.mrf.mxu1  ;;  %v4828_v39 = vor.u32 %v5256_v52, %v4825_v55 }
 0x3de   : > { %v2825_v53 = vadd.f32 %v2824_v26, %v2736_v62  ;;  %v6430_v48 = vadd.f32 %v3500_v38, %v3499_v1  ;;  %v7255_v1 = vld [vmem:[#allocation68_spill] sm:$0xff] }
 0x3df   : > { %v2649_v31 = vadd.f32 %v2648_v45, %v2560_v11  ;;  %2980 = vmatpush.bf16.msra.mxu1 %v4828_v39 }
 0x3e0   : > { %v3274_v19 = vmax.f32 %v2825_v53, 0.0 }
 0x3e2   : > { %v3417_v5 = vmul.f32 %v6349_v10, %v3274_v19 }
 0x3e3   : > { %v2737_v14 = vpop.f32.mrf.mxu2 }
 0x3e4   : > { %v2738_v59 = vadd.f32 %v2737_v14, %v2649_v31  ;;  %v2826_v29 = vpop.f32.mrf.mxu3  ;;  %v2562_v8 = vpop.f32.mrf.mxu0  ;;  %v6433_v62 = vadd.f32 %v6160_v46, %v3417_v5  ;;  %v3365_v46 = vmax.f32 %v6341_v42, 0.0  ;;  %v3364_v5 = vmax.f32 %v7255_v1, 0.0  ;;  %v7259_v1 = vld [vmem:[#allocation51_spill] sm:$0xff] }
 0x3e5   : > { %v2563_v49 = vadd.f32 %v2562_v8, %v6334_v60  ;;  %v2651_v45 = vpop.f32.mrf.mxu1 }
 0x3e6   : > { %v2827_v53 = vadd.f32 %v2826_v29, %v2738_v59  ;;  %v3508_v39 = vmul.f32 %v6092_v7, %v3365_v46  ;;  %v3507_v8 = vmul.f32 %v6090_v37, %v3364_v5  ;;  %v7256_v46 = vld [vmem:[#allocation48_spill] sm:$0xff]  ;;  %v7257_v37 = vld [vmem:[#allocation49_spill] sm:$0xff] }
 0x3e7   : > { %v2652_v4 = vadd.f32 %v2651_v45, %v2563_v49  ;;  %2601 = vmatmul.bf16.gmra.mxu0 %v5853_v13 }
 0x3e8   : > { %v3278_v26 = vmax.f32 %v2827_v53, 0.0  ;;  %2690 = vmatmul.bf16.gmra.mxu1 %v5856_v47  ;;  %2779 = vmatmul.bf16.gmra.mxu2 %v5862_v41  ;;  %v6450_v45 = vadd.f32 %v3508_v39, %v3507_v8 }
 0x3e9   : > { %2868 = vmatmul.bf16.gmra.mxu3 %v5866_v56 }
 0x3ea   : > { %v3421_v54 = vmul.f32 %v6349_v10, %v3278_v26 }
 0x3eb   : > { %v2740_v61 = vpop.f32.mrf.mxu2 }
 0x3ec   : > { %v2741_v11 = vadd.f32 %v2740_v61, %v2652_v4  ;;  %v2829_v38 = vpop.f32.mrf.mxu3  ;;  %v2564_v31 = vpop.f32.mrf.mxu0  ;;  %v6443_v19 = vadd.f32 %v6170_v18, %v3421_v54 }
 0x3ed   : > { %v2565_v52 = vadd.f32 %v2564_v31, %v6334_v60  ;;  %v2653_v55 = vpop.f32.mrf.mxu1  ;;  %v7258_v31 = vld [vmem:[#allocation50_spill] sm:$0xff] }
 0x3ee   : > { %v2830_v14 = vadd.f32 %v2829_v38, %v2741_v11 }
 0x3ef   : > { %v2654_v59 = vadd.f32 %v2653_v55, %v2565_v52 }
 0x3f0   : > { %v3282_v29 = vmax.f32 %v2830_v14, 0.0 }
 0x3f2   : > { %v3425_v42 = vmul.f32 %v6349_v10, %v3282_v29 }
 0x3f3   : > { %v2742_v49 = vpop.f32.mrf.mxu2 }
 0x3f4   : > { %v2743_v53 = vadd.f32 %v2742_v49, %v2654_v59  ;;  %v2831_v18 = vpop.f32.mrf.mxu3  ;;  %v2567_v4 = vpop.f32.mrf.mxu0  ;;  %v6453_v26 = vadd.f32 %v6176_v0, %v3425_v42 }
 0x3f5   : > { %v2568_v54 = vadd.f32 %v2567_v4, %v6334_v60  ;;  %v2656_v61 = vpop.f32.mrf.mxu1 }
 0x3f6   : > { %v2832_v11 = vadd.f32 %v2831_v18, %v2743_v53 }
 0x3f7   : > { %v2657_v7 = vadd.f32 %v2656_v61, %v2568_v54  ;;  %2606 = vmatmul.bf16.gmra.mxu0 %v7256_v46 }
 0x3f8   : > { %v3286_v38 = vmax.f32 %v2832_v11, 0.0  ;;  %2695 = vmatmul.bf16.gmra.mxu1 %v7257_v37  ;;  %2784 = vmatmul.bf16.gmra.mxu2 %v7258_v31 }
 0x3f9   : > { %2873 = vmatmul.bf16.gmra.mxu3 %v7259_v1 }
 0x3fa   : > { %v3429_v5 = vmul.f32 %v6349_v10, %v3286_v38 }
 0x3fb   : > { %v2745_v52 = vpop.f32.mrf.mxu2 }
 0x3fc   : > { %v2746_v55 = vadd.f32 %v2745_v52, %v2657_v7  ;;  %v2834_v0 = vpop.f32.mrf.mxu3  ;;  %v2569_v14 = vpop.f32.mrf.mxu0  ;;  %v6462_v39 = vadd.f32 %v6186_v30, %v3429_v5 }
 0x3fd   : > { %v2570_v59 = vadd.f32 %v2569_v14, %v6334_v60  ;;  %v2658_v29 = vpop.f32.mrf.mxu1 }
 0x3fe   : > { %7260 = vst [vmem:[#allocation62_spill] sm:$0xff] %v6462_v39  ;;  %v2835_v8 = vadd.f32 %v2834_v0, %v2746_v55 }
 0x3ff   : > { %v2659_v42 = vadd.f32 %v2658_v29, %v2570_v59 }
 0x400   : > { %v3290_v49 = vmax.f32 %v2835_v8, 0.0 }
 0x402   : > { %v3433_v53 = vmul.f32 %v6349_v10, %v3290_v49 }
 0x403   : > { %v2747_v18 = vpop.f32.mrf.mxu2 }
 0x404   : > { %v2748_v4 = vadd.f32 %v2747_v18, %v2659_v42  ;;  %v2836_v54 = vpop.f32.mrf.mxu3  ;;  %v2572_v61 = vpop.f32.mrf.mxu0  ;;  %v6467_v11 = vadd.f32 %v6192_v15, %v3433_v53 }
 0x405   : > { %v2573_v7 = vadd.f32 %v2572_v61, %v6334_v60  ;;  %v2661_v38 = vpop.f32.mrf.mxu1 }
 0x406   : > { %7261 = vst [vmem:[#allocation69_spill] sm:$0xff] %v6467_v11  ;;  %v2837_v30 = vadd.f32 %v2836_v54, %v2748_v4 }
 0x407   : > { %v2662_v5 = vadd.f32 %v2661_v38, %v2573_v7  ;;  %2611 = vmatmul.bf16.gmra.mxu0 %v5898_v57 }
 0x408   : > { %v3294_v52 = vmax.f32 %v2837_v30, 0.0  ;;  %2700 = vmatmul.bf16.gmra.mxu1 %v5904_v32  ;;  %2789 = vmatmul.bf16.gmra.mxu2 %v5911_v23 }
 0x409   : > { %2878 = vmatmul.bf16.gmra.mxu3 %v5915_v50  ;;  %v7298_v50 = vld [vmem:[#allocation29_spill] sm:$0xff] }
 0x40a   : > { %v3437_v55 = vmul.f32 %v6349_v10, %v3294_v52 }
 0x40b   : > { %v2750_v0 = vpop.f32.mrf.mxu2 }
 0x40c   : > { %v2751_v14 = vadd.f32 %v2750_v0, %v2662_v5  ;;  %v2839_v15 = vpop.f32.mrf.mxu3  ;;  %v2574_v59 = vpop.f32.mrf.mxu0  ;;  %v6476_v29 = vadd.f32 %v6202_v20, %v3437_v55  ;;  %v7264_v0 = vld [vmem:[#allocation5_spill] sm:$0xff] }
 0x40d   : > { %v2575_v8 = vadd.f32 %v2574_v59, %v6334_v60  ;;  %v2663_v42 = vpop.f32.mrf.mxu1 }
 0x40e   : > { %7262 = vst [vmem:[#allocation63_spill] sm:$0xff] %v6476_v29  ;;  %v2840_v49 = vadd.f32 %v2839_v15, %v2751_v14  ;;  %v7265_v14 = vld [vmem:[#allocation6_spill] sm:$0xff]  ;;  %v7266_v15 = vld [vmem:[#allocation7_spill] sm:$0xff] }
 0x40f   : > { %v2664_v53 = vadd.f32 %v2663_v42, %v2575_v8  ;;  %v7267_v8 = vld [vmem:[#allocation8_spill] sm:$0xff] }
 0x410   : > { %v3298_v18 = vmax.f32 %v2840_v49, 0.0 }
 0x412   : > { %v3441_v4 = vmul.f32 %v6349_v10, %v3298_v18 }
 0x413   : > { %v2752_v54 = vpop.f32.mrf.mxu2 }
 0x414   : > { %v2753_v61 = vadd.f32 %v2752_v54, %v2664_v53  ;;  %v2841_v7 = vpop.f32.mrf.mxu3  ;;  %v2577_v38 = vpop.f32.mrf.mxu0  ;;  %v6481_v30 = vadd.f32 %v6208_v63, %v3441_v4 }
 0x415   : > { %v2578_v5 = vadd.f32 %v2577_v38, %v6334_v60  ;;  %v2666_v52 = vpop.f32.mrf.mxu1 }
 0x416   : > { %7263 = vst [vmem:[#allocation65_spill] sm:$0xff] %v6481_v30  ;;  %v2842_v20 = vadd.f32 %v2841_v7, %v2753_v61  ;;  %v7289_v30 = vld [vmem:[#allocation24_spill] sm:$0xff] }
 0x417   : > { %v2667_v55 = vadd.f32 %v2666_v52, %v2578_v5  ;;  %2892 = vmatmul.bf16.vlgmr.msra.gmra.mxu0 %v7264_v0 }
 0x418   : > { %v3302_v59 = vmax.f32 %v2842_v20, 0.0  ;;  %2981 = vmatmul.bf16.vlgmr.msra.gmra.mxu1 %v7265_v14  ;;  %3070 = vmatmul.bf16.vlgmr.msra.gmra.mxu2 %v7266_v15 }
 0x419   : > { %3159 = vmatmul.bf16.vlgmr.msra.gmra.mxu3 %v7267_v8 }
 0x41a   : > { %v3445_v42 = vmul.f32 %v6349_v10, %v3302_v59 }
 0x41b   : > { %v2755_v49 = vpop.f32.mrf.mxu2 }
 0x41c   : > { %v2756_v53 = vadd.f32 %v2755_v49, %v2667_v55  ;;  %v2844_v63 = vpop.f32.mrf.mxu3  ;;  %v2579_v18 = vpop.f32.mrf.mxu0  ;;  %v6490_v4 = vadd.f32 %v6218_v58, %v3445_v42  ;;  %v7270_v49 = vld [vmem:[#allocation9_spill] sm:$0xff] }
 0x41d   : > { %v2580_v54 = vadd.f32 %v2579_v18, %v6334_v60  ;;  %v2668_v61 = vpop.f32.mrf.mxu1 }
 0x41e   : > { %7268 = vst [vmem:[#allocation66_spill] sm:$0xff] %v6490_v4  ;;  %v2845_v7 = vadd.f32 %v2844_v63, %v2756_v53  ;;  %v7271_v53 = vld [vmem:[#allocation10_spill] sm:$0xff]  ;;  %v7272_v63 = vld [vmem:[#allocation11_spill] sm:$0xff]  ;;  %v7279_v4 = vld [vmem:[#allocation16_spill] sm:$0xff] }
 0x41f   : > { %v2669_v38 = vadd.f32 %v2668_v61, %v2580_v54 }
 0x420   : > { %v3306_v5 = vmax.f32 %v2845_v7, 0.0 }
 0x422   : > { %v3449_v52 = vmul.f32 %v6349_v10, %v3306_v5 }
 0x423   : > { %v2757_v20 = vpop.f32.mrf.mxu2 }
 0x424   : > { %v2758_v0 = vadd.f32 %v2757_v20, %v2669_v38  ;;  %v2846_v14 = vpop.f32.mrf.mxu3  ;;  %v2582_v15 = vpop.f32.mrf.mxu0  ;;  %v6495_v59 = vadd.f32 %v6224_v9, %v3449_v52 }
 0x425   : > { %v2583_v55 = vadd.f32 %v2582_v15, %v6334_v60  ;;  %v2671_v8 = vpop.f32.mrf.mxu1 }
 0x426   : > { %7269 = vst [vmem:[#allocation68_spill] sm:$0xff] %v6495_v59  ;;  %v2847_v58 = vadd.f32 %v2846_v14, %v2758_v0 }
 0x427   : > { %v2672_v42 = vadd.f32 %v2671_v8, %v2583_v55  ;;  %2897 = vmatmul.bf16.gmra.mxu0 %v5607_v25 }
 0x428   : > { %2986 = vmatmul.bf16.gmra.mxu1 %v7270_v49  ;;  %3075 = vmatmul.bf16.gmra.mxu2 %v7271_v53  ;;  %v7273_v53 = vld [vmem:[#allocation12_spill] sm:$0xff] }
 0x429   : > { %3164 = vmatmul.bf16.gmra.mxu3 %v7272_v63  ;;  %v7275_v63 = vld [vmem:[#allocation14_spill] sm:$0xff] }
 0x42b   : > { %v2760_v18 = vpop.f32.mrf.mxu2 }
 0x42c   : > { %v2761_v54 = vadd.f32 %v2760_v18, %v2672_v42  ;;  %v2849_v61 = vpop.f32.mrf.mxu3  ;;  %v2584_v7 = vpop.f32.mrf.mxu0  ;;  %v7274_v42 = vld [vmem:[#allocation13_spill] sm:$0xff]  ;;  %v7276_v18 = vld [vmem:[#allocation15_spill] sm:$0xff] }
 0x42d   : > { %v2585_v9 = vadd.f32 %v2584_v7, %v6334_v60  ;;  %v2673_v38 = vpop.f32.mrf.mxu1 }
 0x42e   : > { %v2850_v5 = vadd.f32 %v2849_v61, %v2761_v54  ;;  %v3310_v61 = vmax.f32 %v2847_v58, 0.0 }
 0x42f   : > { %v2674_v52 = vadd.f32 %v2673_v38, %v2585_v9 }
 0x433   : > { %v2762_v20 = vpop.f32.mrf.mxu2 }
 0x434   : > { %v2763_v0 = vadd.f32 %v2762_v20, %v2674_v52  ;;  %v2851_v14 = vpop.f32.mrf.mxu3  ;;  %v2587_v15 = vpop.f32.mrf.mxu0 }
 0x435   : > { %v2588_v25 = vadd.f32 %v2587_v15, %v6334_v60  ;;  %v2676_v55 = vpop.f32.mrf.mxu1 }
 0x436   : > { %v6504_v8 = vadd.f32 %v2851_v14, %v2763_v0  ;;  %v3453_v14 = vmul.f32 %v6349_v10, %v3310_v61  ;;  %v3314_v61 = vmax.f32 %v2850_v5, 0.0 }
 0x437   : > { %v2677_v49 = vadd.f32 %v2676_v55, %v2588_v25  ;;  %2902 = vmatmul.bf16.gmra.mxu0 %v7273_v53 }
 0x438   : > { %2991 = vmatmul.bf16.gmra.mxu1 %v7274_v42  ;;  %3080 = vmatmul.bf16.gmra.mxu2 %v7275_v63  ;;  %v7277_v63 = vld [vmem:[#allocation59_spill] sm:$0xff] }
 0x439   : > { %3169 = vmatmul.bf16.gmra.mxu3 %v7276_v18  ;;  %v6515_v59 = vadd.f32 %v7277_v63, %v3453_v14 }
 0x43b   : > { %v2765_v54 = vpop.f32.mrf.mxu2  ;;  %7278 = vst [vmem:[#allocation48_spill] sm:$0xff] %v6515_v59 }
 0x43c   : > { %v2766_v7 = vadd.f32 %v2765_v54, %v2677_v49  ;;  %v2854_v9 = vpop.f32.mrf.mxu3  ;;  %v2589_v38 = vpop.f32.mrf.mxu0 }
 0x43d   : > { %v2590_v52 = vadd.f32 %v2589_v38, %v6334_v60  ;;  %v2678_v20 = vpop.f32.mrf.mxu1  ;;  %v7280_v38 = vld [vmem:[#allocation17_spill] sm:$0xff] }
 0x43e   : > { %v6511_v15 = vadd.f32 %v2854_v9, %v2766_v7  ;;  %v7281_v7 = vld [vmem:[#allocation18_spill] sm:$0xff]  ;;  %v7282_v9 = vld [vmem:[#allocation19_spill] sm:$0xff] }
 0x43f   : > { %v2679_v0 = vadd.f32 %v2678_v20, %v2590_v52 }
 0x443   : > { %v2767_v25 = vpop.f32.mrf.mxu2 }
 0x444   : > { %v2768_v55 = vadd.f32 %v2767_v25, %v2679_v0  ;;  %v2856_v53 = vpop.f32.mrf.mxu3  ;;  %v2592_v42 = vpop.f32.mrf.mxu0 }
 0x445   : > { %v2593_v58 = vadd.f32 %v2592_v42, %v6334_v60  ;;  %v2681_v49 = vpop.f32.mrf.mxu1 }
 0x446   : > { %v2857_v18 = vadd.f32 %v2856_v53, %v2768_v55  ;;  %v3457_v55 = vmul.f32 %v6349_v10, %v3314_v61  ;;  %v7288_v61 = vld [vmem:[#allocation23_spill] sm:$0xff] }
 0x447   : > { %v2682_v54 = vadd.f32 %v2681_v49, %v2593_v58  ;;  %2907 = vmatmul.bf16.gmra.mxu0 %v7279_v4  ;;  %v7283_v58 = vld [vmem:[#allocation70_spill] sm:$0xff] }
 0x448   : > { %2996 = vmatmul.bf16.gmra.mxu1 %v7280_v38  ;;  %3085 = vmatmul.bf16.gmra.mxu2 %v7281_v7  ;;  %v6527_v49 = vadd.f32 %v7283_v58, %v3457_v55 }
 0x449   : > { %3174 = vmatmul.bf16.gmra.mxu3 %v7282_v9 }
 0x44a   : > { %7284 = vst [vmem:[#allocation49_spill] sm:$0xff] %v6527_v49 }
 0x44b   : > { %v2770_v52 = vpop.f32.mrf.mxu2 }
 0x44c   : > { %v2771_v20 = vadd.f32 %v2770_v52, %v2682_v54  ;;  %v2859_v0 = vpop.f32.mrf.mxu3  ;;  %v2594_v25 = vpop.f32.mrf.mxu0 }
 0x44d   : > { %v2595_v14 = vadd.f32 %v2594_v25, %v6334_v60  ;;  %v2683_v63 = vpop.f32.mrf.mxu1  ;;  %v7285_v25 = vld [vmem:[#allocation20_spill] sm:$0xff] }
 0x44e   : > { %v6523_v42 = vadd.f32 %v2859_v0, %v2771_v20  ;;  %v7286_v20 = vld [vmem:[#allocation21_spill] sm:$0xff]  ;;  %v7287_v0 = vld [vmem:[#allocation22_spill] sm:$0xff] }
 0x44f   : > { %v2684_v53 = vadd.f32 %v2683_v63, %v2595_v14 }
 0x453   : > { %v2772_v4 = vpop.f32.mrf.mxu2 }
 0x454   : > { %v2773_v38 = vadd.f32 %v2772_v4, %v2684_v53  ;;  %v2861_v7 = vpop.f32.mrf.mxu3  ;;  %v2597_v9 = vpop.f32.mrf.mxu0 }
 0x455   : > { %v2598_v5 = vadd.f32 %v2597_v9, %v6334_v60  ;;  %v2686_v54 = vpop.f32.mrf.mxu1 }
 0x456   : > { %v6530_v52 = vadd.f32 %v2861_v7, %v2773_v38  ;;  %v3318_v7 = vmax.f32 %v6504_v8, 0.0  ;;  %v7293_v8 = vld [vmem:[#allocation71_spill] sm:$0xff] }
 0x457   : > { %v2687_v59 = vadd.f32 %v2686_v54, %v2598_v5  ;;  %2912 = vmatmul.bf16.gmra.mxu0 %v7285_v25 }
 0x458   : > { %3001 = vmatmul.bf16.gmra.mxu1 %v7286_v20  ;;  %3090 = vmatmul.bf16.gmra.mxu2 %v7287_v0  ;;  %v3461_v0 = vmul.f32 %v6349_v10, %v3318_v7 }
 0x459   : > { %3179 = vmatmul.bf16.gmra.mxu3 %v7288_v61 }
 0x45b   : > { %v2775_v14 = vpop.f32.mrf.mxu2 }
 0x45c   : > { %v2776_v63 = vadd.f32 %v2775_v14, %v2687_v59  ;;  %v2864_v55 = vpop.f32.mrf.mxu3  ;;  %v2599_v53 = vpop.f32.mrf.mxu0 }
 0x45d   : > { %v2600_v4 = vadd.f32 %v2599_v53, %v6334_v60  ;;  %v2688_v58 = vpop.f32.mrf.mxu1  ;;  %v7290_v53 = vld [vmem:[#allocation25_spill] sm:$0xff] }
 0x45e   : > { %v6537_v9 = vadd.f32 %v2864_v55, %v2776_v63  ;;  %v7291_v63 = vld [vmem:[#allocation26_spill] sm:$0xff]  ;;  %v7292_v55 = vld [vmem:[#allocation27_spill] sm:$0xff] }
 0x45f   : > { %v2689_v38 = vadd.f32 %v2688_v58, %v2600_v4  ;;  %v6549_v4 = vadd.f32 %v7293_v8, %v3461_v0  ;;  %v3326_v58 = vmax.f32 %v2857_v18, 0.0 }
 0x461   : > { %7294 = vst [vmem:[#allocation50_spill] sm:$0xff] %v6549_v4 }
 0x463   : > { %v2777_v5 = vpop.f32.mrf.mxu2 }
 0x464   : > { %v2778_v54 = vadd.f32 %v2777_v5, %v2689_v38  ;;  %v2866_v25 = vpop.f32.mrf.mxu3  ;;  %v2602_v20 = vpop.f32.mrf.mxu0 }
 0x465   : > { %v2603_v61 = vadd.f32 %v2602_v20, %v6334_v60  ;;  %v2691_v49 = vpop.f32.mrf.mxu1 }
 0x466   : > { %v6542_v59 = vadd.f32 %v2866_v25, %v2778_v54 }
 0x467   : > { %v2692_v14 = vadd.f32 %v2691_v49, %v2603_v61  ;;  %2917 = vmatmul.bf16.gmra.mxu0 %v7289_v30  ;;  %v3469_v49 = vmul.f32 %v6349_v10, %v3326_v58  ;;  %v7299_v58 = vld [vmem:[#allocation30_spill] sm:$0xff] }
 0x468   : > { %3006 = vmatmul.bf16.gmra.mxu1 %v7290_v53  ;;  %3095 = vmatmul.bf16.gmra.mxu2 %v7291_v63  ;;  %v7295_v53 = vld [vmem:[#allocation60_spill] sm:$0xff] }
 0x469   : > { %3184 = vmatmul.bf16.gmra.mxu3 %v7292_v55  ;;  %v6556_v63 = vadd.f32 %v7295_v53, %v3469_v49 }
 0x46b   : > { %v2780_v38 = vpop.f32.mrf.mxu2  ;;  %7296 = vst [vmem:[#allocation51_spill] sm:$0xff] %v6556_v63  ;;  %v7301_v63 = vld [vmem:[#allocation32_spill] sm:$0xff] }
 0x46c   : > { %v2781_v7 = vadd.f32 %v2780_v38, %v2692_v14  ;;  %v2869_v5 = vpop.f32.mrf.mxu3  ;;  %v2604_v20 = vpop.f32.mrf.mxu0 }
 0x46d   : > { %v2605_v54 = vadd.f32 %v2604_v20, %v6334_v60  ;;  %v2693_v25 = vpop.f32.mrf.mxu1  ;;  %v7297_v20 = vld [vmem:[#allocation28_spill] sm:$0xff] }
 0x46e   : > { %v6553_v30 = vadd.f32 %v2869_v5, %v2781_v7  ;;  %v7300_v7 = vld [vmem:[#allocation31_spill] sm:$0xff] }
 0x46f   : > { %v2694_v61 = vadd.f32 %v2693_v25, %v2605_v54 }
 0x473   : > { %v2782_v55 = vpop.f32.mrf.mxu2 }
 0x474   : > { %v2783_v29 = vadd.f32 %v2782_v55, %v2694_v61  ;;  %v2871_v0 = vpop.f32.mrf.mxu3  ;;  %v2607_v8 = vpop.f32.mrf.mxu0 }
 0x475   : > { %v2608_v18 = vadd.f32 %v2607_v8, %v6334_v60  ;;  %v2696_v14 = vpop.f32.mrf.mxu1 }
 0x476   : > { %v6559_v38 = vadd.f32 %v2871_v0, %v2783_v29 }
 0x477   : > { %v2697_v4 = vadd.f32 %v2696_v14, %v2608_v18  ;;  %2922 = vmatmul.bf16.gmra.mxu0 %v7297_v20 }
 0x478   : > { %3011 = vmatmul.bf16.gmra.mxu1 %v7298_v50  ;;  %3100 = vmatmul.bf16.gmra.mxu2 %v7299_v58 }
 0x479   : > { %3189 = vmatmul.bf16.gmra.mxu3 %v7300_v7 }
 0x47b   : > { %v2785_v5 = vpop.f32.mrf.mxu2 }
 0x47c   : > { %v2786_v54 = vadd.f32 %v2785_v5, %v2697_v4  ;;  %v2874_v25 = vpop.f32.mrf.mxu3  ;;  %v2609_v49 = vpop.f32.mrf.mxu0  ;;  %v7302_v4 = vld [vmem:[#allocation33_spill] sm:$0xff]  ;;  %v7303_v5 = vld [vmem:[#allocation34_spill] sm:$0xff] }
 0x47d   : > { %v2610_v61 = vadd.f32 %v2609_v49, %v6334_v60  ;;  %v2698_v53 = vpop.f32.mrf.mxu1  ;;  %v7304_v49 = vld [vmem:[#allocation35_spill] sm:$0xff] }
 0x47e   : > { %v6566_v55 = vadd.f32 %v2874_v25, %v2786_v54 }
 0x47f   : > { %v2699_v29 = vadd.f32 %v2698_v53, %v2610_v61 }
 0x483   : > { %v2787_v0 = vpop.f32.mrf.mxu2 }
 0x484   : > { %v2788_v8 = vadd.f32 %v2787_v0, %v2699_v29  ;;  %v2876_v18 = vpop.f32.mrf.mxu3  ;;  %v2612_v14 = vpop.f32.mrf.mxu0 }
 0x485   : > { %v2613_v50 = vadd.f32 %v2612_v14, %v6334_v60  ;;  %v2701_v20 = vpop.f32.mrf.mxu1 }
 0x486   : > { %v6569_v58 = vadd.f32 %v2876_v18, %v2788_v8  ;;  %v7305_v18 = vld [vmem:[#allocation67_spill] sm:$0xff] }
 0x487   : > { %v2702_v7 = vadd.f32 %v2701_v20, %v2613_v50  ;;  %2927 = vmatmul.bf16.gmra.mxu0 %v7301_v63  ;;  %v6579_v50 = vperm.slane %v7305_v18, 3  ;;  %v3322_v63 = vmax.f32 %v6511_v15, 0.0  ;;  %v7311_v18 = vld [vmem:[#allocation57_spill] sm:$0xff] }
 0x488   : > { %3016 = vmatmul.bf16.gmra.mxu1 %v7302_v4  ;;  %3105 = vmatmul.bf16.gmra.mxu2 %v7303_v5 }
 0x489   : > { %3194 = vmatmul.bf16.gmra.mxu3 %v7304_v49 }
 0x48b   : > { %v2790_v54 = vpop.f32.mrf.mxu2 }
 0x48c   : > { %v2791_v25 = vadd.f32 %v2790_v54, %v2702_v7  ;;  %v2879_v61 = vpop.f32.mrf.mxu3  ;;  %v2614_v53 = vpop.f32.mrf.mxu0  ;;  %v7306_v54 = vld [vmem:[#allocation36_spill] sm:$0xff] }
 0x48d   : > { %v2615_v29 = vadd.f32 %v2614_v53, %v6334_v60  ;;  %v2703_v0 = vpop.f32.mrf.mxu1  ;;  %v3465_v60 = vmul.f32 %v6349_v10, %v3322_v63  ;;  %v7309_v53 = vld [vmem:[#allocation39_spill] sm:$0xff] }
 0x48e   : > { %v6576_v14 = vadd.f32 %v2879_v61, %v2791_v25  ;;  %v7307_v25 = vld [vmem:[#allocation37_spill] sm:$0xff]  ;;  %v7308_v61 = vld [vmem:[#allocation38_spill] sm:$0xff] }
 0x48f   : > { %v2704_v8 = vadd.f32 %v2703_v0, %v2615_v29  ;;  %v7310_v29 = vld [vmem:[#allocation52_spill] sm:$0xff] }
 0x490   : > { %v3374_v0 = vperm.slane %v7310_v29, 6 }
 0x492   : > { %v6595_v11 = vperm.slane %v3374_v0, 0 }
 0x493   : > { %v2792_v20 = vpop.f32.mrf.mxu2 }
 0x494   : > { %v2793_v4 = vadd.f32 %v2792_v20, %v2704_v8  ;;  %v2881_v5 = vpop.f32.mrf.mxu3  ;;  %v2893_v23 = vpop.f32.mrf.mxu0  ;;  %v6592_v20 = vadd.f32 %v7311_v18, %v3465_v60 }
 0x495   : > { %v2982_v49 = vpop.f32.mrf.mxu1  ;;  %v2894_v7 = vadd.f32 %v2893_v23, %v6579_v50 }
 0x496   : > { %v6582_v32 = vadd.f32 %v2881_v5, %v2793_v4 }
 0x497   : > { %2932 = vmatmul.bf16.gmra.mxu0 %v7306_v54  ;;  %v2983_v15 = vadd.f32 %v2982_v49, %v2894_v7  ;;  %v3330_v49 = vmax.f32 %v6523_v42, 0.0 }
 0x498   : > { %3021 = vmatmul.bf16.gmra.mxu1 %v7307_v25  ;;  %3110 = vmatmul.bf16.gmra.mxu2 %v7308_v61 }
 0x499   : > { %3199 = vmatmul.bf16.gmra.mxu3 %v7309_v53  ;;  %v3473_v0 = vmul.f32 %v6349_v10, %v3330_v49 }
 0x49b   : > { %v3071_v8 = vpop.f32.mrf.mxu2 }
 0x49c   : > { %v3072_v4 = vadd.f32 %v3071_v8, %v2983_v15  ;;  %v3160_v5 = vpop.f32.mrf.mxu3  ;;  %v2895_v23 = vpop.f32.mrf.mxu0 }
 0x49d   : > { %v2984_v57 = vpop.f32.mrf.mxu1  ;;  %v2896_v54 = vadd.f32 %v2895_v23, %v6579_v50  ;;  %v7312_v23 = vld [vmem:[#allocation61_spill] sm:$0xff] }
 0x49e   : > { %v3161_v63 = vadd.f32 %v3160_v5, %v3072_v4 }
 0x49f   : > { %v2985_v61 = vadd.f32 %v2984_v57, %v2896_v54 }
 0x4a0   : > { %v3243_v25 = vmax.f32 %v3161_v63, 0.0  ;;  %v6609_v63 = vadd.f32 %v7312_v23, %v3473_v0  ;;  %v7315_v23 = vld [vmem:[#allocation42_spill] sm:$0xff] }
 0x4a2   : > { %v3386_v53 = vmul.f32 %v6595_v11, %v3243_v25 }
 0x4a3   : > { %v3073_v7 = vpop.f32.mrf.mxu2 }
 0x4a4   : > { %v3074_v29 = vadd.f32 %v3073_v7, %v2985_v61  ;;  %v3162_v39 = vpop.f32.mrf.mxu3  ;;  %v2898_v60 = vpop.f32.mrf.mxu0  ;;  %v3513_v15 = vadd.f32 %v6353_v36, %v3386_v53  ;;  %v3334_v36 = vmax.f32 %v6530_v52, 0.0 }
 0x4a5   : > { %v2987_v8 = vpop.f32.mrf.mxu1  ;;  %v2899_v4 = vadd.f32 %v2898_v60, %v6579_v50 }
 0x4a6   : > { %v3163_v18 = vadd.f32 %v3162_v39, %v3074_v29  ;;  %3514 = vadd.xlane.f32.xlu0 %v3513_v15  ;;  %v3338_v29 = vmax.f32 %v6537_v9, 0.0  ;;  %v7314_v9 = vld [vmem:[#allocation41_spill] sm:$0xff] }
 0x4a7   : > { %2937 = vmatmul.bf16.gmra.mxu0 %v5773_v22  ;;  %v2988_v42 = vadd.f32 %v2987_v8, %v2899_v4 }
 0x4a8   : > { %v3247_v57 = vmax.f32 %v3163_v18, 0.0  ;;  %3026 = vmatmul.bf16.gmra.mxu1 %v5776_v35  ;;  %3115 = vmatmul.bf16.gmra.mxu2 %v5782_v6 }
 0x4a9   : > { %3204 = vmatmul.bf16.gmra.mxu3 %v5786_v2  ;;  %v3477_v2 = vmul.f32 %v6349_v10, %v3334_v36  ;;  %v7313_v36 = vld [vmem:[#allocation40_spill] sm:$0xff] }
 0x4aa   : > { %v3390_v5 = vmul.f32 %v6595_v11, %v3247_v57 }
 0x4ab   : > { %v3076_v39 = vpop.f32.mrf.mxu2  ;;  %v6617_v15 = vadd.f32 %v6370_v51, %v3477_v2  ;;  %v7316_v51 = vld [vmem:[#allocation43_spill] sm:$0xff] }
 0x4ac   : > { %v3077_v54 = vadd.f32 %v3076_v39, %v2988_v42  ;;  %v3165_v25 = vpop.f32.mrf.mxu3  ;;  %v2900_v61 = vpop.f32.mrf.mxu0  ;;  %v3518_v22 = vadd.f32 %v6363_v27, %v3390_v5  ;;  %v3481_v5 = vmul.f32 %v6349_v10, %v3338_v29 }
 0x4ad   : > { %v2989_v53 = vpop.f32.mrf.mxu1  ;;  %v2901_v6 = vadd.f32 %v2900_v61, %v6579_v50 }
 0x4ae   : > { %v3166_v35 = vadd.f32 %v3165_v25, %v3077_v54  ;;  %3519 = vadd.xlane.f32.xlu0 %v3518_v22  ;;  %v7317_v22 = vld [vmem:[#allocation58_spill] sm:$0xff] }
 0x4af   : > { %v2990_v7 = vadd.f32 %v2989_v53, %v2901_v6  ;;  %v6629_v53 = vadd.f32 %v7317_v22, %v3481_v5 }
 0x4b0   : > { %v3251_v49 = vmax.f32 %v3166_v35, 0.0 }
 0x4b2   : > { %v3394_v52 = vmul.f32 %v6595_v11, %v3251_v49 }
 0x4b3   : > { %v3078_v60 = vpop.f32.mrf.mxu2 }
 0x4b4   : > { %v3079_v8 = vadd.f32 %v3078_v60, %v2990_v7  ;;  %v3167_v18 = vpop.f32.mrf.mxu3  ;;  %v2903_v27 = vpop.f32.mrf.mxu0  ;;  %v3523_v4 = vadd.f32 %v6373_v43, %v3394_v52  ;;  %v3342_v43 = vmax.f32 %v6542_v59, 0.0 }
 0x4b5   : > { %v2992_v0 = vpop.f32.mrf.mxu1  ;;  %v2904_v42 = vadd.f32 %v2903_v27, %v6579_v50  ;;  %v3346_v27 = vmax.f32 %v6553_v30, 0.0 }
 0x4b6   : > { %v3168_v57 = vadd.f32 %v3167_v18, %v3079_v8  ;;  %3524 = vadd.xlane.f32.xlu1 %v3523_v4  ;;  %v3485_v60 = vmul.f32 %v6349_v10, %v3342_v43 }
 0x4b7   : > { %2942 = vmatmul.bf16.gmra.mxu0 %v7313_v36  ;;  %v2993_v54 = vadd.f32 %v2992_v0, %v2904_v42 }
 0x4b8   : > { %v3255_v39 = vmax.f32 %v3168_v57, 0.0  ;;  %3031 = vmatmul.bf16.gmra.mxu1 %v7314_v9  ;;  %3120 = vmatmul.bf16.gmra.mxu2 %v7315_v23  ;;  %v6637_v0 = vadd.f32 %v6390_v40, %v3485_v60  ;;  %v3489_v23 = vmul.f32 %v6349_v10, %v3346_v27 }
 0x4b9   : > { %3209 = vmatmul.bf16.gmra.mxu3 %v7316_v51 }
 0x4ba   : > { %v3398_v25 = vmul.f32 %v6595_v11, %v3255_v39 }
 0x4bb   : > { %v3081_v61 = vpop.f32.mrf.mxu2 }
 0x4bc   : > { %v3082_v35 = vadd.f32 %v3081_v61, %v2993_v54  ;;  %v3170_v6 = vpop.f32.mrf.mxu3  ;;  %v2905_v2 = vpop.f32.mrf.mxu0  ;;  %v3528_v49 = vadd.f32 %v6383_v17, %v3398_v25  ;;  %v7318_v25 = vld [vmem:[#allocation64_spill] sm:$0xff] }
 0x4bd   : > { %v2994_v7 = vpop.f32.mrf.mxu1  ;;  %v2906_v29 = vadd.f32 %v2905_v2, %v6579_v50  ;;  %v6649_v43 = vadd.f32 %v7318_v25, %v3489_v23  ;;  %v7323_v23 = vld [vmem:[#allocation72_spill] sm:$0xff] }
 0x4be   : > { %v3171_v52 = vadd.f32 %v3170_v6, %v3082_v35  ;;  %3529 = vadd.xlane.f32.xlu1 %v3528_v49 }
 0x4bf   : > { %v2995_v18 = vadd.f32 %v2994_v7, %v2906_v29  ;;  %v3354_v7 = vmax.f32 %v6566_v55, 0.0  ;;  %v7320_v55 = vld [vmem:[#allocation45_spill] sm:$0xff] }
 0x4c0   : > { %v3259_v8 = vmax.f32 %v3171_v52, 0.0 }
 0x4c2   : > { %v3402_v59 = vmul.f32 %v6595_v11, %v3259_v8 }
 0x4c3   : > { %v3083_v4 = vpop.f32.mrf.mxu2 }
 0x4c4   : > { %v3084_v57 = vadd.f32 %v3083_v4, %v2995_v18  ;;  %v3172_v42 = vpop.f32.mrf.mxu3  ;;  %v2908_v17 = vpop.f32.mrf.mxu0  ;;  %v3533_v5 = vadd.f32 %v6393_v12, %v3402_v59  ;;  %v3350_v12 = vmax.f32 %v6559_v38, 0.0 }
 0x4c5   : > { %v2997_v36 = vpop.f32.mrf.mxu1  ;;  %v2909_v9 = vadd.f32 %v2908_v17, %v6579_v50 }
 0x4c6   : > { %v3173_v39 = vadd.f32 %v3172_v42, %v3084_v57  ;;  %3534 = vadd.xlane.f32.xlu2 %v3533_v5  ;;  %v3497_v57 = vmul.f32 %v6349_v10, %v3354_v7  ;;  %v7319_v42 = vld [vmem:[#allocation44_spill] sm:$0xff]  ;;  %v7321_v5 = vld [vmem:[#allocation46_spill] sm:$0xff] }
 0x4c7   : > { %2947 = vmatmul.bf16.gmra.mxu0 %v5813_v44  ;;  %v2998_v40 = vadd.f32 %v2997_v36, %v2909_v9 }
 0x4c8   : > { %v3263_v51 = vmax.f32 %v3173_v39, 0.0  ;;  %3036 = vmatmul.bf16.gmra.mxu1 %v5816_v28  ;;  %3125 = vmatmul.bf16.gmra.mxu2 %v5822_v21 }
 0x4c9   : > { %3214 = vmatmul.bf16.gmra.mxu3 %v5826_v3  ;;  %v3493_v3 = vmul.f32 %v6349_v10, %v3350_v12 }
 0x4ca   : > { %v3406_v30 = vmul.f32 %v6595_v11, %v3263_v51  ;;  %v6669_v51 = vadd.f32 %v7323_v23, %v3497_v57 }
 0x4cb   : > { %v3086_v54 = vpop.f32.mrf.mxu2  ;;  %v6657_v29 = vadd.f32 %v6410_v16, %v3493_v3  ;;  %v7322_v16 = vld [vmem:[#allocation47_spill] sm:$0xff] }
 0x4cc   : > { %v3087_v61 = vadd.f32 %v3086_v54, %v2998_v40  ;;  %v3175_v22 = vpop.f32.mrf.mxu3  ;;  %v2910_v35 = vpop.f32.mrf.mxu0  ;;  %v3538_v44 = vadd.f32 %v6403_v33, %v3406_v30 }
 0x4cd   : > { %v2999_v6 = vpop.f32.mrf.mxu1  ;;  %v2911_v21 = vadd.f32 %v2910_v35, %v6579_v50 }
 0x4ce   : > { %v3176_v28 = vadd.f32 %v3175_v22, %v3087_v61  ;;  %3539 = vadd.xlane.f32.xlu2 %v3538_v44 }
 0x4cf   : > { %v3000_v38 = vadd.f32 %v2999_v6, %v2911_v21 }
 0x4d0   : > { %v3267_v2 = vmax.f32 %v3176_v28, 0.0  ;;  %v3362_v28 = vmax.f32 %v6576_v14, 0.0 }
 0x4d2   : > { %v3410_v49 = vmul.f32 %v6595_v11, %v3267_v2 }
 0x4d3   : > { %v3088_v52 = vpop.f32.mrf.mxu2 }
 0x4d4   : > { %v3089_v60 = vadd.f32 %v3088_v52, %v3000_v38  ;;  %v3177_v8 = vpop.f32.mrf.mxu3  ;;  %v2913_v33 = vpop.f32.mrf.mxu0  ;;  %v3543_v18 = vadd.f32 %v6413_v34, %v3410_v49  ;;  %v3358_v34 = vmax.f32 %v6569_v58, 0.0 }
 0x4d5   : > { %v3002_v59 = vpop.f32.mrf.mxu1  ;;  %v2914_v4 = vadd.f32 %v2913_v33, %v6579_v50 }
 0x4d6   : > { %v3178_v27 = vadd.f32 %v3177_v8, %v3089_v60  ;;  %3544 = vadd.xlane.f32.xlu0 %v3543_v18  ;;  %v3501_v35 = vmul.f32 %v6349_v10, %v3358_v34  ;;  %v3505_v8 = vmul.f32 %v6349_v10, %v3362_v28 }
 0x4d7   : > { %2952 = vmatmul.bf16.gmra.mxu0 %v7319_v42  ;;  %v3003_v36 = vadd.f32 %v3002_v59, %v2914_v4  ;;  %v7324_v59 = vld [vmem:[#allocation73_spill] sm:$0xff] }
 0x4d8   : > { %v3271_v17 = vmax.f32 %v3178_v27, 0.0  ;;  %3041 = vmatmul.bf16.gmra.mxu1 %v7320_v55  ;;  %3130 = vmatmul.bf16.gmra.mxu2 %v7321_v5  ;;  %v6677_v3 = vadd.f32 %v6430_v48, %v3501_v35  ;;  %v6689_v27 = vadd.f32 %v7324_v59, %v3505_v8 }
 0x4d9   : > { %3219 = vmatmul.bf16.gmra.mxu3 %v7322_v16 }
 0x4da   : > { %v3414_v39 = vmul.f32 %v6595_v11, %v3271_v17 }
 0x4db   : > { %v3091_v9 = vpop.f32.mrf.mxu2 }
 0x4dc   : > { %v3092_v40 = vadd.f32 %v3091_v9, %v3003_v36  ;;  %v3180_v30 = vpop.f32.mrf.mxu3  ;;  %v2915_v12 = vpop.f32.mrf.mxu0  ;;  %v3548_v54 = vadd.f32 %v6423_v24, %v3414_v39 }
 0x4dd   : > { %v3004_v25 = vpop.f32.mrf.mxu1  ;;  %v2916_v22 = vadd.f32 %v2915_v12, %v6579_v50 }
 0x4de   : > { %v3181_v61 = vadd.f32 %v3180_v30, %v3092_v40  ;;  %3549 = vadd.xlane.f32.xlu1 %v3548_v54 }
 0x4df   : > { %v3005_v58 = vadd.f32 %v3004_v25, %v2916_v22  ;;  %v7325_v22 = vld [vmem:[#allocation62_spill] sm:$0xff] }
 0x4e0   : > { %v3275_v44 = vmax.f32 %v3181_v61, 0.0 }
 0x4e2   : > { %v3418_v6 = vmul.f32 %v6595_v11, %v3275_v44 }
 0x4e3   : > { %v3093_v21 = vpop.f32.mrf.mxu2 }
 0x4e4   : > { %v3094_v2 = vadd.f32 %v3093_v21, %v3005_v58  ;;  %v3182_v49 = vpop.f32.mrf.mxu3  ;;  %v2918_v24 = vpop.f32.mrf.mxu0  ;;  %v3553_v38 = vadd.f32 %v6433_v62, %v3418_v6  ;;  %v3366_v62 = vmax.f32 %v6582_v32, 0.0 }
 0x4e5   : > { %v3007_v7 = vpop.f32.mrf.mxu1  ;;  %v2919_v60 = vadd.f32 %v2918_v24, %v6579_v50 }
 0x4e6   : > { %v3183_v52 = vadd.f32 %v3182_v49, %v3094_v2  ;;  %3554 = vadd.xlane.f32.xlu2 %v3553_v38  ;;  %v7326_v49 = vld [vmem:[#allocation69_spill] sm:$0xff] }
 0x4e7   : > { %2957 = vmatmul.bf16.gmra.mxu0 %v5853_v13  ;;  %v3008_v14 = vadd.f32 %v3007_v7, %v2919_v60  ;;  %v7327_v60 = vld [vmem:[#allocation53_spill] sm:$0xff] }
 0x4e8   : > { %v3279_v33 = vmax.f32 %v3183_v52, 0.0  ;;  %3046 = vmatmul.bf16.gmra.mxu1 %v5856_v47  ;;  %3135 = vmatmul.bf16.gmra.mxu2 %v5862_v41 }
 0x4e9   : > { %3224 = vmatmul.bf16.gmra.mxu3 %v5866_v56  ;;  %v3509_v56 = vmul.f32 %v6349_v10, %v3366_v62 }
 0x4ea   : > { %v3422_v48 = vmul.f32 %v6595_v11, %v3279_v33  ;;  %v7328_v33 = vld [vmem:[#allocation54_spill] sm:$0xff] }
 0x4eb   : > { %v3096_v18 = vpop.f32.mrf.mxu2  ;;  %v6696_v36 = vadd.f32 %v6450_v45, %v3509_v56 }
 0x4ec   : > { %v3097_v4 = vadd.f32 %v3096_v18, %v3008_v14  ;;  %v3185_v57 = vpop.f32.mrf.mxu3  ;;  %v2920_v42 = vpop.f32.mrf.mxu0  ;;  %v3558_v13 = vadd.f32 %v6443_v19, %v3422_v48  ;;  %v7329_v48 = vld [vmem:[#allocation55_spill] sm:$0xff]  ;;  %v7330_v14 = vld [vmem:[#allocation56_spill] sm:$0xff] }
 0x4ed   : > { %v3009_v17 = vpop.f32.mrf.mxu1  ;;  %v2921_v41 = vadd.f32 %v2920_v42, %v6579_v50 }
 0x4ee   : > { %v3186_v47 = vadd.f32 %v3185_v57, %v3097_v4  ;;  %3559 = vadd.xlane.f32.xlu0 %v3558_v13  ;;  %v7331_v13 = vld [vmem:[#allocation63_spill] sm:$0xff] }
 0x4ef   : > { %v3010_v32 = vadd.f32 %v3009_v17, %v2921_v41 }
 0x4f0   : > { %v3283_v55 = vmax.f32 %v3186_v47, 0.0 }
 0x4f2   : > { %v3426_v5 = vmul.f32 %v6595_v11, %v3283_v55 }
 0x4f3   : > { %v3098_v16 = vpop.f32.mrf.mxu2 }
 0x4f4   : > { %v3099_v39 = vadd.f32 %v3098_v16, %v3010_v32  ;;  %v3187_v34 = vpop.f32.mrf.mxu3  ;;  %v2923_v9 = vpop.f32.mrf.mxu0  ;;  %v3563_v19 = vadd.f32 %v6453_v26, %v3426_v5 }
 0x4f5   : > { %v3012_v23 = vpop.f32.mrf.mxu1  ;;  %v2924_v30 = vadd.f32 %v2923_v9, %v6579_v50 }
 0x4f6   : > { %v3188_v40 = vadd.f32 %v3187_v34, %v3099_v39  ;;  %3564 = vadd.xlane.f32.xlu1 %v3563_v19  ;;  %v7332_v19 = vld [vmem:[#allocation65_spill] sm:$0xff] }
 0x4f7   : > { %2962 = vmatmul.bf16.gmra.mxu0 %v7256_v46  ;;  %v3013_v12 = vadd.f32 %v3012_v23, %v2924_v30 }
 0x4f8   : > { %v3287_v10 = vmax.f32 %v3188_v40, 0.0  ;;  %3051 = vmatmul.bf16.gmra.mxu1 %v7257_v37  ;;  %3140 = vmatmul.bf16.gmra.mxu2 %v7258_v31 }
 0x4f9   : > { %3229 = vmatmul.bf16.gmra.mxu3 %v7259_v1 }
 0x4fa   : > { %v3430_v45 = vmul.f32 %v6595_v11, %v3287_v10 }
 0x4fb   : > { %v3101_v54 = vpop.f32.mrf.mxu2 }
 0x4fc   : > { %v3102_v25 = vadd.f32 %v3101_v54, %v3013_v12  ;;  %v3190_v26 = vpop.f32.mrf.mxu3  ;;  %v2925_v61 = vpop.f32.mrf.mxu0  ;;  %v3568_v35 = vadd.f32 %v7325_v22, %v3430_v45 }
 0x4fd   : > { %v3014_v44 = vpop.f32.mrf.mxu1  ;;  %v2926_v46 = vadd.f32 %v2925_v61, %v6579_v50 }
 0x4fe   : > { %v3191_v6 = vadd.f32 %v3190_v26, %v3102_v25  ;;  %3569 = vadd.xlane.f32.xlu2 %v3568_v35 }
 0x4ff   : > { %v3015_v31 = vadd.f32 %v3014_v44, %v2926_v46 }
 0x500   : > { %v3291_v58 = vmax.f32 %v3191_v6, 0.0 }
 0x502   : > { %v3434_v37 = vmul.f32 %v6595_v11, %v3291_v58  ;;  %v7333_v58 = vld [vmem:[#allocation66_spill] sm:$0xff] }
 0x503   : > { %v3103_v28 = vpop.f32.mrf.mxu2 }
 0x504   : > { %v3104_v1 = vadd.f32 %v3103_v28, %v3015_v31  ;;  %v3192_v21 = vpop.f32.mrf.mxu3  ;;  %v2928_v2 = vpop.f32.mrf.mxu0  ;;  %v3573_v24 = vadd.f32 %v7326_v49, %v3434_v37 }
 0x505   : > { %v3017_v38 = vpop.f32.mrf.mxu1  ;;  %v2929_v52 = vadd.f32 %v2928_v2, %v6579_v50 }
 0x506   : > { %v3193_v7 = vadd.f32 %v3192_v21, %v3104_v1  ;;  %3574 = vadd.xlane.f32.xlu0 %v3573_v24 }
 0x507   : > { %2967 = vmatmul.bf16.gmra.mxu0 %v7327_v60  ;;  %v3018_v18 = vadd.f32 %v3017_v38, %v2929_v52  ;;  %v5422_v38 = vmov 0   ;;  %v7334_v52 = vld [vmem:[#allocation68_spill] sm:$0xff] }
 0x508   : > { %v3295_v8 = vmax.f32 %v3193_v7, 0.0  ;;  %3056 = vmatmul.bf16.gmra.mxu1 %v7328_v33  ;;  %3145 = vmatmul.bf16.gmra.mxu2 %v7329_v48 }
 0x509   : > { %3234 = vmatmul.bf16.gmra.mxu3 %v7330_v14  ;;  %5373 = vset.pattern.permute.xlu2 %v5422_v38 }
 0x50a   : > { %v3438_v62 = vmul.f32 %v6595_v11, %v3295_v8  ;;  %5374 = vset.pattern.permute.xlu0 %v5422_v38  ;;  %5375 = vset.pattern.permute.xlu1 %v5422_v38 }
 0x50b   : > { %v3106_v59 = vpop.f32.mrf.mxu2 }
 0x50c   : > { %v3107_v4 = vadd.f32 %v3106_v59, %v3018_v18  ;;  %v3195_v57 = vpop.f32.mrf.mxu3  ;;  %v2930_v42 = vpop.f32.mrf.mxu0  ;;  %v3578_v17 = vadd.f32 %v7331_v13, %v3438_v62 }
 0x50d   : > { %v2931_v41 = vadd.f32 %v2930_v42, %v6579_v50  ;;  %v3019_v56 = vpop.f32.mrf.mxu1 }
 0x50e   : > { %v3196_v47 = vadd.f32 %v3195_v57, %v3107_v4  ;;  %3579 = vadd.xlane.f32.xlu1 %v3578_v17 }
 0x50f   : > { %v3020_v32 = vadd.f32 %v3019_v56, %v2931_v41 }
 0x510   : > { %v3299_v55 = vmax.f32 %v3196_v47, 0.0 }
 0x512   : > { %v3442_v5 = vmul.f32 %v6595_v11, %v3299_v55 }
 0x513   : > { %v3108_v16 = vpop.f32.mrf.mxu2 }
 0x514   : > { %v3109_v39 = vadd.f32 %v3108_v16, %v3020_v32  ;;  %v3197_v34 = vpop.f32.mrf.mxu3  ;;  %v2933_v9 = vpop.f32.mrf.mxu0  ;;  %v3583_v23 = vadd.f32 %v7332_v19, %v3442_v5 }
 0x515   : > { %v2934_v40 = vadd.f32 %v2933_v9, %v6579_v50  ;;  %v3022_v45 = vpop.f32.mrf.mxu1 }
 0x516   : > { %v3198_v30 = vadd.f32 %v3197_v34, %v3109_v39  ;;  %3584 = vadd.xlane.f32.xlu2 %v3583_v23 }
 0x517   : > { %v3023_v12 = vadd.f32 %v3022_v45, %v2934_v40 }
 0x518   : > { %v3303_v10 = vmax.f32 %v3198_v30, 0.0 }
 0x519   : > { %v3515_v54 = vpop.xlane.xlu0 %3514 }
 0x51a   : > { %v3446_v25 = vmul.f32 %v6595_v11, %v3303_v10  ;;  %v3703_v26 = vperm.slane %v3515_v54, 0  ;;  %v3704_v61 = vperm.slane %v3515_v54, 1  ;;  %v3705_v22 = vperm.slane %v3515_v54, 2 }
 0x51b   : > { %v3706_v35 = vperm.slane %v3515_v54, 3  ;;  %v3111_v44 = vpop.f32.mrf.mxu2  ;;  %v3707_v6 = vperm.slane %v3515_v54, 4  ;;  %v3708_v31 = vperm.slane %v3515_v54, 5  ;;  %v3709_v1 = vperm.slane %v3515_v54, 6 }
 0x51c   : > { %3959 = vst [vmem:[#allocation1] ss:$9 sm:$0xff] %v3703_v26  ;;  %v3112_v46 = vadd.f32 %v3111_v44, %v3023_v12  ;;  %v3588_v37 = vadd.f32 %v7333_v58, %v3446_v25  ;;  %v3200_v28 = vpop.f32.mrf.mxu3  ;;  %v3710_v2 = vperm.slane %v3515_v54, 7  ;;  %v2935_v42 = vpop.f32.mrf.mxu0 }
 0x51d   : > { %3961 = vst [vmem:[#allocation1 + $0x1] ss:$9 sm:$0xff] %v3704_v61  ;;  %v3024_v56 = vpop.f32.mrf.mxu1  ;;  %v2936_v23 = vadd.f32 %v2935_v42, %v6579_v50 }
 0x51e   : > { %3963 = vst [vmem:[#allocation1 + $0x2] ss:$9 sm:$0xff] %v3705_v22  ;;  %v3201_v21 = vadd.f32 %v3200_v28, %v3112_v46  ;;  %3589 = vadd.xlane.f32.xlu0 %v3588_v37 }
 0x51f   : > { %3965 = vst [vmem:[#allocation1 + $0x3] ss:$9 sm:$0xff] %v3706_v35  ;;  %v3025_v10 = vadd.f32 %v3024_v56, %v2936_v23 }
 0x520   : > { %3967 = vst [vmem:[#allocation1 + $0x4] ss:$9 sm:$0xff] %v3707_v6  ;;  %v3307_v49 = vmax.f32 %v3201_v21, 0.0 }
 0x521   : > { %3969 = vst [vmem:[#allocation1 + $0x5] ss:$9 sm:$0xff] %v3708_v31  ;;  %v3520_v7 = vpop.xlane.xlu0 %3519 }
 0x522   : > { %3971 = vst [vmem:[#allocation1 + $0x6] ss:$9 sm:$0xff] %v3709_v1  ;;  %v3450_v24 = vmul.f32 %v6595_v11, %v3307_v49  ;;  %v3711_v8 = vperm.slane %v3520_v7, 0  ;;  %v3712_v33 = vperm.slane %v3520_v7, 1  ;;  %v3713_v48 = vperm.slane %v3520_v7, 2 }
 0x523   : > { %3973 = vst [vmem:[#allocation1 + $0x7] ss:$9 sm:$0xff] %v3710_v2  ;;  %v3714_v62 = vperm.slane %v3520_v7, 3  ;;  %v3715_v18 = vperm.slane %v3520_v7, 4  ;;  %v3716_v59 = vperm.slane %v3520_v7, 5  ;;  %v3717_v4 = vperm.slane %v3520_v7, 6  ;;  %v3113_v5 = vpop.f32.mrf.mxu2 }
 0x524   : > { %v3593_v60 = vadd.f32 %v7334_v52, %v3450_v24  ;;  %v3718_v57 = vperm.slane %v3520_v7, 7  ;;  %v2938_v9 = vpop.f32.mrf.mxu0  ;;  %v3202_v40 = vpop.f32.mrf.mxu3  ;;  %v3114_v54 = vadd.f32 %v3113_v5, %v3025_v10 }
 0x525   : > { %v3027_v45 = vpop.f32.mrf.mxu1  ;;  %v2939_v28 = vadd.f32 %v2938_v9, %v6579_v50 }
 0x526   : > { %3594 = vadd.xlane.f32.xlu1 %v3593_v60  ;;  %v3203_v6 = vadd.f32 %v3202_v40, %v3114_v54 }
 0x527   : > { %v3028_v24 = vadd.f32 %v3027_v45, %v2939_v28  ;;  %v7336_v45 = vld [vmem:[#allocation49_spill] sm:$0xff] }
 0x528   : > { %v3311_v21 = vmax.f32 %v3203_v6, 0.0 }
 0x529   : > { %v3525_v13 = vpop.xlane.xlu1 %3524 }
 0x52a   : > { %v3974_v14 = vld [vmem:[#allocation1] sm:$0xff]  ;;  %v3719_v17 = vperm.slane %v3525_v13, 0  ;;  %v3720_v47 = vperm.slane %v3525_v13, 1  ;;  %v3721_v41 = vperm.slane %v3525_v13, 2  ;;  %v3722_v32 = vperm.slane %v3525_v13, 3 }
 0x52b   : > { %3975 = vst [vmem:[#allocation1] ss:$9 sm:$0xff] %v3711_v8  ;;  %v3723_v16 = vperm.slane %v3525_v13, 4  ;;  %v3724_v39 = vperm.slane %v3525_v13, 5  ;;  %v3725_v34 = vperm.slane %v3525_v13, 6  ;;  %v3726_v19 = vperm.slane %v3525_v13, 7  ;;  %v3116_v12 = vpop.f32.mrf.mxu2 }
 0x52c   : > { %3976 = vst [vmem:[#allocation1 + $0x1] ss:$9 sm:$0xff] %v3712_v33  ;;  %v2940_v61 = vpop.f32.mrf.mxu0  ;;  %v3205_v46 = vpop.f32.mrf.mxu3  ;;  %v3454_v38 = vmul.f32 %v6595_v11, %v3311_v21  ;;  %v3117_v60 = vadd.f32 %v3116_v12, %v3028_v24 }
 0x52d   : > { %3977 = vst [vmem:[#allocation1 + $0x2] ss:$9 sm:$0xff] %v3713_v48  ;;  %v3029_v2 = vpop.f32.mrf.mxu1 }
 0x52e   : > { %3978 = vst [vmem:[#allocation1 + $0x3] ss:$9 sm:$0xff] %v3714_v62  ;;  %4255 = vperm.xlu2 %5373, %v3974_v14   ;;  %v7335_v14 = vld [vmem:[#allocation48_spill] sm:$0xff] }
 0x52f   : > { %3979 = vst [vmem:[#allocation1 + $0x4] ss:$9 sm:$0xff] %v3715_v18  ;;  %v3598_v62 = vadd.f32 %v7335_v14, %v3454_v38  ;;  %v3206_v18 = vadd.f32 %v3205_v46, %v3117_v60  ;;  %v7337_v38 = vld [vmem:[#allocation50_spill] sm:$0xff] }
 0x530   : > { %3980 = vst [vmem:[#allocation1 + $0x5] ss:$9 sm:$0xff] %v3716_v59 }
 0x531   : > { %3981 = vst [vmem:[#allocation1 + $0x6] ss:$9 sm:$0xff] %v3717_v4  ;;  %v3530_v30 = vpop.xlane.xlu1 %3529 }
 0x532   : > { %3982 = vst [vmem:[#allocation1 + $0x7] ss:$9 sm:$0xff] %v3718_v57  ;;  %v3727_v25 = vperm.slane %v3530_v30, 0  ;;  %v3728_v26 = vperm.slane %v3530_v30, 1  ;;  %v3729_v22 = vperm.slane %v3530_v30, 2  ;;  %v3730_v44 = vperm.slane %v3530_v30, 3 }
 0x533   : > { %v3731_v58 = vperm.slane %v3530_v30, 4  ;;  %v3732_v37 = vperm.slane %v3530_v30, 5  ;;  %v3733_v31 = vperm.slane %v3530_v30, 6  ;;  %v3734_v1 = vperm.slane %v3530_v30, 7  ;;  %v3118_v49 = vpop.f32.mrf.mxu2 }
 0x534   : > { %v6727_v7 = vpop.f32.mrf.mxu0  ;;  %v3207_v8 = vpop.f32.mrf.mxu3 }
 0x535   : > { %v6730_v57 = vpop.f32.mrf.mxu1 }
 0x539   : > { %v3983_v55 = vld [vmem:[#allocation1] sm:$0xff]  ;;  %v3535_v52 = vpop.xlane.xlu2 %3534 }
 0x53a   : > { %3984 = vst [vmem:[#allocation1] ss:$9 sm:$0xff] %v3719_v17  ;;  %4258 = vperm.xlu0 %5374, %v3983_v55   ;;  %v3735_v33 = vperm.slane %v3535_v52, 0  ;;  %v3736_v48 = vperm.slane %v3535_v52, 1  ;;  %v3737_v59 = vperm.slane %v3535_v52, 2  ;;  %v3738_v42 = vperm.slane %v3535_v52, 3 }
 0x53b   : > { %3985 = vst [vmem:[#allocation1 + $0x1] ss:$9 sm:$0xff] %v3720_v47  ;;  %v6732_v13 = vpop.f32.mrf.mxu2  ;;  %v3739_v17 = vperm.slane %v3535_v52, 4  ;;  %v3740_v47 = vperm.slane %v3535_v52, 5  ;;  %v3741_v56 = vperm.slane %v3535_v52, 6  ;;  %v2941_v55 = vadd.f32 %v2940_v61, %v6579_v50 }
 0x53c   : > { %3986 = vst [vmem:[#allocation1 + $0x2] ss:$9 sm:$0xff] %v3721_v41  ;;  %v3315_v41 = vmax.f32 %v3206_v18, 0.0  ;;  %v3742_v5 = vperm.slane %v3535_v52, 7 }
 0x53d   : > { %3987 = vst [vmem:[#allocation1 + $0x3] ss:$9 sm:$0xff] %v3722_v32  ;;  %v2945_v32 = vpop.f32.mrf.mxu0  ;;  %v3030_v9 = vadd.f32 %v3029_v2, %v2941_v55  ;;  %v3034_v40 = vpop.f32.mrf.mxu1 }
 0x53e   : > { %3988 = vst [vmem:[#allocation1 + $0x4] ss:$9 sm:$0xff] %v3723_v16  ;;  %v6735_v16 = vpop.f32.mrf.mxu3 }
 0x53f   : > { %3989 = vst [vmem:[#allocation1 + $0x5] ss:$9 sm:$0xff] %v3724_v39  ;;  %v3458_v39 = vmul.f32 %v6595_v11, %v3315_v41  ;;  %v3119_v23 = vadd.f32 %v3118_v49, %v3030_v9 }
 0x540   : > { %3990 = vst [vmem:[#allocation1 + $0x6] ss:$9 sm:$0xff] %v3725_v34  ;;  %v2946_v34 = vadd.f32 %v2945_v32, %v6579_v50 }
 0x541   : > { %3991 = vst [vmem:[#allocation1 + $0x7] ss:$9 sm:$0xff] %v3726_v19  ;;  %v3540_v19 = vpop.xlane.xlu2 %3539  ;;  %v3603_v12 = vadd.f32 %v7336_v45, %v3458_v39  ;;  %v3208_v61 = vadd.f32 %v3207_v8, %v3119_v23 }
 0x542   : > { %v3035_v10 = vadd.f32 %v3034_v40, %v2946_v34  ;;  %v3743_v54 = vperm.slane %v3540_v19, 0  ;;  %v3747_v6 = vperm.slane %v3540_v19, 4  ;;  %v3749_v28 = vperm.slane %v3540_v19, 6 }
 0x543   : > { %v3123_v30 = vpop.f32.mrf.mxu2 }
 0x546   : > { %v3212_v46 = vpop.f32.mrf.mxu3 }
 0x548   : > { %v3992_v35 = vld [vmem:[#allocation1] sm:$0xff] }
 0x549   : > { %3993 = vst [vmem:[#allocation1] ss:$9 sm:$0xff] %v3727_v25  ;;  %4261 = vperm.xlu1 %5375, %v3992_v35   ;;  %v3744_v25 = vperm.slane %v3540_v19, 1  ;;  %v3545_v49 = vpop.xlane.xlu0 %3544 }
 0x54a   : > { %3994 = vst [vmem:[#allocation1 + $0x1] ss:$9 sm:$0xff] %v3728_v26  ;;  %v3124_v26 = vadd.f32 %v3123_v30, %v3035_v10  ;;  %v3751_v60 = vperm.slane %v3545_v49, 0  ;;  %v3752_v8 = vperm.slane %v3545_v49, 1  ;;  %v3754_v18 = vperm.slane %v3545_v49, 3 }
 0x54b   : > { %3995 = vst [vmem:[#allocation1 + $0x2] ss:$9 sm:$0xff] %v3729_v22  ;;  %v3745_v22 = vperm.slane %v3540_v19, 2 }
 0x54c   : > { %3996 = vst [vmem:[#allocation1 + $0x3] ss:$9 sm:$0xff] %v3730_v44  ;;  %v3746_v44 = vperm.slane %v3540_v19, 3 }
 0x54d   : > { %3997 = vst [vmem:[#allocation1 + $0x4] ss:$9 sm:$0xff] %v3731_v58  ;;  %v3748_v58 = vperm.slane %v3540_v19, 5 }
 0x54e   : > { %3998 = vst [vmem:[#allocation1 + $0x5] ss:$9 sm:$0xff] %v3732_v37  ;;  %v3213_v37 = vadd.f32 %v3212_v46, %v3124_v26 }
 0x54f   : > { %3999 = vst [vmem:[#allocation1 + $0x6] ss:$9 sm:$0xff] %v3733_v31  ;;  %v3319_v31 = vmax.f32 %v3208_v61, 0.0 }
 0x550   : > { %4000 = vst [vmem:[#allocation1 + $0x7] ss:$9 sm:$0xff] %v3734_v1  ;;  %v3750_v1 = vperm.slane %v3540_v19, 7  ;;  %v3327_v21 = vmax.f32 %v3213_v37, 0.0  ;;  %v2944_v19 = vadd.f32 %v6727_v7, %v6579_v50 }
 0x551   : > { %v3462_v2 = vmul.f32 %v6595_v11, %v3319_v31 }
 0x552   : > { %v3470_v24 = vmul.f32 %v6595_v11, %v3327_v21  ;;  %v3033_v40 = vadd.f32 %v6730_v57, %v2944_v19 }
 0x553   : > { %v3608_v52 = vadd.f32 %v7337_v38, %v3462_v2 }
 0x554   : > { %v3122_v10 = vadd.f32 %v6732_v13, %v3033_v40 }
 0x557   : > { %v4001_v4 = vld [vmem:[#allocation1] sm:$0xff]  ;;  %3599 = vadd.xlane.f32.xlu2 %v3598_v62 }
 0x558   : > { %4002 = vst [vmem:[#allocation1] ss:$9 sm:$0xff] %v3735_v33  ;;  %v3753_v33 = vperm.slane %v3545_v49, 2 }
 0x559   : > { %4003 = vst [vmem:[#allocation1 + $0x1] ss:$9 sm:$0xff] %v3736_v48  ;;  %v7338_v48 = vld [vmem:[#allocation51_spill] sm:$0xff]  ;;  %v3555_v30 = vpop.xlane.xlu2 %3554 }
 0x55a   : > { %4004 = vst [vmem:[#allocation1 + $0x2] ss:$9 sm:$0xff] %v3737_v59  ;;  %v3618_v14 = vadd.f32 %v7338_v48, %v3470_v24  ;;  %v3755_v59 = vperm.slane %v3545_v49, 4  ;;  %v3767_v45 = vperm.slane %v3555_v30, 0  ;;  %v3770_v7 = vperm.slane %v3555_v30, 3 }
 0x55b   : > { %4005 = vst [vmem:[#allocation1 + $0x3] ss:$9 sm:$0xff] %v3738_v42  ;;  %v3756_v42 = vperm.slane %v3545_v49, 5  ;;  %v3771_v61 = vperm.slane %v3555_v30, 4  ;;  %v3774_v57 = vperm.slane %v3555_v30, 7 }
 0x55c   : > { %4006 = vst [vmem:[#allocation1 + $0x4] ss:$9 sm:$0xff] %v3739_v17  ;;  %v3757_v17 = vperm.slane %v3545_v49, 6 }
 0x55d   : > { %4007 = vst [vmem:[#allocation1 + $0x5] ss:$9 sm:$0xff] %v3740_v47  ;;  %v3550_v47 = vpop.xlane.xlu1 %3549 }
 0x55e   : > { %4008 = vst [vmem:[#allocation1 + $0x6] ss:$9 sm:$0xff] %v3741_v56  ;;  %v3759_v41 = vperm.slane %v3550_v47, 0  ;;  %v3760_v56 = vperm.slane %v3550_v47, 1  ;;  %v3761_v55 = vperm.slane %v3550_v47, 2  ;;  %v3762_v32 = vperm.slane %v3550_v47, 3 }
 0x55f   : > { %4009 = vst [vmem:[#allocation1 + $0x7] ss:$9 sm:$0xff] %v3742_v5  ;;  %v3763_v39 = vperm.slane %v3550_v47, 4  ;;  %v3764_v34 = vperm.slane %v3550_v47, 5  ;;  %v3765_v9 = vperm.slane %v3550_v47, 6  ;;  %v3766_v23 = vperm.slane %v3550_v47, 7 }
 0x564   : > { %3604 = vadd.xlane.f32.xlu0 %v3603_v12  ;;  %v3768_v12 = vperm.slane %v3555_v30, 1 }
 0x566   : > { %v4010_v35 = vld [vmem:[#allocation1] sm:$0xff] }
 0x567   : > { %4011 = vst [vmem:[#allocation1] ss:$9 sm:$0xff] %v3743_v54  ;;  %v3211_v54 = vadd.f32 %v6735_v16, %v3122_v10  ;;  %v3560_v16 = vpop.xlane.xlu0 %3559 }
 0x568   : > { %4012 = vst [vmem:[#allocation1 + $0x1] ss:$9 sm:$0xff] %v3744_v25  ;;  %v3769_v25 = vperm.slane %v3555_v30, 2  ;;  %v3775_v37 = vperm.slane %v3560_v16, 0  ;;  %v3776_v31 = vperm.slane %v3560_v16, 1  ;;  %v3777_v21 = vperm.slane %v3560_v16, 2 }
 0x569   : > { %4013 = vst [vmem:[#allocation1 + $0x2] ss:$9 sm:$0xff] %v3745_v22  ;;  %v3772_v22 = vperm.slane %v3555_v30, 5  ;;  %v3778_v24 = vperm.slane %v3560_v16, 3  ;;  %v3779_v38 = vperm.slane %v3560_v16, 4 }
 0x56a   : > { %4014 = vst [vmem:[#allocation1 + $0x3] ss:$9 sm:$0xff] %v3746_v44  ;;  %v3773_v44 = vperm.slane %v3555_v30, 6 }
 0x56b   : > { %4015 = vst [vmem:[#allocation1 + $0x4] ss:$9 sm:$0xff] %v3747_v6  ;;  %v2948_v6 = vpop.f32.mrf.mxu0 }
 0x56c   : > { %4016 = vst [vmem:[#allocation1 + $0x5] ss:$9 sm:$0xff] %v3748_v58  ;;  %3619 = vadd.xlane.f32.xlu0 %v3618_v14  ;;  %v2949_v46 = vadd.f32 %v2948_v6, %v6579_v50 }
 0x56d   : > { %4017 = vst [vmem:[#allocation1 + $0x6] ss:$9 sm:$0xff] %v3749_v28  ;;  %v3037_v28 = vpop.f32.mrf.mxu1 }
 0x56e   : > { %4018 = vst [vmem:[#allocation1 + $0x7] ss:$9 sm:$0xff] %v3750_v1  ;;  %v3126_v1 = vpop.f32.mrf.mxu2  ;;  %v3038_v2 = vadd.f32 %v3037_v28, %v2949_v46 }
 0x56f   : > { %4264 = vperm.xlu2 %5373, %v4001_v4   ;;  %v3758_v4 = vperm.slane %v3545_v49, 7 }
 0x573   : > { %3609 = vadd.xlane.f32.xlu1 %v3608_v52  ;;  %v3127_v52 = vadd.f32 %v3126_v1, %v3038_v2  ;;  %v2950_v14 = vpop.f32.mrf.mxu0 }
 0x575   : > { %v4019_v62 = vld [vmem:[#allocation1] sm:$0xff] }
 0x576   : > { %4020 = vst [vmem:[#allocation1] ss:$9 sm:$0xff] %v3751_v60  ;;  %v3780_v60 = vperm.slane %v3560_v16, 5 }
 0x577   : > { %4021 = vst [vmem:[#allocation1 + $0x1] ss:$9 sm:$0xff] %v3752_v8  ;;  %4267 = vperm.xlu2 %5373, %v4010_v35   ;;  %v3323_v35 = vmax.f32 %v3211_v54, 0.0  ;;  %v3781_v8 = vperm.slane %v3560_v16, 6  ;;  %v3570_v54 = vpop.xlane.xlu2 %3569 }
 0x578   : > { %4022 = vst [vmem:[#allocation1 + $0x2] ss:$9 sm:$0xff] %v3753_v33  ;;  %v3782_v33 = vperm.slane %v3560_v16, 7  ;;  %v3796_v6 = vperm.slane %v3570_v54, 5  ;;  %v3797_v46 = vperm.slane %v3570_v54, 6 }
 0x579   : > { %4023 = vst [vmem:[#allocation1 + $0x3] ss:$9 sm:$0xff] %v3754_v18  ;;  %v3466_v13 = vmul.f32 %v6595_v11, %v3323_v35  ;;  %v3793_v35 = vperm.slane %v3570_v54, 2 }
 0x57a   : > { %4024 = vst [vmem:[#allocation1 + $0x4] ss:$9 sm:$0xff] %v3755_v59  ;;  %v3039_v59 = vpop.f32.mrf.mxu1 }
 0x57b   : > { %4025 = vst [vmem:[#allocation1 + $0x5] ss:$9 sm:$0xff] %v3756_v42  ;;  %v3613_v58 = vadd.f32 %v6592_v20, %v3466_v13  ;;  %v3215_v20 = vpop.f32.mrf.mxu3  ;;  %v3128_v42 = vpop.f32.mrf.mxu2  ;;  %v3795_v13 = vperm.slane %v3570_v54, 4 }
 0x57c   : > { %4026 = vst [vmem:[#allocation1 + $0x6] ss:$9 sm:$0xff] %v3757_v17  ;;  %v3216_v48 = vadd.f32 %v3215_v20, %v3127_v52 }
 0x57d   : > { %4027 = vst [vmem:[#allocation1 + $0x7] ss:$9 sm:$0xff] %v3758_v4 }
 0x57e   : > { %v3331_v18 = vmax.f32 %v3216_v48, 0.0 }
 0x580   : > { %v3474_v47 = vmul.f32 %v6595_v11, %v3331_v18 }
 0x582   : > { %v3042_v10 = vpop.f32.mrf.mxu1 }
 0x584   : > { %v6744_v5 = vld [vmem:[#allocation1] sm:$0xff] }
 0x585   : > { %4029 = vst [vmem:[#allocation1] ss:$9 sm:$0xff] %v3759_v41 }
 0x586   : > { %4030 = vst [vmem:[#allocation1 + $0x1] ss:$9 sm:$0xff] %v3760_v56 }
 0x587   : > { %4031 = vst [vmem:[#allocation1 + $0x2] ss:$9 sm:$0xff] %v3761_v55 }
 0x588   : > { %4032 = vst [vmem:[#allocation1 + $0x3] ss:$9 sm:$0xff] %v3762_v32  ;;  %v2953_v32 = vpop.f32.mrf.mxu0 }
 0x589   : > { %4033 = vst [vmem:[#allocation1 + $0x4] ss:$9 sm:$0xff] %v3763_v39  ;;  %v2954_v40 = vadd.f32 %v2953_v32, %v6579_v50 }
 0x58a   : > { %4034 = vst [vmem:[#allocation1 + $0x5] ss:$9 sm:$0xff] %v3764_v34 }
 0x58b   : > { %4035 = vst [vmem:[#allocation1 + $0x6] ss:$9 sm:$0xff] %v3765_v9  ;;  %v3217_v9 = vpop.f32.mrf.mxu3 }
 0x58c   : > { %4036 = vst [vmem:[#allocation1 + $0x7] ss:$9 sm:$0xff] %v3766_v23  ;;  %4270 = vperm.xlu1 %5375, %v4019_v62   ;;  %v3565_v62 = vpop.xlane.xlu1 %3564  ;;  %v3623_v23 = vadd.f32 %v6609_v63, %v3474_v47 }
 0x58d   : > { %v3783_v17 = vperm.slane %v3565_v62, 0  ;;  %v3784_v4 = vperm.slane %v3565_v62, 1  ;;  %v3785_v41 = vperm.slane %v3565_v62, 2  ;;  %v3786_v55 = vperm.slane %v3565_v62, 3 }
 0x58e   : > { %v3787_v39 = vperm.slane %v3565_v62, 4  ;;  %v3788_v34 = vperm.slane %v3565_v62, 5  ;;  %v3789_v19 = vperm.slane %v3565_v62, 6  ;;  %v3790_v30 = vperm.slane %v3565_v62, 7 }
 0x593   : > { %v6751_v26 = vld [vmem:[#allocation1] sm:$0xff] }
 0x594   : > { %4038 = vst [vmem:[#allocation1] ss:$9 sm:$0xff] %v3767_v45  ;;  %v3131_v45 = vpop.f32.mrf.mxu2 }
 0x595   : > { %4039 = vst [vmem:[#allocation1 + $0x1] ss:$9 sm:$0xff] %v3768_v12  ;;  %v3043_v12 = vadd.f32 %v3042_v10, %v2954_v40  ;;  %v3585_v10 = vpop.xlane.xlu2 %3584 }
 0x596   : > { %4040 = vst [vmem:[#allocation1 + $0x2] ss:$9 sm:$0xff] %v3769_v25 }
 0x597   : > { %4041 = vst [vmem:[#allocation1 + $0x3] ss:$9 sm:$0xff] %v3770_v7  ;;  %v3132_v25 = vadd.f32 %v3131_v45, %v3043_v12  ;;  %v3791_v7 = vperm.slane %v3570_v54, 0  ;;  %v3815_v45 = vperm.slane %v3585_v10, 0 }
 0x598   : > { %4042 = vst [vmem:[#allocation1 + $0x4] ss:$9 sm:$0xff] %v3771_v61  ;;  %v3220_v61 = vpop.f32.mrf.mxu3 }
 0x599   : > { %4043 = vst [vmem:[#allocation1 + $0x5] ss:$9 sm:$0xff] %v3772_v22  ;;  %v3792_v22 = vperm.slane %v3570_v54, 1  ;;  %v3221_v63 = vadd.f32 %v3220_v61, %v3132_v25  ;;  %v3817_v61 = vperm.slane %v3585_v10, 2 }
 0x59a   : > { %4044 = vst [vmem:[#allocation1 + $0x6] ss:$9 sm:$0xff] %v3773_v44 }
 0x59b   : > { %4045 = vst [vmem:[#allocation1 + $0x7] ss:$9 sm:$0xff] %v3774_v57  ;;  %v3794_v57 = vperm.slane %v3570_v54, 3  ;;  %v3339_v16 = vmax.f32 %v3221_v63, 0.0  ;;  %v3818_v63 = vperm.slane %v3585_v10, 3 }
 0x5a0   : > { %3614 = vadd.xlane.f32.xlu2 %v3613_v58  ;;  %v3482_v58 = vmul.f32 %v6595_v11, %v3339_v16  ;;  %v3821_v16 = vperm.slane %v3585_v10, 6 }
 0x5a2   : > { %v4046_v49 = vld [vmem:[#allocation1] sm:$0xff]  ;;  %v3633_v28 = vadd.f32 %v6629_v53, %v3482_v58 }
 0x5a3   : > { %4047 = vst [vmem:[#allocation1] ss:$9 sm:$0xff] %v3775_v37  ;;  %4279 = vperm.xlu0 %5374, %v4046_v49   ;;  %v2951_v37 = vadd.f32 %v2950_v14, %v6579_v50  ;;  %v3580_v14 = vpop.xlane.xlu1 %3579 }
 0x5a4   : > { %4048 = vst [vmem:[#allocation1 + $0x1] ss:$9 sm:$0xff] %v3776_v31  ;;  %v3575_v31 = vpop.xlane.xlu0 %3574  ;;  %v3807_v18 = vperm.slane %v3580_v14, 0  ;;  %v3811_v47 = vperm.slane %v3580_v14, 4 }
 0x5a5   : > { %4049 = vst [vmem:[#allocation1 + $0x2] ss:$9 sm:$0xff] %v3777_v21  ;;  %v3799_v1 = vperm.slane %v3575_v31, 0  ;;  %v3040_v21 = vadd.f32 %v3039_v59, %v2951_v37  ;;  %v3800_v2 = vperm.slane %v3575_v31, 1  ;;  %v3801_v49 = vperm.slane %v3575_v31, 2  ;;  %v2955_v59 = vpop.f32.mrf.mxu0 }
 0x5a6   : > { %4050 = vst [vmem:[#allocation1 + $0x3] ss:$9 sm:$0xff] %v3778_v24  ;;  %v3802_v52 = vperm.slane %v3575_v31, 3  ;;  %v3806_v48 = vperm.slane %v3575_v31, 7  ;;  %v2956_v32 = vadd.f32 %v2955_v59, %v6579_v50 }
 0x5a7   : > { %4051 = vst [vmem:[#allocation1 + $0x4] ss:$9 sm:$0xff] %v3779_v38  ;;  %v3129_v24 = vadd.f32 %v3128_v42, %v3040_v21  ;;  %v3809_v42 = vperm.slane %v3580_v14, 2 }
 0x5a8   : > { %4052 = vst [vmem:[#allocation1 + $0x5] ss:$9 sm:$0xff] %v3780_v60  ;;  %v3803_v60 = vperm.slane %v3575_v31, 4 }
 0x5a9   : > { %4053 = vst [vmem:[#allocation1 + $0x6] ss:$9 sm:$0xff] %v3781_v8  ;;  %v3804_v8 = vperm.slane %v3575_v31, 5  ;;  %v3218_v20 = vadd.f32 %v3217_v9, %v3129_v24  ;;  %v3133_v9 = vpop.f32.mrf.mxu2 }
 0x5aa   : > { %4054 = vst [vmem:[#allocation1 + $0x7] ss:$9 sm:$0xff] %v3782_v33  ;;  %v3805_v33 = vperm.slane %v3575_v31, 6 }
 0x5ab   : > { %v3335_v53 = vmax.f32 %v3218_v20, 0.0  ;;  %v6783_v37 = vpop.xlane.xlu1 %3594 }
 0x5ac   : > { %v3590_v58 = vpop.xlane.xlu0 %3589 }
 0x5ad   : > { %v3478_v62 = vmul.f32 %v6595_v11, %v3335_v53  ;;  %v6773_v40 = vpop.f32.mrf.mxu0 }
 0x5b1   : > { %v6757_v56 = vld [vmem:[#allocation1] sm:$0xff] }
 0x5b2   : > { %4056 = vst [vmem:[#allocation1] ss:$9 sm:$0xff] %v3783_v17 }
 0x5b3   : > { %4057 = vst [vmem:[#allocation1 + $0x1] ss:$9 sm:$0xff] %v3784_v4  ;;  %v3810_v4 = vperm.slane %v3580_v14, 3 }
 0x5b4   : > { %4058 = vst [vmem:[#allocation1 + $0x2] ss:$9 sm:$0xff] %v3785_v41  ;;  %v3628_v41 = vadd.f32 %v6617_v15, %v3478_v62 }
 0x5b5   : > { %4059 = vst [vmem:[#allocation1 + $0x3] ss:$9 sm:$0xff] %v3786_v55  ;;  %v3812_v55 = vperm.slane %v3580_v14, 5 }
 0x5b6   : > { %4060 = vst [vmem:[#allocation1 + $0x4] ss:$9 sm:$0xff] %v3787_v39  ;;  %3624 = vadd.xlane.f32.xlu1 %v3623_v23  ;;  %v3813_v39 = vperm.slane %v3580_v14, 6 }
 0x5b7   : > { %4061 = vst [vmem:[#allocation1 + $0x5] ss:$9 sm:$0xff] %v3788_v34  ;;  %v3044_v34 = vpop.f32.mrf.mxu1 }
 0x5b8   : > { %4062 = vst [vmem:[#allocation1 + $0x6] ss:$9 sm:$0xff] %v3789_v19  ;;  %4273 = vperm.xlu2 %5373, %v6744_v5   ;;  %v3798_v5 = vperm.slane %v3570_v54, 7  ;;  %v3814_v19 = vperm.slane %v3580_v14, 7  ;;  %v3045_v23 = vadd.f32 %v3044_v34, %v2956_v32  ;;  %v3816_v54 = vperm.slane %v3585_v10, 1 }
 0x5b9   : > { %4063 = vst [vmem:[#allocation1 + $0x7] ss:$9 sm:$0xff] %v3790_v30  ;;  %v3222_v30 = vpop.f32.mrf.mxu3  ;;  %v3829_v32 = vperm.slane %v3590_v58, 6  ;;  %v3830_v34 = vperm.slane %v3590_v58, 7 }
 0x5ba   : > { %v3134_v15 = vadd.f32 %v3133_v9, %v3045_v23  ;;  %v3831_v23 = vperm.slane %v6783_v37, 0 }
 0x5bc   : > { %v3223_v12 = vadd.f32 %v3222_v30, %v3134_v15  ;;  %v3832_v15 = vperm.slane %v6783_v37, 1 }
 0x5bf   : > { %v6775_v25 = vpop.f32.mrf.mxu1 }
 0x5c0   : > { %v6762_v44 = vld [vmem:[#allocation1] sm:$0xff] }
 0x5c1   : > { %4065 = vst [vmem:[#allocation1] ss:$9 sm:$0xff] %v3791_v7  ;;  %v6777_v7 = vpop.f32.mrf.mxu2 }
 0x5c2   : > { %4066 = vst [vmem:[#allocation1 + $0x1] ss:$9 sm:$0xff] %v3792_v22 }
 0x5c3   : > { %4067 = vst [vmem:[#allocation1 + $0x2] ss:$9 sm:$0xff] %v3793_v35  ;;  %v3819_v35 = vperm.slane %v3585_v10, 4 }
 0x5c4   : > { %4068 = vst [vmem:[#allocation1 + $0x3] ss:$9 sm:$0xff] %v3794_v57  ;;  %v3343_v57 = vmax.f32 %v3223_v12, 0.0 }
 0x5c5   : > { %4069 = vst [vmem:[#allocation1 + $0x4] ss:$9 sm:$0xff] %v3795_v13  ;;  %v3820_v13 = vperm.slane %v3585_v10, 5 }
 0x5c6   : > { %4070 = vst [vmem:[#allocation1 + $0x5] ss:$9 sm:$0xff] %v3796_v6  ;;  %v2960_v6 = vpop.f32.mrf.mxu0  ;;  %v3486_v31 = vmul.f32 %v6595_v11, %v3343_v57 }
 0x5c7   : > { %4071 = vst [vmem:[#allocation1 + $0x6] ss:$9 sm:$0xff] %v3797_v46  ;;  %v6781_v46 = vpop.f32.mrf.mxu3  ;;  %v3049_v21 = vpop.f32.mrf.mxu1 }
 0x5c8   : > { %4072 = vst [vmem:[#allocation1 + $0x7] ss:$9 sm:$0xff] %v3798_v5  ;;  %v3822_v5 = vperm.slane %v3585_v10, 7  ;;  %v2959_v10 = vadd.f32 %v6773_v40, %v6579_v50  ;;  %v3838_v40 = vperm.slane %v6783_v37, 7 }
 0x5cd   : > { %3634 = vadd.xlane.f32.xlu0 %v3633_v28  ;;  %v2961_v28 = vadd.f32 %v2960_v6, %v6579_v50 }
 0x5cf   : > { %v4073_v38 = vld [vmem:[#allocation1] sm:$0xff]  ;;  %4276 = vperm.xlu1 %5375, %v6751_v26   ;;  %v3808_v26 = vperm.slane %v3580_v14, 1  ;;  %v4262_v14 = vpop.permute.xlu1 %4261 }
 0x5d0   : > { %4074 = vst [vmem:[#allocation1] ss:$9 sm:$0xff] %v3799_v1  ;;  %v4350_v1 = vlaneseq }
 0x5d1   : > { %4075 = vst [vmem:[#allocation1 + $0x1] ss:$9 sm:$0xff] %v3800_v2  ;;  %v3138_v2 = vpop.f32.mrf.mxu2 }
 0x5d2   : > { %4076 = vst [vmem:[#allocation1 + $0x2] ss:$9 sm:$0xff] %v3801_v49  ;;  %v3050_v49 = vadd.f32 %v3049_v21, %v2961_v28  ;;  %v6788_v24 = vand.u32 127, %v4350_v1 }
 0x5d3   : > { %4077 = vst [vmem:[#allocation1 + $0x3] ss:$9 sm:$0xff] %v3802_v52  ;;  %v4256_v52 = vpop.permute.xlu2 %4255 }
 0x5d4   : > { %4078 = vst [vmem:[#allocation1 + $0x4] ss:$9 sm:$0xff] %v3803_v60  ;;  %v3139_v60 = vadd.f32 %v3138_v2, %v3050_v49  ;;  %v6793_v20 = vadd.s32 4294967288, %v6788_v24  ;;  %v6796_v53 = vadd.s32 4294967280, %v6788_v24  ;;  %v4352_v62 = vperm.slane %v4256_v52, %v6788_v24 }
 0x5d5   : > { %4079 = vst [vmem:[#allocation1 + $0x5] ss:$9 sm:$0xff] %v3804_v8  ;;  %v3823_v8 = vperm.slane %v3590_v58, 0 }
 0x5d6   : > { %4080 = vst [vmem:[#allocation1 + $0x6] ss:$9 sm:$0xff] %v3805_v33  ;;  %v3824_v33 = vperm.slane %v3590_v58, 1 }
 0x5d7   : > { %4081 = vst [vmem:[#allocation1 + $0x7] ss:$9 sm:$0xff] %v3806_v48  ;;  %v4259_v48 = vpop.permute.xlu0 %4258 }
 0x5db   : > { %v3600_v57 = vpop.xlane.xlu2 %3599 }
 0x5dc   : > { %v3841_v28 = vperm.slane %v3600_v57, 2  ;;  %v3843_v49 = vperm.slane %v3600_v57, 4  ;;  %v3845_v52 = vperm.slane %v3600_v57, 6 }
 0x5de   : > { %v6769_v17 = vld [vmem:[#allocation1] sm:$0xff] }
 0x5df   : > { %4083 = vst [vmem:[#allocation1] ss:$9 sm:$0xff] %v3807_v18  ;;  %v3825_v18 = vperm.slane %v3590_v58, 2 }
 0x5e0   : > { %4084 = vst [vmem:[#allocation1 + $0x1] ss:$9 sm:$0xff] %v3808_v26  ;;  %v3826_v26 = vperm.slane %v3590_v58, 3 }
 0x5e1   : > { %4085 = vst [vmem:[#allocation1 + $0x2] ss:$9 sm:$0xff] %v3809_v42  ;;  %4288 = vperm.xlu0 %5374, %v4073_v38   ;;  %3629 = vadd.xlane.f32.xlu2 %v3628_v41  ;;  %v3638_v38 = vadd.f32 %v6637_v0, %v3486_v31  ;;  %v3227_v0 = vpop.f32.mrf.mxu3  ;;  %v4354_v42 = vperm.slane %v4259_v48, %v6793_v20  ;;  %v3828_v41 = vperm.slane %v3590_v58, 5 }
 0x5e2   : > { %4086 = vst [vmem:[#allocation1 + $0x3] ss:$9 sm:$0xff] %v3810_v4  ;;  %v3228_v4 = vadd.f32 %v3227_v0, %v3139_v60  ;;  %v6832_v60 = vadd.s32 4294967264, %v6788_v24 }
 0x5e3   : > { %4087 = vst [vmem:[#allocation1 + $0x4] ss:$9 sm:$0xff] %v3811_v47  ;;  %v3827_v47 = vperm.slane %v3590_v58, 4  ;;  %v6824_v58 = vadd.s32 4294967272, %v6788_v24  ;;  %v4265_v31 = vpop.permute.xlu2 %4264 }
 0x5e4   : > { %4088 = vst [vmem:[#allocation1 + $0x5] ss:$9 sm:$0xff] %v3812_v55  ;;  %v4356_v55 = vsel %vm4355_vm1, %v4354_v42, %v4352_v62  ;;  %v3351_v9 = vmax.f32 %v3228_v4, 0.0  ;;  %v3605_v4 = vpop.xlane.xlu0 %3604 }
 0x5e5   : > { %4089 = vst [vmem:[#allocation1 + $0x6] ss:$9 sm:$0xff] %v3813_v39  ;;  %v4362_v2 = vperm.slane %v4265_v31, %v6824_v58 }
 0x5e6   : > { %4090 = vst [vmem:[#allocation1 + $0x7] ss:$9 sm:$0xff] %v3814_v19  ;;  %v3494_v19 = vmul.f32 %v6595_v11, %v3351_v9  ;;  %v6834_v48 = vpop.xlane.xlu1 %3609 }
 0x5e8   : > { %v3648_v30 = vadd.f32 %v6657_v29, %v3494_v19  ;;  %v3837_v29 = vperm.slane %v6783_v37, 6 }
 0x5eb   : > { %v4268_v62 = vpop.permute.xlu2 %4267 }
 0x5ec   : > { %v4366_v0 = vperm.slane %v4268_v62, %v6832_v60  ;;  %v3862_v62 = vperm.slane %v6834_v48, 7 }
 0x5ed   : > { %v6779_v22 = vld [vmem:[#allocation1] sm:$0xff] }
 0x5ee   : > { %4092 = vst [vmem:[#allocation1] ss:$9 sm:$0xff] %v3815_v45  ;;  %v3833_v45 = vperm.slane %v6783_v37, 2 }
 0x5ef   : > { %4093 = vst [vmem:[#allocation1 + $0x1] ss:$9 sm:$0xff] %v3816_v54  ;;  %v3834_v54 = vperm.slane %v6783_v37, 3 }
 0x5f0   : > { %4094 = vst [vmem:[#allocation1 + $0x2] ss:$9 sm:$0xff] %v3817_v61  ;;  %v3835_v61 = vperm.slane %v6783_v37, 4 }
 0x5f1   : > { %4095 = vst [vmem:[#allocation1 + $0x3] ss:$9 sm:$0xff] %v3818_v63  ;;  %v3836_v63 = vperm.slane %v6783_v37, 5  ;;  %v2963_v37 = vpop.f32.mrf.mxu0 }
 0x5f2   : > { %4096 = vst [vmem:[#allocation1 + $0x4] ss:$9 sm:$0xff] %v3819_v35  ;;  %v3048_v35 = vadd.f32 %v6775_v25, %v2959_v10  ;;  %v3840_v25 = vperm.slane %v3600_v57, 1  ;;  %v2964_v42 = vadd.f32 %v2963_v37, %v6579_v50 }
 0x5f3   : > { %4097 = vst [vmem:[#allocation1 + $0x5] ss:$9 sm:$0xff] %v3820_v13 }
 0x5f4   : > { %4098 = vst [vmem:[#allocation1 + $0x6] ss:$9 sm:$0xff] %v3821_v16  ;;  %v3137_v13 = vadd.f32 %v6777_v7, %v3048_v35  ;;  %v3839_v16 = vperm.slane %v3600_v57, 0  ;;  %v3842_v7 = vperm.slane %v3600_v57, 3  ;;  %v3853_v35 = vperm.slane %v3605_v4, 6 }
 0x5f5   : > { %4099 = vst [vmem:[#allocation1 + $0x7] ss:$9 sm:$0xff] %v3822_v5 }
 0x5f6   : > { %v3226_v6 = vadd.f32 %v6781_v46, %v3137_v13  ;;  %v3844_v46 = vperm.slane %v3600_v57, 5 }
 0x5f8   : > { %v3347_v5 = vmax.f32 %v3226_v6, 0.0 }
 0x5f9   : > { %3639 = vadd.xlane.f32.xlu1 %v3638_v38  ;;  %4282 = vperm.xlu2 %5373, %v6757_v56   ;;  %v4358_v56 = vperm.slane %v4262_v14, %v6796_v53  ;;  %v3141_v14 = vpop.f32.mrf.mxu2 }
 0x5fb   : > { %v4360_v39 = vsel %vm4359_vm2, %v4358_v56, %v4356_v55  ;;  %v6841_v56 = vpop.f32.mrf.mxu0 }
 0x5fc   : > { %v6799_v59 = vld [vmem:[#allocation1] sm:$0xff]  ;;  %v4364_v38 = vsel %vm4363_vm3, %v4362_v2, %v4360_v39  ;;  %v3848_v39 = vperm.slane %v3605_v4, 1 }
 0x5fd   : > { %4101 = vst [vmem:[#allocation1] ss:$9 sm:$0xff] %v3823_v8  ;;  %v3846_v8 = vperm.slane %v3600_v57, 7 }
 0x5fe   : > { %4102 = vst [vmem:[#allocation1 + $0x1] ss:$9 sm:$0xff] %v3824_v33  ;;  %v3052_v33 = vpop.f32.mrf.mxu1 }
 0x5ff   : > { %4103 = vst [vmem:[#allocation1 + $0x2] ss:$9 sm:$0xff] %v3825_v18  ;;  %v3053_v55 = vadd.f32 %v3052_v33, %v2964_v42  ;;  %v3861_v33 = vperm.slane %v6834_v48, 6 }
 0x600   : > { %4104 = vst [vmem:[#allocation1 + $0x3] ss:$9 sm:$0xff] %v3826_v26  ;;  %v4368_v26 = vsel %vm4367_vm4, %v4366_v0, %v4364_v38  ;;  %v3860_v38 = vperm.slane %v6834_v48, 5 }
 0x601   : > { %4105 = vst [vmem:[#allocation1 + $0x4] ss:$9 sm:$0xff] %v3827_v47  ;;  %v3230_v47 = vpop.f32.mrf.mxu3  ;;  %v3142_v9 = vadd.f32 %v3141_v14, %v3053_v55 }
 0x602   : > { %4106 = vst [vmem:[#allocation1 + $0x5] ss:$9 sm:$0xff] %v3828_v41  ;;  %v4271_v41 = vpop.permute.xlu1 %4270 }
 0x603   : > { %4107 = vst [vmem:[#allocation1 + $0x6] ss:$9 sm:$0xff] %v3829_v32  ;;  %v3847_v32 = vperm.slane %v3605_v4, 0 }
 0x604   : > { %4108 = vst [vmem:[#allocation1 + $0x7] ss:$9 sm:$0xff] %v3830_v34 }
 0x606   : > { %v6849_v19 = vpop.f32.mrf.mxu1 }
 0x609   : > { %v6856_v57 = vpop.f32.mrf.mxu3 }
 0x60b   : > { %v6812_v12 = vld [vmem:[#allocation1] sm:$0xff]  ;;  %3649 = vadd.xlane.f32.xlu0 %v3648_v30  ;;  %v3850_v30 = vperm.slane %v3605_v4, 3 }
 0x60c   : > { %4110 = vst [vmem:[#allocation1] ss:$9 sm:$0xff] %v3831_v23  ;;  %v6851_v23 = vpop.f32.mrf.mxu2 }
 0x60d   : > { %4111 = vst [vmem:[#allocation1 + $0x1] ss:$9 sm:$0xff] %v3832_v15  ;;  %v3849_v15 = vperm.slane %v3605_v4, 2 }
 0x60e   : > { %4112 = vst [vmem:[#allocation1 + $0x2] ss:$9 sm:$0xff] %v3833_v45  ;;  %v3851_v45 = vperm.slane %v3605_v4, 4  ;;  %v3057_v6 = vpop.f32.mrf.mxu1 }
 0x60f   : > { %4113 = vst [vmem:[#allocation1 + $0x3] ss:$9 sm:$0xff] %v3834_v54  ;;  %v3852_v54 = vperm.slane %v3605_v4, 5 }
 0x610   : > { %4114 = vst [vmem:[#allocation1 + $0x4] ss:$9 sm:$0xff] %v3835_v61  ;;  %v3231_v61 = vadd.f32 %v3230_v47, %v3142_v9 }
 0x611   : > { %4115 = vst [vmem:[#allocation1 + $0x5] ss:$9 sm:$0xff] %v3836_v63  ;;  %v2968_v63 = vpop.f32.mrf.mxu0 }
 0x612   : > { %4116 = vst [vmem:[#allocation1 + $0x6] ss:$9 sm:$0xff] %v3837_v29  ;;  %4285 = vperm.xlu1 %5375, %v6762_v44   ;;  %v3490_v44 = vmul.f32 %v6595_v11, %v3347_v5  ;;  %v3854_v29 = vperm.slane %v3605_v4, 7  ;;  %v3355_v13 = vmax.f32 %v3231_v61, 0.0  ;;  %v3620_v61 = vpop.xlane.xlu0 %3619 }
 0x613   : > { %4117 = vst [vmem:[#allocation1 + $0x7] ss:$9 sm:$0xff] %v3838_v40  ;;  %v2969_v40 = vadd.f32 %v2968_v63, %v6579_v50  ;;  %v3615_v14 = vpop.xlane.xlu2 %3614  ;;  %v6887_v63 = vadd.s32 4294967240, %v6788_v24 }
 0x614   : > { %v3643_v18 = vadd.f32 %v6649_v43, %v3490_v44  ;;  %v3498_v31 = vmul.f32 %v6595_v11, %v3355_v13  ;;  %v3859_v44 = vperm.slane %v6834_v48, 4  ;;  %v3865_v4 = vperm.slane %v3615_v14, 2 }
 0x615   : > { %v3058_v5 = vadd.f32 %v3057_v6, %v2969_v40  ;;  %v3867_v55 = vperm.slane %v3615_v14, 4  ;;  %v3873_v6 = vperm.slane %v3620_v61, 2 }
 0x61a   : > { %v6826_v21 = vld [vmem:[#allocation1] sm:$0xff] }
 0x61b   : > { %4119 = vst [vmem:[#allocation1] ss:$9 sm:$0xff] %v3839_v16  ;;  %v3146_v16 = vpop.f32.mrf.mxu2  ;;  %v4274_v42 = vpop.permute.xlu2 %4273 }
 0x61c   : > { %4120 = vst [vmem:[#allocation1 + $0x1] ss:$9 sm:$0xff] %v3840_v25  ;;  %v3855_v25 = vperm.slane %v6834_v48, 0  ;;  %v3147_v37 = vadd.f32 %v3146_v16, %v3058_v5  ;;  %v3875_v5 = vperm.slane %v3620_v61, 4 }
 0x61d   : > { %4121 = vst [vmem:[#allocation1 + $0x2] ss:$9 sm:$0xff] %v3841_v28  ;;  %v3856_v28 = vperm.slane %v6834_v48, 1 }
 0x61e   : > { %4122 = vst [vmem:[#allocation1 + $0x3] ss:$9 sm:$0xff] %v3842_v7  ;;  %v3857_v7 = vperm.slane %v6834_v48, 2 }
 0x61f   : > { %4123 = vst [vmem:[#allocation1 + $0x4] ss:$9 sm:$0xff] %v3843_v49  ;;  %4297 = vperm.xlu0 %5374, %v6799_v59   ;;  %v6844_v59 = vadd.s32 4294967256, %v6788_v24  ;;  %v3858_v49 = vperm.slane %v6834_v48, 3 }
 0x620   : > { %4124 = vst [vmem:[#allocation1 + $0x5] ss:$9 sm:$0xff] %v3844_v46  ;;  %v3235_v46 = vpop.f32.mrf.mxu3 }
 0x621   : > { %4125 = vst [vmem:[#allocation1 + $0x6] ss:$9 sm:$0xff] %v3845_v52  ;;  %v4370_v34 = vperm.slane %v4271_v41, %v6844_v59  ;;  %v3653_v52 = vadd.f32 %v6669_v51, %v3498_v31  ;;  %v3864_v51 = vperm.slane %v3615_v14, 1  ;;  %v3866_v41 = vperm.slane %v3615_v14, 3 }
 0x622   : > { %4126 = vst [vmem:[#allocation1 + $0x7] ss:$9 sm:$0xff] %v3846_v8  ;;  %3644 = vadd.xlane.f32.xlu2 %v3643_v18  ;;  %v3236_v8 = vadd.f32 %v3235_v46, %v3147_v37  ;;  %v3878_v31 = vperm.slane %v3620_v61, 7  ;;  %v2970_v37 = vpop.f32.mrf.mxu0 }
 0x623   : > { %v6854_v10 = vsel %vm4371_vm5, %v4370_v34, %v4368_v26  ;;  %v3863_v26 = vperm.slane %v3615_v14, 0  ;;  %v3869_v34 = vperm.slane %v3615_v14, 6 }
 0x624   : > { %v3363_v18 = vmax.f32 %v3236_v8, 0.0 }
 0x626   : > { %v3506_v0 = vmul.f32 %v6595_v11, %v3363_v18 }
 0x628   : > { %v3663_v48 = vadd.f32 %v6689_v27, %v3506_v0 }
 0x629   : > { %v6846_v43 = vld [vmem:[#allocation1] sm:$0xff] }
 0x62a   : > { %4128 = vst [vmem:[#allocation1] ss:$9 sm:$0xff] %v3847_v32 }
 0x62b   : > { %4129 = vst [vmem:[#allocation1 + $0x1] ss:$9 sm:$0xff] %v3848_v39  ;;  %v3868_v39 = vperm.slane %v3615_v14, 5 }
 0x62c   : > { %4130 = vst [vmem:[#allocation1 + $0x2] ss:$9 sm:$0xff] %v3849_v15  ;;  %v2966_v15 = vadd.f32 %v6841_v56, %v6579_v50  ;;  %v3872_v56 = vperm.slane %v3620_v61, 1 }
 0x62d   : > { %4131 = vst [vmem:[#allocation1 + $0x3] ss:$9 sm:$0xff] %v3850_v30  ;;  %v3870_v30 = vperm.slane %v3615_v14, 7  ;;  %v3059_v14 = vpop.f32.mrf.mxu1 }
 0x62e   : > { %4132 = vst [vmem:[#allocation1 + $0x4] ss:$9 sm:$0xff] %v3851_v45  ;;  %v3625_v45 = vpop.xlane.xlu1 %3624  ;;  %v3055_v27 = vadd.f32 %v6849_v19, %v2966_v15  ;;  %v3874_v19 = vperm.slane %v3620_v61, 3 }
 0x62f   : > { %4133 = vst [vmem:[#allocation1 + $0x5] ss:$9 sm:$0xff] %v3852_v54  ;;  %v3881_v46 = vperm.slane %v3625_v45, 2  ;;  %v3883_v8 = vperm.slane %v3625_v45, 4  ;;  %v3886_v0 = vperm.slane %v3625_v45, 7 }
 0x630   : > { %4134 = vst [vmem:[#allocation1 + $0x6] ss:$9 sm:$0xff] %v3853_v35  ;;  %v3144_v54 = vadd.f32 %v6851_v23, %v3055_v27 }
 0x631   : > { %4135 = vst [vmem:[#allocation1 + $0x7] ss:$9 sm:$0xff] %v3854_v29  ;;  %v3871_v29 = vperm.slane %v3620_v61, 0 }
 0x638   : > { %v6863_v2 = vld [vmem:[#allocation1] sm:$0xff] }
 0x639   : > { %4137 = vst [vmem:[#allocation1] ss:$9 sm:$0xff] %v3855_v25  ;;  %v3876_v25 = vperm.slane %v3620_v61, 5 }
 0x63a   : > { %4138 = vst [vmem:[#allocation1 + $0x1] ss:$9 sm:$0xff] %v3856_v28  ;;  %4291 = vperm.xlu2 %5373, %v6769_v17   ;;  %v6874_v17 = vadd.s32 4294967248, %v6788_v24 }
 0x63b   : > { %4139 = vst [vmem:[#allocation1 + $0x2] ss:$9 sm:$0xff] %v3857_v7  ;;  %v3879_v7 = vperm.slane %v3625_v45, 0 }
 0x63c   : > { %4140 = vst [vmem:[#allocation1 + $0x3] ss:$9 sm:$0xff] %v3858_v49  ;;  %3654 = vadd.xlane.f32.xlu1 %v3653_v52  ;;  %v4374_v32 = vperm.slane %v4274_v42, %v6874_v17  ;;  %v3882_v52 = vperm.slane %v3625_v45, 3  ;;  %v3237_v42 = vpop.f32.mrf.mxu3 }
 0x63d   : > { %4141 = vst [vmem:[#allocation1 + $0x4] ss:$9 sm:$0xff] %v3859_v44  ;;  %v3880_v44 = vperm.slane %v3625_v45, 1 }
 0x63e   : > { %4142 = vst [vmem:[#allocation1 + $0x5] ss:$9 sm:$0xff] %v3860_v38  ;;  %v4376_v9 = vsel %vm4375_vm6, %v4374_v32, %v6854_v10  ;;  %v3233_v10 = vadd.f32 %v6856_v57, %v3144_v54  ;;  %v3877_v57 = vperm.slane %v3620_v61, 6  ;;  %v2971_v38 = vadd.f32 %v2970_v37, %v6579_v50  ;;  %v4280_v50 = vpop.permute.xlu0 %4279 }
 0x63f   : > { %4143 = vst [vmem:[#allocation1 + $0x6] ss:$9 sm:$0xff] %v3861_v33  ;;  %v6904_v32 = vadd.s32 4294967224, %v6788_v24 }
 0x640   : > { %4144 = vst [vmem:[#allocation1 + $0x7] ss:$9 sm:$0xff] %v3862_v62  ;;  %v3359_v16 = vmax.f32 %v3233_v10, 0.0  ;;  %v3885_v62 = vperm.slane %v3625_v45, 6  ;;  %v3060_v18 = vadd.f32 %v3059_v14, %v2971_v38 }
 0x641   : > { %v4277_v35 = vpop.permute.xlu1 %4276 }
 0x642   : > { %v4378_v13 = vperm.slane %v4277_v35, %v6887_v63 }
 0x644   : > { %v4380_v23 = vsel %vm4379_vm7, %v4378_v13, %v4376_v9 }
 0x647   : > { %v6876_v47 = vld [vmem:[#allocation1] sm:$0xff] }
 0x648   : > { %4146 = vst [vmem:[#allocation1] ss:$9 sm:$0xff] %v3863_v26 }
 0x649   : > { %4147 = vst [vmem:[#allocation1 + $0x1] ss:$9 sm:$0xff] %v3864_v51  ;;  %3664 = vadd.xlane.f32.xlu0 %v3663_v48  ;;  %v6900_v51 = vadd.s32 4294967232, %v6788_v24 }
 0x64a   : > { %4148 = vst [vmem:[#allocation1 + $0x2] ss:$9 sm:$0xff] %v3865_v4 }
 0x64b   : > { %4149 = vst [vmem:[#allocation1 + $0x3] ss:$9 sm:$0xff] %v3866_v41  ;;  %v4382_v41 = vperm.slane %v4280_v50, %v6900_v51 }
 0x64c   : > { %4150 = vst [vmem:[#allocation1 + $0x4] ss:$9 sm:$0xff] %v3867_v55 }
 0x64d   : > { %4151 = vst [vmem:[#allocation1 + $0x5] ss:$9 sm:$0xff] %v3868_v39  ;;  %v4384_v9 = vsel %vm4383_vm8, %v4382_v41, %v4380_v23 }
 0x64e   : > { %4152 = vst [vmem:[#allocation1 + $0x6] ss:$9 sm:$0xff] %v3869_v34 }
 0x64f   : > { %4153 = vst [vmem:[#allocation1 + $0x7] ss:$9 sm:$0xff] %v3870_v30 }
 0x654   : > { %v3630_v33 = vpop.xlane.xlu2 %3629 }
 0x655   : > { %4294 = vperm.xlu1 %5375, %v6779_v22   ;;  %v3502_v22 = vmul.f32 %v6595_v11, %v3359_v16  ;;  %v3887_v48 = vperm.slane %v3630_v33, 0  ;;  %v3888_v55 = vperm.slane %v3630_v33, 1  ;;  %v3889_v34 = vperm.slane %v3630_v33, 2 }
 0x656   : > { %v4154_v40 = vld [vmem:[#allocation1] sm:$0xff]  ;;  %v3890_v30 = vperm.slane %v3630_v33, 3  ;;  %v3891_v54 = vperm.slane %v3630_v33, 4  ;;  %v3892_v61 = vperm.slane %v3630_v33, 5  ;;  %v3893_v10 = vperm.slane %v3630_v33, 6 }
 0x657   : > { %4155 = vst [vmem:[#allocation1] ss:$9 sm:$0xff] %v3871_v29  ;;  %v3658_v28 = vadd.f32 %v6677_v3, %v3502_v22  ;;  %v3148_v3 = vpop.f32.mrf.mxu2  ;;  %v3894_v29 = vperm.slane %v3630_v33, 7 }
 0x658   : > { %4156 = vst [vmem:[#allocation1 + $0x1] ss:$9 sm:$0xff] %v3872_v56  ;;  %v3149_v26 = vadd.f32 %v3148_v3, %v3060_v18 }
 0x659   : > { %4157 = vst [vmem:[#allocation1 + $0x2] ss:$9 sm:$0xff] %v3873_v6  ;;  %v3635_v6 = vpop.xlane.xlu0 %3634 }
 0x65a   : > { %4158 = vst [vmem:[#allocation1 + $0x3] ss:$9 sm:$0xff] %v3874_v19  ;;  %v3238_v4 = vadd.f32 %v3237_v42, %v3149_v26  ;;  %v6915_v19 = vadd.s32 4294967216, %v6788_v24  ;;  %v3895_v23 = vperm.slane %v3635_v6, 0  ;;  %v3896_v16 = vperm.slane %v3635_v6, 1 }
 0x65b   : > { %4159 = vst [vmem:[#allocation1 + $0x4] ss:$9 sm:$0xff] %v3875_v5  ;;  %v3902_v37 = vperm.slane %v3635_v6, 7 }
 0x65c   : > { %4160 = vst [vmem:[#allocation1 + $0x5] ss:$9 sm:$0xff] %v3876_v25  ;;  %v4283_v39 = vpop.permute.xlu2 %4282  ;;  %v3367_v27 = vmax.f32 %v3238_v4, 0.0 }
 0x65d   : > { %4161 = vst [vmem:[#allocation1 + $0x6] ss:$9 sm:$0xff] %v3877_v57  ;;  %4306 = vperm.xlu0 %5374, %v6846_v43   ;;  %v3884_v43 = vperm.slane %v3625_v45, 5  ;;  %v4386_v45 = vperm.slane %v4283_v39, %v6904_v32 }
 0x65e   : > { %4162 = vst [vmem:[#allocation1 + $0x7] ss:$9 sm:$0xff] %v3878_v31  ;;  %v3510_v56 = vmul.f32 %v6595_v11, %v3367_v27  ;;  %v3897_v11 = vperm.slane %v3635_v6, 2  ;;  %v3900_v31 = vperm.slane %v3635_v6, 5 }
 0x65f   : > { %v4388_v35 = vsel %vm4387_vm9, %v4386_v45, %v4384_v9 }
 0x660   : > { %v3668_v13 = vadd.f32 %v6696_v36, %v3510_v56  ;;  %v3899_v36 = vperm.slane %v3635_v6, 4 }
 0x661   : > { %v4289_v14 = vpop.permute.xlu0 %4288 }
 0x663   : > { %3659 = vadd.xlane.f32.xlu2 %v3658_v28  ;;  %v3901_v28 = vperm.slane %v3635_v6, 6 }
 0x665   : > { %v6896_v49 = vld [vmem:[#allocation1] sm:$0xff]  ;;  %4315 = vperm.xlu0 %5374, %v4154_v40  }
 0x666   : > { %4164 = vst [vmem:[#allocation1] ss:$9 sm:$0xff] %v3879_v7 }
 0x667   : > { %4165 = vst [vmem:[#allocation1 + $0x1] ss:$9 sm:$0xff] %v3880_v44 }
 0x668   : > { %4166 = vst [vmem:[#allocation1 + $0x2] ss:$9 sm:$0xff] %v3881_v46 }
 0x669   : > { %4167 = vst [vmem:[#allocation1 + $0x3] ss:$9 sm:$0xff] %v3882_v52 }
 0x66a   : > { %4168 = vst [vmem:[#allocation1 + $0x4] ss:$9 sm:$0xff] %v3883_v8 }
 0x66b   : > { %4169 = vst [vmem:[#allocation1 + $0x5] ss:$9 sm:$0xff] %v3884_v43 }
 0x66c   : > { %4170 = vst [vmem:[#allocation1 + $0x6] ss:$9 sm:$0xff] %v3885_v62  ;;  %v3640_v40 = vpop.xlane.xlu1 %3639 }
 0x66d   : > { %4171 = vst [vmem:[#allocation1 + $0x7] ss:$9 sm:$0xff] %v3886_v0  ;;  %v3904_v44 = vperm.slane %v3640_v40, 1  ;;  %v3905_v46 = vperm.slane %v3640_v40, 2  ;;  %v3906_v38 = vperm.slane %v3640_v40, 3  ;;  %v3907_v52 = vperm.slane %v3640_v40, 4 }
 0x66e   : > { %v3908_v8 = vperm.slane %v3640_v40, 5  ;;  %v3909_v33 = vperm.slane %v3640_v40, 6  ;;  %v3910_v43 = vperm.slane %v3640_v40, 7 }
 0x674   : > { %v6907_v15 = vld [vmem:[#allocation1] sm:$0xff] }
 0x675   : > { %4173 = vst [vmem:[#allocation1] ss:$9 sm:$0xff] %v3887_v48  ;;  %v6929_v48 = vadd.s32 4294967200, %v6788_v24 }
 0x676   : > { %4174 = vst [vmem:[#allocation1 + $0x1] ss:$9 sm:$0xff] %v3888_v55 }
 0x677   : > { %4175 = vst [vmem:[#allocation1 + $0x2] ss:$9 sm:$0xff] %v3889_v34 }
 0x678   : > { %4176 = vst [vmem:[#allocation1 + $0x3] ss:$9 sm:$0xff] %v3890_v30 }
 0x679   : > { %4177 = vst [vmem:[#allocation1 + $0x4] ss:$9 sm:$0xff] %v3891_v54 }
 0x67a   : > { %4178 = vst [vmem:[#allocation1 + $0x5] ss:$9 sm:$0xff] %v3892_v61 }
 0x67b   : > { %4179 = vst [vmem:[#allocation1 + $0x6] ss:$9 sm:$0xff] %v3893_v10  ;;  %4300 = vperm.xlu2 %5373, %v6812_v12   ;;  %v3898_v12 = vperm.slane %v3635_v6, 3 }
 0x67c   : > { %4180 = vst [vmem:[#allocation1 + $0x7] ss:$9 sm:$0xff] %v3894_v29 }
 0x67e   : > { %v3650_v30 = vpop.xlane.xlu0 %3649 }
 0x67f   : > { %3669 = vadd.xlane.f32.xlu1 %v3668_v13  ;;  %v3919_v45 = vperm.slane %v3650_v30, 0  ;;  %v3920_v27 = vperm.slane %v3650_v30, 1  ;;  %v3921_v61 = vperm.slane %v3650_v30, 2  ;;  %v3923_v10 = vperm.slane %v3650_v30, 4 }
 0x680   : > { %v3924_v29 = vperm.slane %v3650_v30, 5  ;;  %v3925_v56 = vperm.slane %v3650_v30, 6 }
 0x683   : > { %v4181_v5 = vld [vmem:[#allocation1] sm:$0xff]  ;;  %4309 = vperm.xlu2 %5373, %v6863_v2   ;;  %v3903_v2 = vperm.slane %v3640_v40, 0 }
 0x684   : > { %4182 = vst [vmem:[#allocation1] ss:$9 sm:$0xff] %v3895_v23  ;;  %4324 = vperm.xlu0 %5374, %v4181_v5   ;;  %v4286_v25 = vpop.permute.xlu1 %4285 }
 0x685   : > { %4183 = vst [vmem:[#allocation1 + $0x1] ss:$9 sm:$0xff] %v3896_v16  ;;  %v4390_v57 = vperm.slane %v4286_v25, %v6915_v19 }
 0x686   : > { %4184 = vst [vmem:[#allocation1 + $0x2] ss:$9 sm:$0xff] %v3897_v11 }
 0x687   : > { %4185 = vst [vmem:[#allocation1 + $0x3] ss:$9 sm:$0xff] %v3898_v12  ;;  %v4392_v22 = vsel %vm4391_vm10, %v4390_v57, %v4388_v35  ;;  %v3922_v35 = vperm.slane %v3650_v30, 3 }
 0x688   : > { %4186 = vst [vmem:[#allocation1 + $0x4] ss:$9 sm:$0xff] %v3899_v36  ;;  %v6935_v36 = vadd.s32 4294967192, %v6788_v24 }
 0x689   : > { %4187 = vst [vmem:[#allocation1 + $0x5] ss:$9 sm:$0xff] %v3900_v31 }
 0x68a   : > { %4188 = vst [vmem:[#allocation1 + $0x6] ss:$9 sm:$0xff] %v3901_v28 }
 0x68b   : > { %4189 = vst [vmem:[#allocation1 + $0x7] ss:$9 sm:$0xff] %v3902_v37  ;;  %4318 = vperm.xlu2 %5373, %v6896_v49   ;;  %v6923_v49 = vadd.s32 4294967208, %v6788_v24 }
 0x68d   : > { %v4394_v62 = vperm.slane %v4289_v14, %v6923_v49 }
 0x68f   : > { %v4396_v4 = vsel %vm4395_vm11, %v4394_v62, %v4392_v22 }
 0x692   : > { %v4190_v7 = vld [vmem:[#allocation1] sm:$0xff] }
 0x693   : > { %4191 = vst [vmem:[#allocation1] ss:$9 sm:$0xff] %v3903_v2  ;;  %4327 = vperm.xlu2 %5373, %v4190_v7   ;;  %v6940_v2 = vadd.s32 4294967184, %v6788_v24  ;;  %v4298_v7 = vpop.permute.xlu0 %4297 }
 0x694   : > { %4192 = vst [vmem:[#allocation1 + $0x1] ss:$9 sm:$0xff] %v3904_v44 }
 0x695   : > { %4193 = vst [vmem:[#allocation1 + $0x2] ss:$9 sm:$0xff] %v3905_v46  ;;  %v3645_v3 = vpop.xlane.xlu2 %3644  ;;  %v4406_v46 = vperm.slane %v4298_v7, %v6940_v2 }
 0x696   : > { %4194 = vst [vmem:[#allocation1 + $0x3] ss:$9 sm:$0xff] %v3906_v38  ;;  %v3911_v18 = vperm.slane %v3645_v3, 0  ;;  %v3912_v0 = vperm.slane %v3645_v3, 1  ;;  %v3913_v26 = vperm.slane %v3645_v3, 2  ;;  %v3914_v42 = vperm.slane %v3645_v3, 3 }
 0x697   : > { %4195 = vst [vmem:[#allocation1 + $0x4] ss:$9 sm:$0xff] %v3907_v52  ;;  %v3916_v41 = vperm.slane %v3645_v3, 5  ;;  %v3917_v55 = vperm.slane %v3645_v3, 6  ;;  %v3918_v39 = vperm.slane %v3645_v3, 7 }
 0x698   : > { %4196 = vst [vmem:[#allocation1 + $0x5] ss:$9 sm:$0xff] %v3908_v8  ;;  %4303 = vperm.xlu1 %5375, %v6826_v21   ;;  %v3915_v21 = vperm.slane %v3645_v3, 4 }
 0x699   : > { %4197 = vst [vmem:[#allocation1 + $0x6] ss:$9 sm:$0xff] %v3909_v33 }
 0x69a   : > { %4198 = vst [vmem:[#allocation1 + $0x7] ss:$9 sm:$0xff] %v3910_v43 }
 0x69d   : > { %v4292_v34 = vpop.permute.xlu2 %4291 }
 0x6a0   : > { %4312 = vperm.xlu1 %5375, %v6876_v47   ;;  %v4398_v47 = vperm.slane %v4292_v34, %v6929_v48 }
 0x6a1   : > { %v4199_v50 = vld [vmem:[#allocation1] sm:$0xff] }
 0x6a2   : > { %4200 = vst [vmem:[#allocation1] ss:$9 sm:$0xff] %v3911_v18  ;;  %v4400_v9 = vsel %vm4399_vm12, %v4398_v47, %v4396_v4 }
 0x6a3   : > { %4201 = vst [vmem:[#allocation1 + $0x1] ss:$9 sm:$0xff] %v3912_v0 }
 0x6a4   : > { %4202 = vst [vmem:[#allocation1 + $0x2] ss:$9 sm:$0xff] %v3913_v26 }
 0x6a5   : > { %4203 = vst [vmem:[#allocation1 + $0x3] ss:$9 sm:$0xff] %v3914_v42 }
 0x6a6   : > { %4204 = vst [vmem:[#allocation1 + $0x4] ss:$9 sm:$0xff] %v3915_v21 }
 0x6a7   : > { %4205 = vst [vmem:[#allocation1 + $0x5] ss:$9 sm:$0xff] %v3916_v41 }
 0x6a8   : > { %4206 = vst [vmem:[#allocation1 + $0x6] ss:$9 sm:$0xff] %v3917_v55  ;;  %4321 = vperm.xlu1 %5375, %v6907_v15   ;;  %v3926_v15 = vperm.slane %v3650_v30, 7 }
 0x6a9   : > { %4207 = vst [vmem:[#allocation1 + $0x7] ss:$9 sm:$0xff] %v3918_v39 }
 0x6af   : > { %v3655_v40 = vpop.xlane.xlu1 %3654 }
 0x6b0   : > { %v4208_v54 = vld [vmem:[#allocation1] sm:$0xff]  ;;  %4330 = vperm.xlu1 %5375, %v4199_v50   ;;  %v3927_v13 = vperm.slane %v3655_v40, 0  ;;  %v3928_v6 = vperm.slane %v3655_v40, 1  ;;  %v3929_v23 = vperm.slane %v3655_v40, 2  ;;  %v3930_v16 = vperm.slane %v3655_v40, 3 }
 0x6b1   : > { %4333 = vperm.xlu0 %5374, %v4208_v54   ;;  %4209 = vst [vmem:[#allocation1] ss:$9 sm:$0xff] %v3919_v45  ;;  %v3931_v11 = vperm.slane %v3655_v40, 4  ;;  %v3932_v25 = vperm.slane %v3655_v40, 5  ;;  %v3933_v12 = vperm.slane %v3655_v40, 6  ;;  %v3934_v57 = vperm.slane %v3655_v40, 7 }
 0x6b2   : > { %4210 = vst [vmem:[#allocation1 + $0x1] ss:$9 sm:$0xff] %v3920_v27 }
 0x6b3   : > { %4211 = vst [vmem:[#allocation1 + $0x2] ss:$9 sm:$0xff] %v3921_v61 }
 0x6b4   : > { %4212 = vst [vmem:[#allocation1 + $0x3] ss:$9 sm:$0xff] %v3922_v35 }
 0x6b5   : > { %4213 = vst [vmem:[#allocation1 + $0x4] ss:$9 sm:$0xff] %v3923_v10 }
 0x6b6   : > { %4214 = vst [vmem:[#allocation1 + $0x5] ss:$9 sm:$0xff] %v3924_v29 }
 0x6b7   : > { %4215 = vst [vmem:[#allocation1 + $0x6] ss:$9 sm:$0xff] %v3925_v56 }
 0x6b8   : > { %4216 = vst [vmem:[#allocation1 + $0x7] ss:$9 sm:$0xff] %v3926_v15 }
 0x6bc   : > { %v3665_v0 = vpop.xlane.xlu0 %3664 }
 0x6bd   : > { %v3943_v26 = vperm.slane %v3665_v0, 0  ;;  %v3944_v50 = vperm.slane %v3665_v0, 1  ;;  %v3945_v4 = vperm.slane %v3665_v0, 2  ;;  %v3946_v21 = vperm.slane %v3665_v0, 3 }
 0x6be   : > { %v3947_v41 = vperm.slane %v3665_v0, 4  ;;  %v3948_v55 = vperm.slane %v3665_v0, 5  ;;  %v3949_v39 = vperm.slane %v3665_v0, 6  ;;  %v3950_v34 = vperm.slane %v3665_v0, 7 }
 0x6bf   : > { %v4217_v5 = vld [vmem:[#allocation1] sm:$0xff] }
 0x6c0   : > { %4336 = vperm.xlu2 %5373, %v4217_v5   ;;  %4218 = vst [vmem:[#allocation1] ss:$9 sm:$0xff] %v3927_v13 }
 0x6c1   : > { %4219 = vst [vmem:[#allocation1 + $0x1] ss:$9 sm:$0xff] %v3928_v6 }
 0x6c2   : > { %4220 = vst [vmem:[#allocation1 + $0x2] ss:$9 sm:$0xff] %v3929_v23 }
 0x6c3   : > { %4221 = vst [vmem:[#allocation1 + $0x3] ss:$9 sm:$0xff] %v3930_v16 }
 0x6c4   : > { %4222 = vst [vmem:[#allocation1 + $0x4] ss:$9 sm:$0xff] %v3931_v11 }
 0x6c5   : > { %4223 = vst [vmem:[#allocation1 + $0x5] ss:$9 sm:$0xff] %v3932_v25 }
 0x6c6   : > { %4224 = vst [vmem:[#allocation1 + $0x6] ss:$9 sm:$0xff] %v3933_v12 }
 0x6c7   : > { %4225 = vst [vmem:[#allocation1 + $0x7] ss:$9 sm:$0xff] %v3934_v57  ;;  %v4295_v31 = vpop.permute.xlu1 %4294 }
 0x6c8   : > { %v4402_v22 = vperm.slane %v4295_v31, %v6935_v36 }
 0x6ca   : > { %v4404_v28 = vsel %vm4403_vm13, %v4402_v22, %v4400_v9 }
 0x6cb   : > { %v6944_v14 = vsel %vm4407_vm14, %v4406_v46, %v4404_v28 }
 0x6ce   : > { %v4226_v37 = vld [vmem:[#allocation1] sm:$0xff] }
 0x6cf   : > { %4339 = vperm.xlu1 %5375, %v4226_v37   ;;  %v4307_v13 = vpop.permute.xlu0 %4306 }
 0x6d0   : > { %v4414_v11 = vperm.slane %v4307_v13, %v6793_v20 }
 0x6d6   : > { %v3660_v44 = vpop.xlane.xlu2 %3659 }
 0x6d7   : > { %v3935_v38 = vperm.slane %v3660_v44, 0  ;;  %v3936_v52 = vperm.slane %v3660_v44, 1  ;;  %v3937_v8 = vperm.slane %v3660_v44, 2  ;;  %v3938_v33 = vperm.slane %v3660_v44, 3  ;;  %v4316_v16 = vpop.permute.xlu0 %4315 }
 0x6d8   : > { %v3939_v43 = vperm.slane %v3660_v44, 4  ;;  %v3940_v3 = vperm.slane %v3660_v44, 5  ;;  %v3941_v62 = vperm.slane %v3660_v44, 6  ;;  %v3942_v18 = vperm.slane %v3660_v44, 7 }
 0x6d9   : > { %4227 = vst [vmem:[#allocation1] ss:$9 sm:$0xff] %v3935_v38  ;;  %v4420_v44 = vperm.slane %v4316_v16, %v6832_v60 }
 0x6da   : > { %4228 = vst [vmem:[#allocation1 + $0x1] ss:$9 sm:$0xff] %v3936_v52 }
 0x6db   : > { %4229 = vst [vmem:[#allocation1 + $0x2] ss:$9 sm:$0xff] %v3937_v8 }
 0x6dc   : > { %4230 = vst [vmem:[#allocation1 + $0x3] ss:$9 sm:$0xff] %v3938_v33 }
 0x6dd   : > { %4231 = vst [vmem:[#allocation1 + $0x4] ss:$9 sm:$0xff] %v3939_v43 }
 0x6de   : > { %4232 = vst [vmem:[#allocation1 + $0x5] ss:$9 sm:$0xff] %v3940_v3  ;;  %v4301_v15 = vpop.permute.xlu2 %4300 }
 0x6df   : > { %4233 = vst [vmem:[#allocation1 + $0x6] ss:$9 sm:$0xff] %v3941_v62 }
 0x6e0   : > { %4234 = vst [vmem:[#allocation1 + $0x7] ss:$9 sm:$0xff] %v3942_v18 }
 0x6e6   : > { %v4310_v6 = vpop.permute.xlu2 %4309 }
 0x6e7   : > { %v4235_v42 = vld [vmem:[#allocation1] sm:$0xff]  ;;  %v4416_v22 = vperm.slane %v4310_v6, %v6796_v53 }
 0x6e8   : > { %4342 = vperm.xlu0 %5374, %v4235_v42   ;;  %4236 = vst [vmem:[#allocation1] ss:$9 sm:$0xff] %v3943_v26 }
 0x6e9   : > { %4237 = vst [vmem:[#allocation1 + $0x1] ss:$9 sm:$0xff] %v3944_v50 }
 0x6ea   : > { %4238 = vst [vmem:[#allocation1 + $0x2] ss:$9 sm:$0xff] %v3945_v4 }
 0x6eb   : > { %4239 = vst [vmem:[#allocation1 + $0x3] ss:$9 sm:$0xff] %v3946_v21 }
 0x6ec   : > { %4240 = vst [vmem:[#allocation1 + $0x4] ss:$9 sm:$0xff] %v3947_v41 }
 0x6ed   : > { %4241 = vst [vmem:[#allocation1 + $0x5] ss:$9 sm:$0xff] %v3948_v55 }
 0x6ee   : > { %4242 = vst [vmem:[#allocation1 + $0x6] ss:$9 sm:$0xff] %v3949_v39  ;;  %v4319_v25 = vpop.permute.xlu2 %4318 }
 0x6ef   : > { %4243 = vst [vmem:[#allocation1 + $0x7] ss:$9 sm:$0xff] %v3950_v34  ;;  %v4422_v20 = vperm.slane %v4319_v25, %v6844_v59 }
 0x6f2   : > { %v3670_v47 = vpop.xlane.xlu1 %3669 }
 0x6f3   : > { %v3951_v9 = vperm.slane %v3670_v47, 0  ;;  %v3952_v30 = vperm.slane %v3670_v47, 1  ;;  %v3953_v45 = vperm.slane %v3670_v47, 2  ;;  %v3954_v27 = vperm.slane %v3670_v47, 3 }
 0x6f4   : > { %v3955_v61 = vperm.slane %v3670_v47, 4  ;;  %v3956_v35 = vperm.slane %v3670_v47, 5  ;;  %v3957_v10 = vperm.slane %v3670_v47, 6  ;;  %v3958_v29 = vperm.slane %v3670_v47, 7 }
 0x6f6   : > { %v4244_v54 = vld [vmem:[#allocation1] sm:$0xff]  ;;  %v4325_v28 = vpop.permute.xlu0 %4324  ;;  %v4328_v52 = vpop.permute.xlu2 %4327 }
 0x6f7   : > { %4345 = vperm.xlu2 %5373, %v4244_v54   ;;  %4245 = vst [vmem:[#allocation1] ss:$9 sm:$0xff] %v3951_v9  ;;  %v4426_v43 = vperm.slane %v4325_v28, %v6887_v63  ;;  %v4428_v62 = vperm.slane %v4328_v52, %v6900_v51  ;;  %v4409_v51 = vadd.s32 4294967176, %v6788_v24 }
 0x6f8   : > { %4246 = vst [vmem:[#allocation1 + $0x1] ss:$9 sm:$0xff] %v3952_v30 }
 0x6f9   : > { %4247 = vst [vmem:[#allocation1 + $0x2] ss:$9 sm:$0xff] %v3953_v45  ;;  %v4410_v47 = vperm.slane %v4301_v15, %v4409_v51 }
 0x6fa   : > { %4248 = vst [vmem:[#allocation1 + $0x3] ss:$9 sm:$0xff] %v3954_v27 }
 0x6fb   : > { %4249 = vst [vmem:[#allocation1 + $0x4] ss:$9 sm:$0xff] %v3955_v61  ;;  %v4412_v9 = vsel %vm4411_vm15, %v4410_v47, %v6944_v14 }
 0x6fc   : > { %4250 = vst [vmem:[#allocation1 + $0x5] ss:$9 sm:$0xff] %v3956_v35 }
 0x6fd   : > { %4251 = vst [vmem:[#allocation1 + $0x6] ss:$9 sm:$0xff] %v3957_v10 }
 0x6fe   : > { %4252 = vst [vmem:[#allocation1 + $0x7] ss:$9 sm:$0xff] %v3958_v29 }
 0x705   : > { %v4253_v56 = vld [vmem:[#allocation1] sm:$0xff] }
 0x706   : > { %4348 = vperm.xlu1 %5375, %v4253_v56  }
 0x70a   : > { %v4304_v40 = vpop.permute.xlu1 %4303 }
 0x70b   : > { %v4413_v5 = vperm.slane %v4304_v40, %v6788_v24 }
 0x70d   : > { %v4415_v12 = vsel %vm4355_vm1, %v4414_v11, %v4413_v5  ;;  %vm4450_vm1 = vcmp.lt.s32.totalorder %v4350_v1, 256 }
 0x70e   : > { %v4417_v37 = vsel %vm4359_vm2, %v4416_v22, %v4415_v12 }
 0x712   : > { %v4313_v23 = vpop.permute.xlu1 %4312 }
 0x713   : > { %v4418_v57 = vperm.slane %v4313_v23, %v6824_v58 }
 0x715   : > { %v4419_v7 = vsel %vm4363_vm3, %v4418_v57, %v4417_v37 }
 0x716   : > { %v4421_v46 = vsel %vm4367_vm4, %v4420_v44, %v4419_v7 }
 0x717   : > { %v4423_v58 = vsel %vm4371_vm5, %v4422_v20, %v4421_v46 }
 0x71a   : > { %v4322_v31 = vpop.permute.xlu1 %4321  ;;  %v4337_v18 = vpop.permute.xlu2 %4336 }
 0x71b   : > { %v4424_v38 = vperm.slane %v4322_v31, %v6874_v17  ;;  %v4434_v4 = vperm.slane %v4337_v18, %v6923_v49 }
 0x71d   : > { %v4425_v53 = vsel %vm4375_vm6, %v4424_v38, %v4423_v58 }
 0x71e   : > { %v4427_v3 = vsel %vm4379_vm7, %v4426_v43, %v4425_v53 }
 0x71f   : > { %v4429_v17 = vsel %vm4383_vm8, %v4428_v62, %v4427_v3 }
 0x722   : > { %v4331_v8 = vpop.permute.xlu1 %4330 }
 0x723   : > { %v4334_v33 = vpop.permute.xlu0 %4333  ;;  %v4430_v60 = vperm.slane %v4331_v8, %v6904_v32 }
 0x724   : > { %v4432_v26 = vperm.slane %v4334_v33, %v6915_v19 }
 0x725   : > { %v4431_v59 = vsel %vm4387_vm9, %v4430_v60, %v4429_v17 }
 0x726   : > { %v4433_v42 = vsel %vm4391_vm10, %v4432_v26, %v4431_v59 }
 0x727   : > { %v4435_v21 = vsel %vm4395_vm11, %v4434_v4, %v4433_v42 }
 0x741   : > { %v4340_v0 = vpop.permute.xlu1 %4339 }
 0x742   : > { %v4436_v63 = vperm.slane %v4340_v0, %v6929_v48 }
 0x744   : > { %v4437_v55 = vsel %vm4399_vm12, %v4436_v63, %v4435_v21 }
 0x751   : > { %v4346_v41 = vpop.permute.xlu2 %4345 }
 0x752   : > { %v4440_v39 = vperm.slane %v4346_v41, %v6940_v2 }
 0x75a   : > { %v4343_v50 = vpop.permute.xlu0 %4342 }
 0x75b   : > { %v4438_v32 = vperm.slane %v4343_v50, %v6935_v36 }
 0x75d   : > { %v4439_v19 = vsel %vm4403_vm13, %v4438_v32, %v4437_v55 }
 0x75e   : > { %v4441_v49 = vsel %vm4407_vm14, %v4440_v39, %v4439_v19 }
 0x778   : > { %v4349_v34 = vpop.permute.xlu1 %4348 }
 0x779   : > { %v4442_v48 = vperm.slane %v4349_v34, %v4409_v51 }
 0x77b   : > { %v4443_v36 = vsel %vm4411_vm15, %v4442_v48, %v4441_v49 }
 0x77c   : > { %v4444_v24 = vrot.slane %v4443_v36, 7 }
 0x77e   : > { %v4446_v30 = vsel %vm4445_vm0, %v4412_v9, %v4444_v24 }
 0x77f   : > { %4452 = vst.msk [vmem:[%s268_s10] sm:$0x3] %vm4450_vm1, %v4446_v30 }
 0x780 PF: > { %s17_s21 = sadd.s32 1, %s5417_s21  }
 0x781   : > { %p14_p8 = scmp.ge.s32.totalorder %s17_s21, 4  }
 0x783   :  { %16 = sbr.rel (!%p14_p8) target bundleno = 1 (0x1), region = 86 }
 0x788   :  { %4473 = vsyncpa [#allocation3], 1 }
 0x789   :  { %4475 = vsyncpa [#allocation3 + $0x1], 1 }

</bundles_post_ra>
